<compile_context>
chip_gen: v6e
topology: v6e:2x2x1
jax: 0.10.0
libtpu: 0.0.40
codegen_flags: <defaults>
</compile_context>

<pallas_src>
import functools
import math

import jax
import jax.numpy as jnp
from jax.experimental import pallas as pl
from jax.experimental.pallas import tpu as pltpu

LN_EPS = 1e-5
NEG_INF = -1e30

# ordered weight names fed to the kernel (stacked along a leading layer axis)
WKEYS = [
    "sWq", "sbq", "sWk", "sbk", "sWv", "sbv", "sWo", "sbo",   # self-attn
    "cWq", "cbq", "cWk", "cbk", "cWv", "cbv", "cWo", "cbo",   # cross-attn
    "W1", "b1", "W2", "b2",                                   # FFN
    "g1", "be1", "g2", "be2", "g3", "be3",                    # LayerNorms
]
MATMUL_KEYS = frozenset(
    ["sWq", "sWk", "sWv", "sWo", "cWq", "cWk", "cWv", "cWo", "W1", "W2"])
FFN_KEYS = frozenset(["W1", "b1", "W2", "b2"])


def _round_up(x, m):
    return ((x + m - 1) // m) * m


def _cdiv(a, b):
    return (a + b - 1) // b


# ---------------------------------------------------------------------------
# in-kernel math helpers
# ---------------------------------------------------------------------------
def _layer_norm(x, g, b):
    mu = jnp.mean(x, axis=-1, keepdims=True)
    var = jnp.mean((x - mu) ** 2, axis=-1, keepdims=True)
    return (x - mu) * jax.lax.rsqrt(var + LN_EPS) * g + b


def _mha(x_bf, kv_bf, Bb, Tq, Tk, head_masks,
         Wq, bq, Wk, bk, Wv, bv, Wo, bo, nhead, key_bias):
    """PyTorch-style MultiheadAttention (eval mode, optional key-padding bias).

    x_bf:  (Bb*Tq, D) bf16 queries input
    kv_bf: (Bb*Tk, D) bf16 keys/values input
    Full-width bf16 projections with f32 accumulation; per-head attention via
    lane masks + batched 3-D einsums (heads never sliced out of the lane dim);
    context stays one lane-dense (Bb*Tq, D) slab -> single Wo matmul.

    Returns (out, Q, K, V, p_list, s_list) with p/s per head, each (Bb,Tq,Tk).
    """
    D = Wq.shape[0]
    dh = D // nhead
    scale = 1.0 / math.sqrt(dh)
    bf16 = jnp.bfloat16

    # full-width projections: single MXU matmuls, f32 accumulation
    Q = jnp.dot(x_bf, Wq, preferred_element_type=jnp.float32) + bq   # (Bb*Tq, D)
    K = jnp.dot(kv_bf, Wk, preferred_element_type=jnp.float32) + bk  # (Bb*Tk, D)
    V = jnp.dot(kv_bf, Wv, preferred_element_type=jnp.float32) + bv  # (Bb*Tk, D)

    # leading-dim splits only (free): (Bb, T, D)
    Qb = Q.reshape(Bb, Tq, D).astype(bf16)
    Kb = K.reshape(Bb, Tk, D).astype(bf16)
    Vb = V.reshape(Bb, Tk, D).astype(bf16)

    ctx = jnp.zeros((Bb, Tq, D), jnp.float32)
    p_list, s_list = [], []
    for h in range(nhead):
        mh = head_masks[h]                                    # (1, D) bf16
        # masking K restricts the contraction to head h's dh lanes; at dh<128
        # the MXU pass count equals a true dh-deep contraction.
        # TODO(synk): slot_attention_scores include the 1/sqrt(dh) scaling
        # (softmax-input logits); drop `* scale` if raw QK^T is expected.
        s = jnp.einsum("bqd,bkd->bqk", Qb, Kb * mh,
                       preferred_element_type=jnp.float32) * scale   # (Bb,Tq,Tk)
        if key_bias is not None:
            s = s + key_bias                                  # (1, Tk) broadcast
        m = jnp.max(s, axis=-1, keepdims=True)
        e = jnp.exp(s - m)
        p = e / jnp.sum(e, axis=-1, keepdims=True)            # exact softmax
        # masking V keeps only head h's output columns -> sum over heads is the
        # concatenated context, assembled directly as a lane-dense (Bb,Tq,D) slab
        ctx = ctx + jnp.einsum("bqk,bkd->bqd", p.astype(bf16), Vb * mh,
                               preferred_element_type=jnp.float32)
        p_list.append(p)
        s_list.append(s)

    out = jnp.dot(ctx.reshape(Bb * Tq, D).astype(bf16), Wo,
                  preferred_element_type=jnp.float32) + bo
    return out, Q, K, V, p_list, s_list


# ---------------------------------------------------------------------------
# fused decoder-stack kernel: grid = (batch_blocks, layer)
# ---------------------------------------------------------------------------
def _decoder_stack_kernel(nhead, has_final_norm, Bb, Tp, Sp, T_valid, S_valid,
                          *refs):
    (tgt_ref, mem_ref,
     sWq, sbq, sWk, sbk, sWv, sbv, sWo, sbo,
     cWq, cbq, cWk, cbk, cWv, cbv, cWo, cbo,
     W1, b1, W2, b2,
     g1, be1, g2, be2, g3, be3,
     fng, fnb,
     out_ref, q_ref, k_ref, sv_ref, assign_ref, attn_ref,
     x_scr) = refs

    layer = pl.program_id(1)
    last = pl.num_programs(1) - 1
    bf16 = jnp.bfloat16
    D = x_scr.shape[-1]
    dh = D // nhead

    # per-head lane masks (static), shared by self- and cross-attention
    lane = jax.lax.broadcasted_iota(jnp.int32, (1, D), 1)
    head_masks = [((lane >= h * dh) & (lane < (h + 1) * dh)).astype(bf16)
                  for h in range(nhead)]

    # static key-padding biases (only if the wrapper actually padded T / S)
    if Tp != T_valid:
        tpos = jax.lax.broadcasted_iota(jnp.int32, (1, Tp), 1)
        t_bias = jnp.where(tpos < T_valid, 0.0, NEG_INF).astype(jnp.float32)
    else:
        t_bias = None
    if Sp != S_valid:
        spos = jax.lax.broadcasted_iota(jnp.int32, (1, Sp), 1)
        s_bias = jnp.where(spos < S_valid, 0.0, NEG_INF).astype(jnp.float32)
    else:
        s_bias = None

    # load the original tgt into the resident activation at the first layer
    @pl.when(layer == 0)
    def _():
        x_scr[...] = tgt_ref[...].reshape(Bb * Tp, D)

    x = x_scr[...]                                            # (Bb*Tp, D) f32
    mem_bf = mem_ref[...].reshape(Bb * Sp, D).astype(bf16)    # (Bb*Sp, D) bf16

    # --- self attention + add & norm ---
    xb = x.astype(bf16)                                       # cast hoisted
    sa = _mha(xb, xb, Bb, Tp, Tp, head_masks,
              sWq[...], sbq[...], sWk[...], sbk[...], sWv[...], sbv[...],
              sWo[...], sbo[...], nhead, t_bias)[0]
    x = _layer_norm(x + sa, g1[...], be1[...])

    # --- cross attention (memory) + aux outputs + add & norm ---
    xb = x.astype(bf16)
    ca, Qc, Kc, Vc, p_list, s_list = _mha(
        xb, mem_bf, Bb, Tp, Sp, head_masks,
        cWq[...], cbq[...], cWk[...], cbk[...], cWv[...], cbv[...],
        cWo[...], cbo[...], nhead, s_bias)

    # slot/aux outputs written ONLY at the last layer (head averaging done
    # inside the pl.when so it is skipped at runtime for earlier layers).
    @pl.when(layer == last)
    def _():
        inv_h = 1.0 / nhead
        q_ref[...] = Qc.reshape(Bb, Tp, D)
        k_ref[...] = Kc.reshape(Bb, Sp, D)
        sv_ref[...] = Vc.reshape(Bb, Sp, D)
        p_avg = p_list[0]
        s_avg = s_list[0]
        for h in range(1, nhead):
            p_avg = p_avg + p_list[h]
            s_avg = s_avg + s_list[h]
        assign_ref[...] = p_avg * inv_h
        attn_ref[...] = s_avg * inv_h

    x = _layer_norm(x + ca, g2[...], be2[...])

    # --- feed-forward + add & norm ---
    xb = x.astype(bf16)
    h = jnp.maximum(
        jnp.dot(xb, W1[...], preferred_element_type=jnp.float32) + b1[...], 0.0)
    ff = jnp.dot(h.astype(bf16), W2[...],
                 preferred_element_type=jnp.float32) + b2[...]
    x = _layer_norm(x + ff, g3[...], be3[...])

    # carry the activation to the next layer in VMEM (no HBM round trip)
    x_scr[...] = x

    # final layer: optional fused final LayerNorm + single output writeback
    @pl.when(layer == last)
    def _():
        xo = _layer_norm(x, fng[...], fnb[...]) if has_final_norm else x
        out_ref[...] = xo.reshape(Bb, Tp, D)


# ---------------------------------------------------------------------------
# generation-aware VMEM budget
# ---------------------------------------------------------------------------
def _vmem_limit_bytes():
    cap = None
    try:
        info = pltpu.get_tpu_info()
        cap = getattr(info, "vmem_capacity_bytes", None)
    except Exception:
        cap = None
    if not cap:
        return 64 * 1024 * 1024          # conservative default
    # ~85% of physical per-core VMEM: ~108 MiB on v5e/v6e, ~54 MiB on v7x
    return int(cap * 0.85)


# ---------------------------------------------------------------------------
# wrapper: one pallas_call for the whole stack
# ---------------------------------------------------------------------------
def transformer_decoder(tgt, memory, layer_params, final_norm, nhead,
                        *, batch_block=None,
                        single_buffer_ffn_weights=None,
                        single_buffer_outputs=None):
    """Mirrors TransformerDecoder.forward.

    Layers are chained (layer i consumes layer i-1's output -- the standard
    nn.TransformerDecoder behaviour and the evident intent of the reference,
    whose `output`/`outputs` line is a typo), the slot/aux outputs come from the
    LAST layer's cross-attention, and the optional final LayerNorm is applied
    to the chained output only.

    One pallas_call, grid=(B/Bb, L): the activation for a Bb-sized batch block
    stays resident in VMEM scratch across the layer axis, per-layer weights are
    streamed in (stacked along a leading L axis) once per batch block, and only
    the last layer writes outputs to HBM.
    """
    B, T, D = tgt.shape
    S = memory.shape[1]
    L = len(layer_params)
    dff = int(layer_params[0]["W1"].shape[1])
    assert D % nhead == 0

    # lane/sublane-dense padding: S -> multiple of 128 (lane dim of the (T,S)
    # outputs and the attention N-dim), T -> multiple of 8 (sublane dim)
    Tp = _round_up(T, 8)
    Sp = _round_up(S, 128)

    # batch blocking (keep >= 2 batch steps so both v7x TensorCores get work)
    if batch_block is None:
        Bb = max(1, min(8, B))
        if B > 1 and _cdiv(B, Bb) < 2:
            Bb = _cdiv(B, 2)
    else:
        Bb = max(1, min(int(batch_block), B))
    nb = _cdiv(B, Bb)
    Bpad = nb * Bb

    tgt_p = jnp.pad(tgt.astype(jnp.float32),
                    ((0, Bpad - B), (0, Tp - T), (0, 0)))
    mem_p = jnp.pad(memory.astype(jnp.float32),
                    ((0, Bpad - B), (0, Sp - S), (0, 0)))

    # stack weights along a new leading layer axis; matmul weights in bf16
    stacked = []
    for name in WKEYS:
        w = jnp.stack([p[name] for p in layer_params], axis=0)
        if name in MATMUL_KEYS:
            w = w.astype(jnp.bfloat16)
        stacked.append(w)

    has_final_norm = final_norm is not None
    if has_final_norm:
        fng, fnb = final_norm
    else:
        fng = jnp.ones((1, D), jnp.float32)
        fnb = jnp.zeros((1, D), jnp.float32)

    vmem_limit = _vmem_limit_bytes()
    wb_layer = sum(int(w.size) * w.dtype.itemsize for w in stacked) // max(L, 1)
    out_block_bytes = 4 * Bb * (2 * Tp * D + 2 * Sp * D + 2 * Tp * Sp)
    if single_buffer_ffn_weights is None:
        # selective single-buffering of the FFN weights (~half the per-layer
        # bytes) only when full double-buffering would crowd the VMEM budget
        # (mainly v7x at realistic d_model/d_ff); attention weights stay
        # double-buffered so their prefetch overlaps the previous layer's FFN.
        single_buffer_ffn_weights = (2 * wb_layer) > (vmem_limit // 2)
    if single_buffer_outputs is None:
        # outputs are written once per batch block -> double-buffering them
        # buys little; drop to 1 buffer when VMEM is tight (v7x).
        single_buffer_outputs = (2 * wb_layer + out_block_bytes) > int(0.75 * vmem_limit)

    def _wspec(name, shape):
        nrest = len(shape) - 1
        block = (None,) + tuple(shape[1:])
        imap = lambda b, l, _n=nrest: (l,) + (0,) * _n
        if single_buffer_ffn_weights and name in FFN_KEYS:
            return pl.BlockSpec(block, imap, pipeline_mode=pl.Buffered(1))
        return pl.BlockSpec(block, imap)

    def _ospec(block, imap):
        if single_buffer_outputs:
            return pl.BlockSpec(block, imap, pipeline_mode=pl.Buffered(1))
        return pl.BlockSpec(block, imap)

    in_specs = [
        pl.BlockSpec((Bb, Tp, D), lambda b, l: (b, 0, 0)),    # tgt block
        pl.BlockSpec((Bb, Sp, D), lambda b, l: (b, 0, 0)),    # memory block
    ]
    in_specs += [_wspec(name, w.shape) for name, w in zip(WKEYS, stacked)]
    in_specs += [pl.BlockSpec((1, D), lambda b, l: (0, 0)),   # final-norm g
                 pl.BlockSpec((1, D), lambda b, l: (0, 0))]   # final-norm b

    out_specs = [
        _ospec((Bb, Tp, D), lambda b, l: (b, 0, 0)),          # tgt out
        _ospec((Bb, Tp, D), lambda b, l: (b, 0, 0)),          # queries
        _ospec((Bb, Sp, D), lambda b, l: (b, 0, 0)),          # keys
        _ospec((Bb, Sp, D), lambda b, l: (b, 0, 0)),          # slot_vectors
        _ospec((Bb, Tp, Sp), lambda b, l: (b, 0, 0)),         # assign scores
        _ospec((Bb, Tp, Sp), lambda b, l: (b, 0, 0)),         # attn scores
    ]
    out_shapes = (
        jax.ShapeDtypeStruct((Bpad, Tp, D), jnp.float32),
        jax.ShapeDtypeStruct((Bpad, Tp, D), jnp.float32),
        jax.ShapeDtypeStruct((Bpad, Sp, D), jnp.float32),
        jax.ShapeDtypeStruct((Bpad, Sp, D), jnp.float32),
        jax.ShapeDtypeStruct((Bpad, Tp, Sp), jnp.float32),
        jax.ShapeDtypeStruct((Bpad, Tp, Sp), jnp.float32),
    )

    # advisory cost estimate for XLA scheduling of the custom call
    flops_blk_layer = Bb * (12 * Tp * D * D + 4 * Sp * D * D + 4 * Tp * Tp * D
                            + 4 * Tp * Sp * D + 4 * Tp * D * dff)
    w_bytes = sum(int(w.size) * w.dtype.itemsize for w in stacked)
    cost = pl.CostEstimate(
        flops=int(nb * L * flops_blk_layer),
        transcendentals=int(nb * L * Bb * nhead * Tp * (Tp + Sp)),
        bytes_accessed=int(nb * w_bytes
                           + 4 * (Bpad * Tp * D + Bpad * Sp * D)
                           + out_block_bytes * nb),
    )

    kernel = functools.partial(_decoder_stack_kernel, nhead, has_final_norm,
                               Bb, Tp, Sp, T, S)
    outs = pl.pallas_call(
        kernel,
        out_shape=out_shapes,
        grid_spec=pltpu.PrefetchScalarGridSpec(
            num_scalar_prefetch=0,
            grid=(nb, L),                 # batch blocks parallel, layers sequential
            in_specs=in_specs,
            out_specs=out_specs,
            scratch_shapes=[
                pltpu.VMEM((Bb * Tp, D), jnp.float32),  # activation carried across layers
            ],
        ),
        compiler_params=pltpu.CompilerParams(
            dimension_semantics=("parallel", "arbitrary"),
            vmem_limit_bytes=int(vmem_limit)),
        cost_estimate=cost,
    )(tgt_p, mem_p, *stacked, fng, fnb)

    out, q, k, sv, assign, attn = outs
    return (out[:B, :T], q[:B, :T], k[:B, :S], sv[:B, :S],
            assign[:B, :T, :S], attn[:B, :T, :S])


# ---------------------------------------------------------------------------
# deterministic parameter init (kept in f32; wrapper casts matmul weights)
# ---------------------------------------------------------------------------
def init_layer_params(key, d_model, d_ff):
    ks = jax.random.split(key, 10)
    n = lambda k, shape: (0.02 * jax.random.normal(k, shape)).astype(jnp.float32)
    z = lambda shape: jnp.zeros(shape, jnp.float32)
    o = lambda shape: jnp.ones(shape, jnp.float32)
    return {
        "sWq": n(ks[0], (d_model, d_model)), "sbq": z((1, d_model)),
        "sWk": n(ks[1], (d_model, d_model)), "sbk": z((1, d_model)),
        "sWv": n(ks[2], (d_model, d_model)), "sbv": z((1, d_model)),
        "sWo": n(ks[3], (d_model, d_model)), "sbo": z((1, d_model)),
        "cWq": n(ks[4], (d_model, d_model)), "cbq": z((1, d_model)),
        "cWk": n(ks[5], (d_model, d_model)), "cbk": z((1, d_model)),
        "cWv": n(ks[6], (d_model, d_model)), "cbv": z((1, d_model)),
        "cWo": n(ks[7], (d_model, d_model)), "cbo": z((1, d_model)),
        "W1": n(ks[8], (d_model, d_ff)), "b1": z((1, d_ff)),
        "W2": n(ks[9], (d_ff, d_model)), "b2": z((1, d_model)),
        "g1": o((1, d_model)), "be1": z((1, d_model)),
        "g2": o((1, d_model)), "be2": z((1, d_model)),
        "g3": o((1, d_model)), "be3": z((1, d_model)),
    }


if __name__ == "__main__":
    # D is a multiple of 128 so D-last outputs are lane-dense; S is padded to
    # 128 inside the wrapper (key-padding masked); B=4 exercises the batch-
    # blocked path (Bb=2, two parallel batch grid steps).
    B, T, S, D, NHEAD, DFF, NLAYERS = 4, 8, 8, 128, 4, 256, 2

    key = jax.random.PRNGKey(0)
    k_tgt, k_mem, k_par = jax.random.split(key, 3)
    tgt = jax.random.normal(k_tgt, (B, T, D), jnp.float32)
    memory = jax.random.normal(k_mem, (B, S, D), jnp.float32)

    layer_keys = jax.random.split(k_par, NLAYERS)
    layer_params = [init_layer_params(k, D, DFF) for k in layer_keys]
    final_norm = (jnp.ones((1, D), jnp.float32), jnp.zeros((1, D), jnp.float32))

    outs = transformer_decoder(tgt, memory, layer_params, final_norm, NHEAD)
    outs = jax.block_until_ready(outs)

    out, queries, keys, slot_vectors, assign, attn = outs
    assert out.shape == (B, T, D)
    assert queries.shape == (B, T, D)
    assert keys.shape == (B, S, D)
    assert slot_vectors.shape == (B, S, D)
    assert assign.shape == (B, T, S)
    assert attn.shape == (B, T, S)
    assert all(bool(jnp.all(jnp.isfinite(o))) for o in outs)
    # softmax rows over the real (unpadded) keys must sum to ~1
    assert bool(jnp.all(jnp.abs(jnp.sum(assign, axis=-1) - 1.0) < 1e-3))
    print("KERNEL_OK")
</pallas_src>

<mosaic_0001>
module attributes {stable_mosaic.version = 11 : i64} {
  func.func @_decoder_stack_kernel(%arg0: i32, %arg1: i32, %arg2: memref<2x8x128xf32, #tpu.memory_space<vmem>>, %arg3: memref<2x128x128xf32, #tpu.memory_space<vmem>>, %arg4: memref<1x128x128xbf16, #tpu.memory_space<vmem>>, %arg5: memref<1x1x128xf32, #tpu.memory_space<vmem>>, %arg6: memref<1x128x128xbf16, #tpu.memory_space<vmem>>, %arg7: memref<1x1x128xf32, #tpu.memory_space<vmem>>, %arg8: memref<1x128x128xbf16, #tpu.memory_space<vmem>>, %arg9: memref<1x1x128xf32, #tpu.memory_space<vmem>>, %arg10: memref<1x128x128xbf16, #tpu.memory_space<vmem>>, %arg11: memref<1x1x128xf32, #tpu.memory_space<vmem>>, %arg12: memref<1x128x128xbf16, #tpu.memory_space<vmem>>, %arg13: memref<1x1x128xf32, #tpu.memory_space<vmem>>, %arg14: memref<1x128x128xbf16, #tpu.memory_space<vmem>>, %arg15: memref<1x1x128xf32, #tpu.memory_space<vmem>>, %arg16: memref<1x128x128xbf16, #tpu.memory_space<vmem>>, %arg17: memref<1x1x128xf32, #tpu.memory_space<vmem>>, %arg18: memref<1x128x128xbf16, #tpu.memory_space<vmem>>, %arg19: memref<1x1x128xf32, #tpu.memory_space<vmem>>, %arg20: memref<1x128x256xbf16, #tpu.memory_space<vmem>>, %arg21: memref<1x1x256xf32, #tpu.memory_space<vmem>>, %arg22: memref<1x256x128xbf16, #tpu.memory_space<vmem>>, %arg23: memref<1x1x128xf32, #tpu.memory_space<vmem>>, %arg24: memref<1x1x128xf32, #tpu.memory_space<vmem>>, %arg25: memref<1x1x128xf32, #tpu.memory_space<vmem>>, %arg26: memref<1x1x128xf32, #tpu.memory_space<vmem>>, %arg27: memref<1x1x128xf32, #tpu.memory_space<vmem>>, %arg28: memref<1x1x128xf32, #tpu.memory_space<vmem>>, %arg29: memref<1x1x128xf32, #tpu.memory_space<vmem>>, %arg30: memref<1x128xf32, #tpu.memory_space<vmem>>, %arg31: memref<1x128xf32, #tpu.memory_space<vmem>>, %arg32: memref<2x8x128xf32, #tpu.memory_space<vmem>>, %arg33: memref<2x8x128xf32, #tpu.memory_space<vmem>>, %arg34: memref<2x128x128xf32, #tpu.memory_space<vmem>>, %arg35: memref<2x128x128xf32, #tpu.memory_space<vmem>>, %arg36: memref<2x8x128xf32, #tpu.memory_space<vmem>>, %arg37: memref<2x8x128xf32, #tpu.memory_space<vmem>>, %arg38: memref<16x128xf32, #tpu.memory_space<vmem>>) attributes {dimension_semantics = [#tpu.dimension_semantics<parallel>, #tpu.dimension_semantics<arbitrary>], iteration_bounds = array<i64: 2, 2>, scalar_prefetch = 0 : i64, scratch_operands = 1 : i64, tpu.core_type = #tpu.core_type<tc>, window_params = [{transform_indices = @transform_0, window_bounds = array<i64: 2, 8, 128>}, {transform_indices = @transform_1, window_bounds = array<i64: 2, 128, 128>}, {transform_indices = @transform_2, window_bounds = array<i64: 1, 128, 128>}, {transform_indices = @transform_3, window_bounds = array<i64: 1, 1, 128>}, {transform_indices = @transform_4, window_bounds = array<i64: 1, 128, 128>}, {transform_indices = @transform_5, window_bounds = array<i64: 1, 1, 128>}, {transform_indices = @transform_6, window_bounds = array<i64: 1, 128, 128>}, {transform_indices = @transform_7, window_bounds = array<i64: 1, 1, 128>}, {transform_indices = @transform_8, window_bounds = array<i64: 1, 128, 128>}, {transform_indices = @transform_9, window_bounds = array<i64: 1, 1, 128>}, {transform_indices = @transform_10, window_bounds = array<i64: 1, 128, 128>}, {transform_indices = @transform_11, window_bounds = array<i64: 1, 1, 128>}, {transform_indices = @transform_12, window_bounds = array<i64: 1, 128, 128>}, {transform_indices = @transform_13, window_bounds = array<i64: 1, 1, 128>}, {transform_indices = @transform_14, window_bounds = array<i64: 1, 128, 128>}, {transform_indices = @transform_15, window_bounds = array<i64: 1, 1, 128>}, {transform_indices = @transform_16, window_bounds = array<i64: 1, 128, 128>}, {transform_indices = @transform_17, window_bounds = array<i64: 1, 1, 128>}, {transform_indices = @transform_18, window_bounds = array<i64: 1, 128, 256>}, {transform_indices = @transform_19, window_bounds = array<i64: 1, 1, 256>}, {transform_indices = @transform_20, window_bounds = array<i64: 1, 256, 128>}, {transform_indices = @transform_21, window_bounds = array<i64: 1, 1, 128>}, {transform_indices = @transform_22, window_bounds = array<i64: 1, 1, 128>}, {transform_indices = @transform_23, window_bounds = array<i64: 1, 1, 128>}, {transform_indices = @transform_24, window_bounds = array<i64: 1, 1, 128>}, {transform_indices = @transform_25, window_bounds = array<i64: 1, 1, 128>}, {transform_indices = @transform_26, window_bounds = array<i64: 1, 1, 128>}, {transform_indices = @transform_27, window_bounds = array<i64: 1, 1, 128>}, {pipeline_mode = #tpu.pipeline_mode<synchronous>, transform_indices = @transform_28, window_bounds = array<i64: 1, 128>}, {pipeline_mode = #tpu.pipeline_mode<synchronous>, transform_indices = @transform_29, window_bounds = array<i64: 1, 128>}, {transform_indices = @transform_30, window_bounds = array<i64: 2, 8, 128>}, {transform_indices = @transform_31, window_bounds = array<i64: 2, 8, 128>}, {transform_indices = @transform_32, window_bounds = array<i64: 2, 128, 128>}, {transform_indices = @transform_33, window_bounds = array<i64: 2, 128, 128>}, {transform_indices = @transform_34, window_bounds = array<i64: 2, 8, 128>}, {transform_indices = @transform_35, window_bounds = array<i64: 2, 8, 128>}]} {
    %0 = tpu.iota {dimensions = array<i32: 1>} : vector<1x128xi32>
    %c0_i32 = arith.constant 0 : i32
    %1 = vector.broadcast %c0_i32 : i32 to vector<1x128xi32>
    %2 = arith.cmpi sge, %0, %1 : vector<1x128xi32>
    %c32_i32 = arith.constant 32 : i32
    %3 = vector.broadcast %c32_i32 : i32 to vector<1x128xi32>
    %4 = arith.cmpi slt, %0, %3 : vector<1x128xi32>
    %5 = arith.andi %2, %4 : vector<1x128xi1>
    %6 = arith.extui %5 : vector<1x128xi1> to vector<1x128xi32>
    %7 = arith.sitofp %6 : vector<1x128xi32> to vector<1x128xf32>
    %8 = arith.truncf %7 : vector<1x128xf32> to vector<1x128xbf16>
    %c32_i32_0 = arith.constant 32 : i32
    %9 = vector.broadcast %c32_i32_0 : i32 to vector<1x128xi32>
    %10 = arith.cmpi sge, %0, %9 : vector<1x128xi32>
    %c64_i32 = arith.constant 64 : i32
    %11 = vector.broadcast %c64_i32 : i32 to vector<1x128xi32>
    %12 = arith.cmpi slt, %0, %11 : vector<1x128xi32>
    %13 = arith.andi %10, %12 : vector<1x128xi1>
    %14 = arith.extui %13 : vector<1x128xi1> to vector<1x128xi32>
    %15 = arith.sitofp %14 : vector<1x128xi32> to vector<1x128xf32>
    %16 = arith.truncf %15 : vector<1x128xf32> to vector<1x128xbf16>
    %c64_i32_1 = arith.constant 64 : i32
    %17 = vector.broadcast %c64_i32_1 : i32 to vector<1x128xi32>
    %18 = arith.cmpi sge, %0, %17 : vector<1x128xi32>
    %c96_i32 = arith.constant 96 : i32
    %19 = vector.broadcast %c96_i32 : i32 to vector<1x128xi32>
    %20 = arith.cmpi slt, %0, %19 : vector<1x128xi32>
    %21 = arith.andi %18, %20 : vector<1x128xi1>
    %22 = arith.extui %21 : vector<1x128xi1> to vector<1x128xi32>
    %23 = arith.sitofp %22 : vector<1x128xi32> to vector<1x128xf32>
    %24 = arith.truncf %23 : vector<1x128xf32> to vector<1x128xbf16>
    %c96_i32_2 = arith.constant 96 : i32
    %25 = vector.broadcast %c96_i32_2 : i32 to vector<1x128xi32>
    %26 = arith.cmpi sge, %0, %25 : vector<1x128xi32>
    %c128_i32 = arith.constant 128 : i32
    %27 = vector.broadcast %c128_i32 : i32 to vector<1x128xi32>
    %28 = arith.cmpi slt, %0, %27 : vector<1x128xi32>
    %29 = arith.andi %26, %28 : vector<1x128xi1>
    %30 = arith.extui %29 : vector<1x128xi1> to vector<1x128xi32>
    %31 = arith.sitofp %30 : vector<1x128xi32> to vector<1x128xf32>
    %32 = arith.truncf %31 : vector<1x128xf32> to vector<1x128xbf16>
    %33 = tpu.iota {dimensions = array<i32: 1>} : vector<1x128xi32>
    %c8_i32 = arith.constant 8 : i32
    %34 = vector.broadcast %c8_i32 : i32 to vector<1x128xi32>
    %35 = arith.cmpi slt, %33, %34 : vector<1x128xi32>
    %cst = arith.constant 0.000000e+00 : f32
    %cst_3 = arith.constant -1.000000e+30 : f32
    %36 = vector.broadcast %cst : f32 to vector<1x128xf32>
    %37 = vector.broadcast %cst_3 : f32 to vector<1x128xf32>
    %38 = arith.select %35, %36, %37 : vector<1x128xi1>, vector<1x128xf32>
    %c0_i32_4 = arith.constant 0 : i32
    %39 = arith.cmpi eq, %arg1, %c0_i32_4 : i32
    %40 = arith.extui %39 : i1 to i32
    %c0_i32_5 = arith.constant 0 : i32
    %41 = arith.cmpi ne, %40, %c0_i32_5 : i32
    scf.if %41 {
      %c0_161 = arith.constant 0 : index
      %c0_162 = arith.constant 0 : index
      %c0_163 = arith.constant 0 : index
      %408 = vector.load %arg2[%c0_161, %c0_162, %c0_163] : memref<2x8x128xf32, #tpu.memory_space<vmem>>, vector<2x8x128xf32>
      %409 = vector.shape_cast %408 : vector<2x8x128xf32> to vector<16x128xf32>
      %c0_164 = arith.constant 0 : index
      %c0_165 = arith.constant 0 : index
      %410 = vector.load %arg38[%c0_164, %c0_165] : memref<16x128xf32, #tpu.memory_space<vmem>>, vector<16x128xf32>
      tpu.vector_store %arg38[%c0_164, %c0_165], %409 {strides = array<i32>} : memref<16x128xf32, #tpu.memory_space<vmem>>, vector<16x128xf32>,
    } else {
    }
    %c0 = arith.constant 0 : index
    %c0_6 = arith.constant 0 : index
    %42 = vector.load %arg38[%c0, %c0_6] : memref<16x128xf32, #tpu.memory_space<vmem>>, vector<16x128xf32>
    %c0_7 = arith.constant 0 : index
    %c0_8 = arith.constant 0 : index
    %c0_9 = arith.constant 0 : index
    %43 = vector.load %arg3[%c0_7, %c0_8, %c0_9] : memref<2x128x128xf32, #tpu.memory_space<vmem>>, vector<2x128x128xf32>
    %44 = vector.shape_cast %43 : vector<2x128x128xf32> to vector<256x128xf32>
    %45 = arith.truncf %44 : vector<256x128xf32> to vector<256x128xbf16>
    %46 = arith.truncf %42 : vector<16x128xf32> to vector<16x128xbf16>
    %c0_10 = arith.constant 0 : index
    %c0_11 = arith.constant 0 : index
    %c0_12 = arith.constant 0 : index
    %47 = vector.load %arg4[%c0_10, %c0_11, %c0_12] : memref<1x128x128xbf16, #tpu.memory_space<vmem>>, vector<1x128x128xbf16>
    %48 = vector.shape_cast %47 : vector<1x128x128xbf16> to vector<128x128xbf16>
    %c0_13 = arith.constant 0 : index
    %c0_14 = arith.constant 0 : index
    %c0_15 = arith.constant 0 : index
    %49 = vector.load %arg5[%c0_13, %c0_14, %c0_15] : memref<1x1x128xf32, #tpu.memory_space<vmem>>, vector<1x1x128xf32>
    %50 = vector.shape_cast %49 : vector<1x1x128xf32> to vector<1x128xf32>
    %c0_16 = arith.constant 0 : index
    %c0_17 = arith.constant 0 : index
    %c0_18 = arith.constant 0 : index
    %51 = vector.load %arg6[%c0_16, %c0_17, %c0_18] : memref<1x128x128xbf16, #tpu.memory_space<vmem>>, vector<1x128x128xbf16>
    %52 = vector.shape_cast %51 : vector<1x128x128xbf16> to vector<128x128xbf16>
    %c0_19 = arith.constant 0 : index
    %c0_20 = arith.constant 0 : index
    %c0_21 = arith.constant 0 : index
    %53 = vector.load %arg7[%c0_19, %c0_20, %c0_21] : memref<1x1x128xf32, #tpu.memory_space<vmem>>, vector<1x1x128xf32>
    %54 = vector.shape_cast %53 : vector<1x1x128xf32> to vector<1x128xf32>
    %c0_22 = arith.constant 0 : index
    %c0_23 = arith.constant 0 : index
    %c0_24 = arith.constant 0 : index
    %55 = vector.load %arg8[%c0_22, %c0_23, %c0_24] : memref<1x128x128xbf16, #tpu.memory_space<vmem>>, vector<1x128x128xbf16>
    %56 = vector.shape_cast %55 : vector<1x128x128xbf16> to vector<128x128xbf16>
    %c0_25 = arith.constant 0 : index
    %c0_26 = arith.constant 0 : index
    %c0_27 = arith.constant 0 : index
    %57 = vector.load %arg9[%c0_25, %c0_26, %c0_27] : memref<1x1x128xf32, #tpu.memory_space<vmem>>, vector<1x1x128xf32>
    %58 = vector.shape_cast %57 : vector<1x1x128xf32> to vector<1x128xf32>
    %c0_28 = arith.constant 0 : index
    %c0_29 = arith.constant 0 : index
    %c0_30 = arith.constant 0 : index
    %59 = vector.load %arg10[%c0_28, %c0_29, %c0_30] : memref<1x128x128xbf16, #tpu.memory_space<vmem>>, vector<1x128x128xbf16>
    %60 = vector.shape_cast %59 : vector<1x128x128xbf16> to vector<128x128xbf16>
    %c0_31 = arith.constant 0 : index
    %c0_32 = arith.constant 0 : index
    %c0_33 = arith.constant 0 : index
    %61 = vector.load %arg11[%c0_31, %c0_32, %c0_33] : memref<1x1x128xf32, #tpu.memory_space<vmem>>, vector<1x1x128xf32>
    %62 = vector.shape_cast %61 : vector<1x1x128xf32> to vector<1x128xf32>
    %cst_34 = arith.constant dense<0.000000e+00> : vector<16x128xf32>
    %63 = tpu.matmul %46, %48, %cst_34 {dimension_numbers = #tpu.dot_dimension_numbers<[1], [0], [0], [1], [0, 0, 1, 1], [], []>} : vector<16x128xbf16>, vector<128x128xbf16>, vector<16x128xf32> -> vector<16x128xf32>
    %64 = vector.broadcast %50 : vector<1x128xf32> to vector<16x128xf32>
    %65 = arith.addf %63, %64 : vector<16x128xf32>
    %cst_35 = arith.constant dense<0.000000e+00> : vector<16x128xf32>
    %66 = tpu.matmul %46, %52, %cst_35 {dimension_numbers = #tpu.dot_dimension_numbers<[1], [0], [0], [1], [0, 0, 1, 1], [], []>} : vector<16x128xbf16>, vector<128x128xbf16>, vector<16x128xf32> -> vector<16x128xf32>
    %67 = vector.broadcast %54 : vector<1x128xf32> to vector<16x128xf32>
    %68 = arith.addf %66, %67 : vector<16x128xf32>
    %cst_36 = arith.constant dense<0.000000e+00> : vector<16x128xf32>
    %69 = tpu.matmul %46, %56, %cst_36 {dimension_numbers = #tpu.dot_dimension_numbers<[1], [0], [0], [1], [0, 0, 1, 1], [], []>} : vector<16x128xbf16>, vector<128x128xbf16>, vector<16x128xf32> -> vector<16x128xf32>
    %70 = vector.broadcast %58 : vector<1x128xf32> to vector<16x128xf32>
    %71 = arith.addf %69, %70 : vector<16x128xf32>
    %72 = vector.shape_cast %65 : vector<16x128xf32> to vector<2x8x128xf32>
    %73 = arith.truncf %72 : vector<2x8x128xf32> to vector<2x8x128xbf16>
    %74 = vector.shape_cast %68 : vector<16x128xf32> to vector<2x8x128xf32>
    %75 = arith.truncf %74 : vector<2x8x128xf32> to vector<2x8x128xbf16>
    %76 = vector.shape_cast %71 : vector<16x128xf32> to vector<2x8x128xf32>
    %77 = arith.truncf %76 : vector<2x8x128xf32> to vector<2x8x128xbf16>
    %cst_37 = arith.constant 0.000000e+00 : f32
    %78 = vector.broadcast %cst_37 : f32 to vector<2x8x128xf32>
    %79 = vector.shape_cast %8 : vector<1x128xbf16> to vector<1x1x128xbf16>
    %80 = vector.broadcast %79 : vector<1x1x128xbf16> to vector<2x8x128xbf16>
    %81 = arith.mulf %75, %80 : vector<2x8x128xbf16>
    "tpu.trace_start"() <{level = 10 : i32, message = "bqd,bkd->bqk"}> : () -> ()
    %cst_38 = arith.constant dense<0.000000e+00> : vector<2x8x8xf32>
    %82 = tpu.matmul %73, %81, %cst_38 {dimension_numbers = #tpu.dot_dimension_numbers<[2], [2], [1], [1], [0, 0, 0, 1, 1, 1], [0], [0]>} : vector<2x8x128xbf16>, vector<2x8x128xbf16>, vector<2x8x8xf32> -> vector<2x8x8xf32>
    "tpu.trace_stop"() : () -> ()
    %cst_39 = arith.constant 0.176776692 : f32
    %83 = vector.broadcast %cst_39 : f32 to vector<2x8x8xf32>
    %84 = arith.mulf %82, %83 : vector<2x8x8xf32>
    %cst_40 = arith.constant dense<0xFF800000> : vector<2x8xf32>
    %85 = vector.multi_reduction <maximumf>, %84, %cst_40 [2] : vector<2x8x8xf32> to vector<2x8xf32>
    %86 = vector.shape_cast %85 : vector<2x8xf32> to vector<2x8x1xf32>
    %87 = vector.broadcast %86 : vector<2x8x1xf32> to vector<2x8x8xf32>
    %88 = arith.subf %84, %87 : vector<2x8x8xf32>
    %89 = math.exp %88 : vector<2x8x8xf32>
    %cst_41 = arith.constant dense<0.000000e+00> : vector<2x8xf32>
    %90 = vector.multi_reduction <add>, %89, %cst_41 [2] : vector<2x8x8xf32> to vector<2x8xf32>
    %91 = vector.shape_cast %90 : vector<2x8xf32> to vector<2x8x1xf32>
    %92 = vector.broadcast %91 : vector<2x8x1xf32> to vector<2x8x8xf32>
    %93 = arith.divf %89, %92 : vector<2x8x8xf32>
    %94 = arith.truncf %93 : vector<2x8x8xf32> to vector<2x8x8xbf16>
    %95 = vector.shape_cast %8 : vector<1x128xbf16> to vector<1x1x128xbf16>
    %96 = vector.broadcast %95 : vector<1x1x128xbf16> to vector<2x8x128xbf16>
    %97 = arith.mulf %77, %96 : vector<2x8x128xbf16>
    "tpu.trace_start"() <{level = 10 : i32, message = "bqk,bkd->bqd"}> : () -> ()
    %cst_42 = arith.constant dense<0.000000e+00> : vector<2x8x128xf32>
    %98 = tpu.matmul %94, %97, %cst_42 {dimension_numbers = #tpu.dot_dimension_numbers<[2], [1], [1], [2], [0, 0, 0, 1, 1, 2], [0], [0]>} : vector<2x8x8xbf16>, vector<2x8x128xbf16>, vector<2x8x128xf32> -> vector<2x8x128xf32>
    "tpu.trace_stop"() : () -> ()
    %99 = arith.addf %78, %98 : vector<2x8x128xf32>
    %100 = vector.shape_cast %16 : vector<1x128xbf16> to vector<1x1x128xbf16>
    %101 = vector.broadcast %100 : vector<1x1x128xbf16> to vector<2x8x128xbf16>
    %102 = arith.mulf %75, %101 : vector<2x8x128xbf16>
    "tpu.trace_start"() <{level = 10 : i32, message = "bqd,bkd->bqk"}> : () -> ()
    %cst_43 = arith.constant dense<0.000000e+00> : vector<2x8x8xf32>
    %103 = tpu.matmul %73, %102, %cst_43 {dimension_numbers = #tpu.dot_dimension_numbers<[2], [2], [1], [1], [0, 0, 0, 1, 1, 1], [0], [0]>} : vector<2x8x128xbf16>, vector<2x8x128xbf16>, vector<2x8x8xf32> -> vector<2x8x8xf32>
    "tpu.trace_stop"() : () -> ()
    %cst_44 = arith.constant 0.176776692 : f32
    %104 = vector.broadcast %cst_44 : f32 to vector<2x8x8xf32>
    %105 = arith.mulf %103, %104 : vector<2x8x8xf32>
    %cst_45 = arith.constant dense<0xFF800000> : vector<2x8xf32>
    %106 = vector.multi_reduction <maximumf>, %105, %cst_45 [2] : vector<2x8x8xf32> to vector<2x8xf32>
    %107 = vector.shape_cast %106 : vector<2x8xf32> to vector<2x8x1xf32>
    %108 = vector.broadcast %107 : vector<2x8x1xf32> to vector<2x8x8xf32>
    %109 = arith.subf %105, %108 : vector<2x8x8xf32>
    %110 = math.exp %109 : vector<2x8x8xf32>
    %cst_46 = arith.constant dense<0.000000e+00> : vector<2x8xf32>
    %111 = vector.multi_reduction <add>, %110, %cst_46 [2] : vector<2x8x8xf32> to vector<2x8xf32>
    %112 = vector.shape_cast %111 : vector<2x8xf32> to vector<2x8x1xf32>
    %113 = vector.broadcast %112 : vector<2x8x1xf32> to vector<2x8x8xf32>
    %114 = arith.divf %110, %113 : vector<2x8x8xf32>
    %115 = arith.truncf %114 : vector<2x8x8xf32> to vector<2x8x8xbf16>
    %116 = vector.shape_cast %16 : vector<1x128xbf16> to vector<1x1x128xbf16>
    %117 = vector.broadcast %116 : vector<1x1x128xbf16> to vector<2x8x128xbf16>
    %118 = arith.mulf %77, %117 : vector<2x8x128xbf16>
    "tpu.trace_start"() <{level = 10 : i32, message = "bqk,bkd->bqd"}> : () -> ()
    %cst_47 = arith.constant dense<0.000000e+00> : vector<2x8x128xf32>
    %119 = tpu.matmul %115, %118, %cst_47 {dimension_numbers = #tpu.dot_dimension_numbers<[2], [1], [1], [2], [0, 0, 0, 1, 1, 2], [0], [0]>} : vector<2x8x8xbf16>, vector<2x8x128xbf16>, vector<2x8x128xf32> -> vector<2x8x128xf32>
    "tpu.trace_stop"() : () -> ()
    %120 = arith.addf %99, %119 : vector<2x8x128xf32>
    %121 = vector.shape_cast %24 : vector<1x128xbf16> to vector<1x1x128xbf16>
    %122 = vector.broadcast %121 : vector<1x1x128xbf16> to vector<2x8x128xbf16>
    %123 = arith.mulf %75, %122 : vector<2x8x128xbf16>
    "tpu.trace_start"() <{level = 10 : i32, message = "bqd,bkd->bqk"}> : () -> ()
    %cst_48 = arith.constant dense<0.000000e+00> : vector<2x8x8xf32>
    %124 = tpu.matmul %73, %123, %cst_48 {dimension_numbers = #tpu.dot_dimension_numbers<[2], [2], [1], [1], [0, 0, 0, 1, 1, 1], [0], [0]>} : vector<2x8x128xbf16>, vector<2x8x128xbf16>, vector<2x8x8xf32> -> vector<2x8x8xf32>
    "tpu.trace_stop"() : () -> ()
    %cst_49 = arith.constant 0.176776692 : f32
    %125 = vector.broadcast %cst_49 : f32 to vector<2x8x8xf32>
    %126 = arith.mulf %124, %125 : vector<2x8x8xf32>
    %cst_50 = arith.constant dense<0xFF800000> : vector<2x8xf32>
    %127 = vector.multi_reduction <maximumf>, %126, %cst_50 [2] : vector<2x8x8xf32> to vector<2x8xf32>
    %128 = vector.shape_cast %127 : vector<2x8xf32> to vector<2x8x1xf32>
    %129 = vector.broadcast %128 : vector<2x8x1xf32> to vector<2x8x8xf32>
    %130 = arith.subf %126, %129 : vector<2x8x8xf32>
    %131 = math.exp %130 : vector<2x8x8xf32>
    %cst_51 = arith.constant dense<0.000000e+00> : vector<2x8xf32>
    %132 = vector.multi_reduction <add>, %131, %cst_51 [2] : vector<2x8x8xf32> to vector<2x8xf32>
    %133 = vector.shape_cast %132 : vector<2x8xf32> to vector<2x8x1xf32>
    %134 = vector.broadcast %133 : vector<2x8x1xf32> to vector<2x8x8xf32>
    %135 = arith.divf %131, %134 : vector<2x8x8xf32>
    %136 = arith.truncf %135 : vector<2x8x8xf32> to vector<2x8x8xbf16>
    %137 = vector.shape_cast %24 : vector<1x128xbf16> to vector<1x1x128xbf16>
    %138 = vector.broadcast %137 : vector<1x1x128xbf16> to vector<2x8x128xbf16>
    %139 = arith.mulf %77, %138 : vector<2x8x128xbf16>
    "tpu.trace_start"() <{level = 10 : i32, message = "bqk,bkd->bqd"}> : () -> ()
    %cst_52 = arith.constant dense<0.000000e+00> : vector<2x8x128xf32>
    %140 = tpu.matmul %136, %139, %cst_52 {dimension_numbers = #tpu.dot_dimension_numbers<[2], [1], [1], [2], [0, 0, 0, 1, 1, 2], [0], [0]>} : vector<2x8x8xbf16>, vector<2x8x128xbf16>, vector<2x8x128xf32> -> vector<2x8x128xf32>
    "tpu.trace_stop"() : () -> ()
    %141 = arith.addf %120, %140 : vector<2x8x128xf32>
    %142 = vector.shape_cast %32 : vector<1x128xbf16> to vector<1x1x128xbf16>
    %143 = vector.broadcast %142 : vector<1x1x128xbf16> to vector<2x8x128xbf16>
    %144 = arith.mulf %75, %143 : vector<2x8x128xbf16>
    "tpu.trace_start"() <{level = 10 : i32, message = "bqd,bkd->bqk"}> : () -> ()
    %cst_53 = arith.constant dense<0.000000e+00> : vector<2x8x8xf32>
    %145 = tpu.matmul %73, %144, %cst_53 {dimension_numbers = #tpu.dot_dimension_numbers<[2], [2], [1], [1], [0, 0, 0, 1, 1, 1], [0], [0]>} : vector<2x8x128xbf16>, vector<2x8x128xbf16>, vector<2x8x8xf32> -> vector<2x8x8xf32>
    "tpu.trace_stop"() : () -> ()
    %cst_54 = arith.constant 0.176776692 : f32
    %146 = vector.broadcast %cst_54 : f32 to vector<2x8x8xf32>
    %147 = arith.mulf %145, %146 : vector<2x8x8xf32>
    %cst_55 = arith.constant dense<0xFF800000> : vector<2x8xf32>
    %148 = vector.multi_reduction <maximumf>, %147, %cst_55 [2] : vector<2x8x8xf32> to vector<2x8xf32>
    %149 = vector.shape_cast %148 : vector<2x8xf32> to vector<2x8x1xf32>
    %150 = vector.broadcast %149 : vector<2x8x1xf32> to vector<2x8x8xf32>
    %151 = arith.subf %147, %150 : vector<2x8x8xf32>
    %152 = math.exp %151 : vector<2x8x8xf32>
    %cst_56 = arith.constant dense<0.000000e+00> : vector<2x8xf32>
    %153 = vector.multi_reduction <add>, %152, %cst_56 [2] : vector<2x8x8xf32> to vector<2x8xf32>
    %154 = vector.shape_cast %153 : vector<2x8xf32> to vector<2x8x1xf32>
    %155 = vector.broadcast %154 : vector<2x8x1xf32> to vector<2x8x8xf32>
    %156 = arith.divf %152, %155 : vector<2x8x8xf32>
    %157 = arith.truncf %156 : vector<2x8x8xf32> to vector<2x8x8xbf16>
    %158 = vector.shape_cast %32 : vector<1x128xbf16> to vector<1x1x128xbf16>
    %159 = vector.broadcast %158 : vector<1x1x128xbf16> to vector<2x8x128xbf16>
    %160 = arith.mulf %77, %159 : vector<2x8x128xbf16>
    "tpu.trace_start"() <{level = 10 : i32, message = "bqk,bkd->bqd"}> : () -> ()
    %cst_57 = arith.constant dense<0.000000e+00> : vector<2x8x128xf32>
    %161 = tpu.matmul %157, %160, %cst_57 {dimension_numbers = #tpu.dot_dimension_numbers<[2], [1], [1], [2], [0, 0, 0, 1, 1, 2], [0], [0]>} : vector<2x8x8xbf16>, vector<2x8x128xbf16>, vector<2x8x128xf32> -> vector<2x8x128xf32>
    "tpu.trace_stop"() : () -> ()
    %162 = arith.addf %141, %161 : vector<2x8x128xf32>
    %163 = vector.shape_cast %162 : vector<2x8x128xf32> to vector<16x128xf32>
    %164 = arith.truncf %163 : vector<16x128xf32> to vector<16x128xbf16>
    %cst_58 = arith.constant dense<0.000000e+00> : vector<16x128xf32>
    %165 = tpu.matmul %164, %60, %cst_58 {dimension_numbers = #tpu.dot_dimension_numbers<[1], [0], [0], [1], [0, 0, 1, 1], [], []>} : vector<16x128xbf16>, vector<128x128xbf16>, vector<16x128xf32> -> vector<16x128xf32>
    %166 = vector.broadcast %62 : vector<1x128xf32> to vector<16x128xf32>
    %167 = arith.addf %165, %166 : vector<16x128xf32>
    %168 = arith.addf %42, %167 : vector<16x128xf32>
    %c0_59 = arith.constant 0 : index
    %c0_60 = arith.constant 0 : index
    %c0_61 = arith.constant 0 : index
    %169 = vector.load %arg24[%c0_59, %c0_60, %c0_61] : memref<1x1x128xf32, #tpu.memory_space<vmem>>, vector<1x1x128xf32>
    %170 = vector.shape_cast %169 : vector<1x1x128xf32> to vector<1x128xf32>
    %c0_62 = arith.constant 0 : index
    %c0_63 = arith.constant 0 : index
    %c0_64 = arith.constant 0 : index
    %171 = vector.load %arg25[%c0_62, %c0_63, %c0_64] : memref<1x1x128xf32, #tpu.memory_space<vmem>>, vector<1x1x128xf32>
    %172 = vector.shape_cast %171 : vector<1x1x128xf32> to vector<1x128xf32>
    %cst_65 = arith.constant dense<0.000000e+00> : vector<16xf32>
    %173 = vector.multi_reduction <add>, %168, %cst_65 [1] : vector<16x128xf32> to vector<16xf32>
    %174 = vector.shape_cast %173 : vector<16xf32> to vector<16x1xf32>
    %cst_66 = arith.constant 1.280000e+02 : f32
    %175 = vector.broadcast %cst_66 : f32 to vector<16x1xf32>
    %176 = arith.divf %174, %175 : vector<16x1xf32>
    %177 = vector.broadcast %176 : vector<16x1xf32> to vector<16x128xf32>
    %178 = arith.subf %168, %177 : vector<16x128xf32>
    %179 = arith.mulf %178, %178 : vector<16x128xf32>
    %cst_67 = arith.constant dense<0.000000e+00> : vector<16xf32>
    %180 = vector.multi_reduction <add>, %179, %cst_67 [1] : vector<16x128xf32> to vector<16xf32>
    %181 = vector.shape_cast %180 : vector<16xf32> to vector<16x1xf32>
    %cst_68 = arith.constant 1.280000e+02 : f32
    %182 = vector.broadcast %cst_68 : f32 to vector<16x1xf32>
    %183 = arith.divf %181, %182 : vector<16x1xf32>
    %184 = vector.broadcast %176 : vector<16x1xf32> to vector<16x128xf32>
    %185 = arith.subf %168, %184 : vector<16x128xf32>
    %cst_69 = arith.constant 9.99999974E-6 : f32
    %186 = vector.broadcast %cst_69 : f32 to vector<16x1xf32>
    %187 = arith.addf %183, %186 : vector<16x1xf32>
    %188 = math.rsqrt %187 : vector<16x1xf32>
    %189 = vector.broadcast %188 : vector<16x1xf32> to vector<16x128xf32>
    %190 = arith.mulf %185, %189 : vector<16x128xf32>
    %191 = vector.broadcast %170 : vector<1x128xf32> to vector<16x128xf32>
    %192 = arith.mulf %190, %191 : vector<16x128xf32>
    %193 = vector.broadcast %172 : vector<1x128xf32> to vector<16x128xf32>
    %194 = arith.addf %192, %193 : vector<16x128xf32>
    %195 = arith.truncf %194 : vector<16x128xf32> to vector<16x128xbf16>
    %c0_70 = arith.constant 0 : index
    %c0_71 = arith.constant 0 : index
    %c0_72 = arith.constant 0 : index
    %196 = vector.load %arg12[%c0_70, %c0_71, %c0_72] : memref<1x128x128xbf16, #tpu.memory_space<vmem>>, vector<1x128x128xbf16>
    %197 = vector.shape_cast %196 : vector<1x128x128xbf16> to vector<128x128xbf16>
    %c0_73 = arith.constant 0 : index
    %c0_74 = arith.constant 0 : index
    %c0_75 = arith.constant 0 : index
    %198 = vector.load %arg13[%c0_73, %c0_74, %c0_75] : memref<1x1x128xf32, #tpu.memory_space<vmem>>, vector<1x1x128xf32>
    %199 = vector.shape_cast %198 : vector<1x1x128xf32> to vector<1x128xf32>
    %c0_76 = arith.constant 0 : index
    %c0_77 = arith.constant 0 : index
    %c0_78 = arith.constant 0 : index
    %200 = vector.load %arg14[%c0_76, %c0_77, %c0_78] : memref<1x128x128xbf16, #tpu.memory_space<vmem>>, vector<1x128x128xbf16>
    %201 = vector.shape_cast %200 : vector<1x128x128xbf16> to vector<128x128xbf16>
    %c0_79 = arith.constant 0 : index
    %c0_80 = arith.constant 0 : index
    %c0_81 = arith.constant 0 : index
    %202 = vector.load %arg15[%c0_79, %c0_80, %c0_81] : memref<1x1x128xf32, #tpu.memory_space<vmem>>, vector<1x1x128xf32>
    %203 = vector.shape_cast %202 : vector<1x1x128xf32> to vector<1x128xf32>
    %c0_82 = arith.constant 0 : index
    %c0_83 = arith.constant 0 : index
    %c0_84 = arith.constant 0 : index
    %204 = vector.load %arg16[%c0_82, %c0_83, %c0_84] : memref<1x128x128xbf16, #tpu.memory_space<vmem>>, vector<1x128x128xbf16>
    %205 = vector.shape_cast %204 : vector<1x128x128xbf16> to vector<128x128xbf16>
    %c0_85 = arith.constant 0 : index
    %c0_86 = arith.constant 0 : index
    %c0_87 = arith.constant 0 : index
    %206 = vector.load %arg17[%c0_85, %c0_86, %c0_87] : memref<1x1x128xf32, #tpu.memory_space<vmem>>, vector<1x1x128xf32>
    %207 = vector.shape_cast %206 : vector<1x1x128xf32> to vector<1x128xf32>
    %c0_88 = arith.constant 0 : index
    %c0_89 = arith.constant 0 : index
    %c0_90 = arith.constant 0 : index
    %208 = vector.load %arg18[%c0_88, %c0_89, %c0_90] : memref<1x128x128xbf16, #tpu.memory_space<vmem>>, vector<1x128x128xbf16>
    %209 = vector.shape_cast %208 : vector<1x128x128xbf16> to vector<128x128xbf16>
    %c0_91 = arith.constant 0 : index
    %c0_92 = arith.constant 0 : index
    %c0_93 = arith.constant 0 : index
    %210 = vector.load %arg19[%c0_91, %c0_92, %c0_93] : memref<1x1x128xf32, #tpu.memory_space<vmem>>, vector<1x1x128xf32>
    %211 = vector.shape_cast %210 : vector<1x1x128xf32> to vector<1x128xf32>
    %cst_94 = arith.constant dense<0.000000e+00> : vector<16x128xf32>
    %212 = tpu.matmul %195, %197, %cst_94 {dimension_numbers = #tpu.dot_dimension_numbers<[1], [0], [0], [1], [0, 0, 1, 1], [], []>} : vector<16x128xbf16>, vector<128x128xbf16>, vector<16x128xf32> -> vector<16x128xf32>
    %213 = vector.broadcast %199 : vector<1x128xf32> to vector<16x128xf32>
    %214 = arith.addf %212, %213 : vector<16x128xf32>
    %cst_95 = arith.constant dense<0.000000e+00> : vector<256x128xf32>
    %215 = tpu.matmul %45, %201, %cst_95 {dimension_numbers = #tpu.dot_dimension_numbers<[1], [0], [0], [1], [0, 0, 1, 1], [], []>} : vector<256x128xbf16>, vector<128x128xbf16>, vector<256x128xf32> -> vector<256x128xf32>
    %216 = vector.broadcast %203 : vector<1x128xf32> to vector<256x128xf32>
    %217 = arith.addf %215, %216 : vector<256x128xf32>
    %cst_96 = arith.constant dense<0.000000e+00> : vector<256x128xf32>
    %218 = tpu.matmul %45, %205, %cst_96 {dimension_numbers = #tpu.dot_dimension_numbers<[1], [0], [0], [1], [0, 0, 1, 1], [], []>} : vector<256x128xbf16>, vector<128x128xbf16>, vector<256x128xf32> -> vector<256x128xf32>
    %219 = vector.broadcast %207 : vector<1x128xf32> to vector<256x128xf32>
    %220 = arith.addf %218, %219 : vector<256x128xf32>
    %221 = vector.shape_cast %214 : vector<16x128xf32> to vector<2x8x128xf32>
    %222 = arith.truncf %221 : vector<2x8x128xf32> to vector<2x8x128xbf16>
    %223 = vector.shape_cast %217 : vector<256x128xf32> to vector<2x128x128xf32>
    %224 = arith.truncf %223 : vector<2x128x128xf32> to vector<2x128x128xbf16>
    %225 = vector.shape_cast %220 : vector<256x128xf32> to vector<2x128x128xf32>
    %226 = arith.truncf %225 : vector<2x128x128xf32> to vector<2x128x128xbf16>
    %cst_97 = arith.constant 0.000000e+00 : f32
    %227 = vector.broadcast %cst_97 : f32 to vector<2x8x128xf32>
    %228 = vector.shape_cast %8 : vector<1x128xbf16> to vector<1x1x128xbf16>
    %229 = vector.broadcast %228 : vector<1x1x128xbf16> to vector<2x128x128xbf16>
    %230 = arith.mulf %224, %229 : vector<2x128x128xbf16>
    "tpu.trace_start"() <{level = 10 : i32, message = "bqd,bkd->bqk"}> : () -> ()
    %cst_98 = arith.constant dense<0.000000e+00> : vector<2x8x128xf32>
    %231 = tpu.matmul %222, %230, %cst_98 {dimension_numbers = #tpu.dot_dimension_numbers<[2], [2], [1], [1], [0, 0, 0, 1, 1, 1], [0], [0]>} : vector<2x8x128xbf16>, vector<2x128x128xbf16>, vector<2x8x128xf32> -> vector<2x8x128xf32>
    "tpu.trace_stop"() : () -> ()
    %cst_99 = arith.constant 0.176776692 : f32
    %232 = vector.broadcast %cst_99 : f32 to vector<2x8x128xf32>
    %233 = arith.mulf %231, %232 : vector<2x8x128xf32>
    %234 = vector.shape_cast %38 : vector<1x128xf32> to vector<1x1x128xf32>
    %235 = vector.broadcast %234 : vector<1x1x128xf32> to vector<2x8x128xf32>
    %236 = arith.addf %233, %235 : vector<2x8x128xf32>
    %cst_100 = arith.constant dense<0xFF800000> : vector<2x8xf32>
    %237 = vector.multi_reduction <maximumf>, %236, %cst_100 [2] : vector<2x8x128xf32> to vector<2x8xf32>
    %238 = vector.shape_cast %237 : vector<2x8xf32> to vector<2x8x1xf32>
    %239 = vector.broadcast %238 : vector<2x8x1xf32> to vector<2x8x128xf32>
    %240 = arith.subf %236, %239 : vector<2x8x128xf32>
    %241 = math.exp %240 : vector<2x8x128xf32>
    %cst_101 = arith.constant dense<0.000000e+00> : vector<2x8xf32>
    %242 = vector.multi_reduction <add>, %241, %cst_101 [2] : vector<2x8x128xf32> to vector<2x8xf32>
    %243 = vector.shape_cast %242 : vector<2x8xf32> to vector<2x8x1xf32>
    %244 = vector.broadcast %243 : vector<2x8x1xf32> to vector<2x8x128xf32>
    %245 = arith.divf %241, %244 : vector<2x8x128xf32>
    %246 = arith.truncf %245 : vector<2x8x128xf32> to vector<2x8x128xbf16>
    %247 = vector.shape_cast %8 : vector<1x128xbf16> to vector<1x1x128xbf16>
    %248 = vector.broadcast %247 : vector<1x1x128xbf16> to vector<2x128x128xbf16>
    %249 = arith.mulf %226, %248 : vector<2x128x128xbf16>
    "tpu.trace_start"() <{level = 10 : i32, message = "bqk,bkd->bqd"}> : () -> ()
    %cst_102 = arith.constant dense<0.000000e+00> : vector<2x8x128xf32>
    %250 = tpu.matmul %246, %249, %cst_102 {dimension_numbers = #tpu.dot_dimension_numbers<[2], [1], [1], [2], [0, 0, 0, 1, 1, 2], [0], [0]>} : vector<2x8x128xbf16>, vector<2x128x128xbf16>, vector<2x8x128xf32> -> vector<2x8x128xf32>
    "tpu.trace_stop"() : () -> ()
    %251 = arith.addf %227, %250 : vector<2x8x128xf32>
    %252 = vector.shape_cast %16 : vector<1x128xbf16> to vector<1x1x128xbf16>
    %253 = vector.broadcast %252 : vector<1x1x128xbf16> to vector<2x128x128xbf16>
    %254 = arith.mulf %224, %253 : vector<2x128x128xbf16>
    "tpu.trace_start"() <{level = 10 : i32, message = "bqd,bkd->bqk"}> : () -> ()
    %cst_103 = arith.constant dense<0.000000e+00> : vector<2x8x128xf32>
    %255 = tpu.matmul %222, %254, %cst_103 {dimension_numbers = #tpu.dot_dimension_numbers<[2], [2], [1], [1], [0, 0, 0, 1, 1, 1], [0], [0]>} : vector<2x8x128xbf16>, vector<2x128x128xbf16>, vector<2x8x128xf32> -> vector<2x8x128xf32>
    "tpu.trace_stop"() : () -> ()
    %cst_104 = arith.constant 0.176776692 : f32
    %256 = vector.broadcast %cst_104 : f32 to vector<2x8x128xf32>
    %257 = arith.mulf %255, %256 : vector<2x8x128xf32>
    %258 = vector.shape_cast %38 : vector<1x128xf32> to vector<1x1x128xf32>
    %259 = vector.broadcast %258 : vector<1x1x128xf32> to vector<2x8x128xf32>
    %260 = arith.addf %257, %259 : vector<2x8x128xf32>
    %cst_105 = arith.constant dense<0xFF800000> : vector<2x8xf32>
    %261 = vector.multi_reduction <maximumf>, %260, %cst_105 [2] : vector<2x8x128xf32> to vector<2x8xf32>
    %262 = vector.shape_cast %261 : vector<2x8xf32> to vector<2x8x1xf32>
    %263 = vector.broadcast %262 : vector<2x8x1xf32> to vector<2x8x128xf32>
    %264 = arith.subf %260, %263 : vector<2x8x128xf32>
    %265 = math.exp %264 : vector<2x8x128xf32>
    %cst_106 = arith.constant dense<0.000000e+00> : vector<2x8xf32>
    %266 = vector.multi_reduction <add>, %265, %cst_106 [2] : vector<2x8x128xf32> to vector<2x8xf32>
    %267 = vector.shape_cast %266 : vector<2x8xf32> to vector<2x8x1xf32>
    %268 = vector.broadcast %267 : vector<2x8x1xf32> to vector<2x8x128xf32>
    %269 = arith.divf %265, %268 : vector<2x8x128xf32>
    %270 = arith.truncf %269 : vector<2x8x128xf32> to vector<2x8x128xbf16>
    %271 = vector.shape_cast %16 : vector<1x128xbf16> to vector<1x1x128xbf16>
    %272 = vector.broadcast %271 : vector<1x1x128xbf16> to vector<2x128x128xbf16>
    %273 = arith.mulf %226, %272 : vector<2x128x128xbf16>
    "tpu.trace_start"() <{level = 10 : i32, message = "bqk,bkd->bqd"}> : () -> ()
    %cst_107 = arith.constant dense<0.000000e+00> : vector<2x8x128xf32>
    %274 = tpu.matmul %270, %273, %cst_107 {dimension_numbers = #tpu.dot_dimension_numbers<[2], [1], [1], [2], [0, 0, 0, 1, 1, 2], [0], [0]>} : vector<2x8x128xbf16>, vector<2x128x128xbf16>, vector<2x8x128xf32> -> vector<2x8x128xf32>
    "tpu.trace_stop"() : () -> ()
    %275 = arith.addf %251, %274 : vector<2x8x128xf32>
    %276 = vector.shape_cast %24 : vector<1x128xbf16> to vector<1x1x128xbf16>
    %277 = vector.broadcast %276 : vector<1x1x128xbf16> to vector<2x128x128xbf16>
    %278 = arith.mulf %224, %277 : vector<2x128x128xbf16>
    "tpu.trace_start"() <{level = 10 : i32, message = "bqd,bkd->bqk"}> : () -> ()
    %cst_108 = arith.constant dense<0.000000e+00> : vector<2x8x128xf32>
    %279 = tpu.matmul %222, %278, %cst_108 {dimension_numbers = #tpu.dot_dimension_numbers<[2], [2], [1], [1], [0, 0, 0, 1, 1, 1], [0], [0]>} : vector<2x8x128xbf16>, vector<2x128x128xbf16>, vector<2x8x128xf32> -> vector<2x8x128xf32>
    "tpu.trace_stop"() : () -> ()
    %cst_109 = arith.constant 0.176776692 : f32
    %280 = vector.broadcast %cst_109 : f32 to vector<2x8x128xf32>
    %281 = arith.mulf %279, %280 : vector<2x8x128xf32>
    %282 = vector.shape_cast %38 : vector<1x128xf32> to vector<1x1x128xf32>
    %283 = vector.broadcast %282 : vector<1x1x128xf32> to vector<2x8x128xf32>
    %284 = arith.addf %281, %283 : vector<2x8x128xf32>
    %cst_110 = arith.constant dense<0xFF800000> : vector<2x8xf32>
    %285 = vector.multi_reduction <maximumf>, %284, %cst_110 [2] : vector<2x8x128xf32> to vector<2x8xf32>
    %286 = vector.shape_cast %285 : vector<2x8xf32> to vector<2x8x1xf32>
    %287 = vector.broadcast %286 : vector<2x8x1xf32> to vector<2x8x128xf32>
    %288 = arith.subf %284, %287 : vector<2x8x128xf32>
    %289 = math.exp %288 : vector<2x8x128xf32>
    %cst_111 = arith.constant dense<0.000000e+00> : vector<2x8xf32>
    %290 = vector.multi_reduction <add>, %289, %cst_111 [2] : vector<2x8x128xf32> to vector<2x8xf32>
    %291 = vector.shape_cast %290 : vector<2x8xf32> to vector<2x8x1xf32>
    %292 = vector.broadcast %291 : vector<2x8x1xf32> to vector<2x8x128xf32>
    %293 = arith.divf %289, %292 : vector<2x8x128xf32>
    %294 = arith.truncf %293 : vector<2x8x128xf32> to vector<2x8x128xbf16>
    %295 = vector.shape_cast %24 : vector<1x128xbf16> to vector<1x1x128xbf16>
    %296 = vector.broadcast %295 : vector<1x1x128xbf16> to vector<2x128x128xbf16>
    %297 = arith.mulf %226, %296 : vector<2x128x128xbf16>
    "tpu.trace_start"() <{level = 10 : i32, message = "bqk,bkd->bqd"}> : () -> ()
    %cst_112 = arith.constant dense<0.000000e+00> : vector<2x8x128xf32>
    %298 = tpu.matmul %294, %297, %cst_112 {dimension_numbers = #tpu.dot_dimension_numbers<[2], [1], [1], [2], [0, 0, 0, 1, 1, 2], [0], [0]>} : vector<2x8x128xbf16>, vector<2x128x128xbf16>, vector<2x8x128xf32> -> vector<2x8x128xf32>
    "tpu.trace_stop"() : () -> ()
    %299 = arith.addf %275, %298 : vector<2x8x128xf32>
    %300 = vector.shape_cast %32 : vector<1x128xbf16> to vector<1x1x128xbf16>
    %301 = vector.broadcast %300 : vector<1x1x128xbf16> to vector<2x128x128xbf16>
    %302 = arith.mulf %224, %301 : vector<2x128x128xbf16>
    "tpu.trace_start"() <{level = 10 : i32, message = "bqd,bkd->bqk"}> : () -> ()
    %cst_113 = arith.constant dense<0.000000e+00> : vector<2x8x128xf32>
    %303 = tpu.matmul %222, %302, %cst_113 {dimension_numbers = #tpu.dot_dimension_numbers<[2], [2], [1], [1], [0, 0, 0, 1, 1, 1], [0], [0]>} : vector<2x8x128xbf16>, vector<2x128x128xbf16>, vector<2x8x128xf32> -> vector<2x8x128xf32>
    "tpu.trace_stop"() : () -> ()
    %cst_114 = arith.constant 0.176776692 : f32
    %304 = vector.broadcast %cst_114 : f32 to vector<2x8x128xf32>
    %305 = arith.mulf %303, %304 : vector<2x8x128xf32>
    %306 = vector.shape_cast %38 : vector<1x128xf32> to vector<1x1x128xf32>
    %307 = vector.broadcast %306 : vector<1x1x128xf32> to vector<2x8x128xf32>
    %308 = arith.addf %305, %307 : vector<2x8x128xf32>
    %cst_115 = arith.constant dense<0xFF800000> : vector<2x8xf32>
    %309 = vector.multi_reduction <maximumf>, %308, %cst_115 [2] : vector<2x8x128xf32> to vector<2x8xf32>
    %310 = vector.shape_cast %309 : vector<2x8xf32> to vector<2x8x1xf32>
    %311 = vector.broadcast %310 : vector<2x8x1xf32> to vector<2x8x128xf32>
    %312 = arith.subf %308, %311 : vector<2x8x128xf32>
    %313 = math.exp %312 : vector<2x8x128xf32>
    %cst_116 = arith.constant dense<0.000000e+00> : vector<2x8xf32>
    %314 = vector.multi_reduction <add>, %313, %cst_116 [2] : vector<2x8x128xf32> to vector<2x8xf32>
    %315 = vector.shape_cast %314 : vector<2x8xf32> to vector<2x8x1xf32>
    %316 = vector.broadcast %315 : vector<2x8x1xf32> to vector<2x8x128xf32>
    %317 = arith.divf %313, %316 : vector<2x8x128xf32>
    %318 = arith.truncf %317 : vector<2x8x128xf32> to vector<2x8x128xbf16>
    %319 = vector.shape_cast %32 : vector<1x128xbf16> to vector<1x1x128xbf16>
    %320 = vector.broadcast %319 : vector<1x1x128xbf16> to vector<2x128x128xbf16>
    %321 = arith.mulf %226, %320 : vector<2x128x128xbf16>
    "tpu.trace_start"() <{level = 10 : i32, message = "bqk,bkd->bqd"}> : () -> ()
    %cst_117 = arith.constant dense<0.000000e+00> : vector<2x8x128xf32>
    %322 = tpu.matmul %318, %321, %cst_117 {dimension_numbers = #tpu.dot_dimension_numbers<[2], [1], [1], [2], [0, 0, 0, 1, 1, 2], [0], [0]>} : vector<2x8x128xbf16>, vector<2x128x128xbf16>, vector<2x8x128xf32> -> vector<2x8x128xf32>
    "tpu.trace_stop"() : () -> ()
    %323 = arith.addf %299, %322 : vector<2x8x128xf32>
    %324 = vector.shape_cast %323 : vector<2x8x128xf32> to vector<16x128xf32>
    %325 = arith.truncf %324 : vector<16x128xf32> to vector<16x128xbf16>
    %cst_118 = arith.constant dense<0.000000e+00> : vector<16x128xf32>
    %326 = tpu.matmul %325, %209, %cst_118 {dimension_numbers = #tpu.dot_dimension_numbers<[1], [0], [0], [1], [0, 0, 1, 1], [], []>} : vector<16x128xbf16>, vector<128x128xbf16>, vector<16x128xf32> -> vector<16x128xf32>
    %327 = vector.broadcast %211 : vector<1x128xf32> to vector<16x128xf32>
    %328 = arith.addf %326, %327 : vector<16x128xf32>
    %c1_i32 = arith.constant 1 : i32
    %329 = arith.cmpi eq, %arg1, %c1_i32 : i32
    %330 = arith.extui %329 : i1 to i32
    %c0_i32_119 = arith.constant 0 : i32
    %331 = arith.cmpi ne, %330, %c0_i32_119 : i32
    scf.if %331 {
      %408 = vector.shape_cast %214 : vector<16x128xf32> to vector<2x8x128xf32>
      %c0_161 = arith.constant 0 : index
      %c0_162 = arith.constant 0 : index
      %c0_163 = arith.constant 0 : index
      %409 = vector.load %arg33[%c0_161, %c0_162, %c0_163] : memref<2x8x128xf32, #tpu.memory_space<vmem>>, vector<2x8x128xf32>
      tpu.vector_store %arg33[%c0_161, %c0_162, %c0_163], %408 {strides = array<i32>} : memref<2x8x128xf32, #tpu.memory_space<vmem>>, vector<2x8x128xf32>,
      %410 = vector.shape_cast %217 : vector<256x128xf32> to vector<2x128x128xf32>
      %c0_164 = arith.constant 0 : index
      %c0_165 = arith.constant 0 : index
      %c0_166 = arith.constant 0 : index
      %411 = vector.load %arg34[%c0_164, %c0_165, %c0_166] : memref<2x128x128xf32, #tpu.memory_space<vmem>>, vector<2x128x128xf32>
      tpu.vector_store %arg34[%c0_164, %c0_165, %c0_166], %410 {strides = array<i32>} : memref<2x128x128xf32, #tpu.memory_space<vmem>>, vector<2x128x128xf32>,
      %412 = vector.shape_cast %220 : vector<256x128xf32> to vector<2x128x128xf32>
      %c0_167 = arith.constant 0 : index
      %c0_168 = arith.constant 0 : index
      %c0_169 = arith.constant 0 : index
      %413 = vector.load %arg35[%c0_167, %c0_168, %c0_169] : memref<2x128x128xf32, #tpu.memory_space<vmem>>, vector<2x128x128xf32>
      tpu.vector_store %arg35[%c0_167, %c0_168, %c0_169], %412 {strides = array<i32>} : memref<2x128x128xf32, #tpu.memory_space<vmem>>, vector<2x128x128xf32>,
      %414 = arith.addf %245, %269 : vector<2x8x128xf32>
      %415 = arith.addf %236, %260 : vector<2x8x128xf32>
      %416 = arith.addf %414, %293 : vector<2x8x128xf32>
      %417 = arith.addf %415, %284 : vector<2x8x128xf32>
      %418 = arith.addf %416, %317 : vector<2x8x128xf32>
      %419 = arith.addf %417, %308 : vector<2x8x128xf32>
      %cst_170 = arith.constant 2.500000e-01 : f32
      %420 = vector.broadcast %cst_170 : f32 to vector<2x8x128xf32>
      %421 = arith.mulf %418, %420 : vector<2x8x128xf32>
      %c0_171 = arith.constant 0 : index
      %c0_172 = arith.constant 0 : index
      %c0_173 = arith.constant 0 : index
      %422 = vector.load %arg36[%c0_171, %c0_172, %c0_173] : memref<2x8x128xf32, #tpu.memory_space<vmem>>, vector<2x8x128xf32>
      tpu.vector_store %arg36[%c0_171, %c0_172, %c0_173], %421 {strides = array<i32>} : memref<2x8x128xf32, #tpu.memory_space<vmem>>, vector<2x8x128xf32>,
      %cst_174 = arith.constant 2.500000e-01 : f32
      %423 = vector.broadcast %cst_174 : f32 to vector<2x8x128xf32>
      %424 = arith.mulf %419, %423 : vector<2x8x128xf32>
      %c0_175 = arith.constant 0 : index
      %c0_176 = arith.constant 0 : index
      %c0_177 = arith.constant 0 : index
      %425 = vector.load %arg37[%c0_175, %c0_176, %c0_177] : memref<2x8x128xf32, #tpu.memory_space<vmem>>, vector<2x8x128xf32>
      tpu.vector_store %arg37[%c0_175, %c0_176, %c0_177], %424 {strides = array<i32>} : memref<2x8x128xf32, #tpu.memory_space<vmem>>, vector<2x8x128xf32>,
    } else {
    }
    %332 = arith.addf %194, %328 : vector<16x128xf32>
    %c0_120 = arith.constant 0 : index
    %c0_121 = arith.constant 0 : index
    %c0_122 = arith.constant 0 : index
    %333 = vector.load %arg26[%c0_120, %c0_121, %c0_122] : memref<1x1x128xf32, #tpu.memory_space<vmem>>, vector<1x1x128xf32>
    %334 = vector.shape_cast %333 : vector<1x1x128xf32> to vector<1x128xf32>
    %c0_123 = arith.constant 0 : index
    %c0_124 = arith.constant 0 : index
    %c0_125 = arith.constant 0 : index
    %335 = vector.load %arg27[%c0_123, %c0_124, %c0_125] : memref<1x1x128xf32, #tpu.memory_space<vmem>>, vector<1x1x128xf32>
    %336 = vector.shape_cast %335 : vector<1x1x128xf32> to vector<1x128xf32>
    %cst_126 = arith.constant dense<0.000000e+00> : vector<16xf32>
    %337 = vector.multi_reduction <add>, %332, %cst_126 [1] : vector<16x128xf32> to vector<16xf32>
    %338 = vector.shape_cast %337 : vector<16xf32> to vector<16x1xf32>
    %cst_127 = arith.constant 1.280000e+02 : f32
    %339 = vector.broadcast %cst_127 : f32 to vector<16x1xf32>
    %340 = arith.divf %338, %339 : vector<16x1xf32>
    %341 = vector.broadcast %340 : vector<16x1xf32> to vector<16x128xf32>
    %342 = arith.subf %332, %341 : vector<16x128xf32>
    %343 = arith.mulf %342, %342 : vector<16x128xf32>
    %cst_128 = arith.constant dense<0.000000e+00> : vector<16xf32>
    %344 = vector.multi_reduction <add>, %343, %cst_128 [1] : vector<16x128xf32> to vector<16xf32>
    %345 = vector.shape_cast %344 : vector<16xf32> to vector<16x1xf32>
    %cst_129 = arith.constant 1.280000e+02 : f32
    %346 = vector.broadcast %cst_129 : f32 to vector<16x1xf32>
    %347 = arith.divf %345, %346 : vector<16x1xf32>
    %348 = vector.broadcast %340 : vector<16x1xf32> to vector<16x128xf32>
    %349 = arith.subf %332, %348 : vector<16x128xf32>
    %cst_130 = arith.constant 9.99999974E-6 : f32
    %350 = vector.broadcast %cst_130 : f32 to vector<16x1xf32>
    %351 = arith.addf %347, %350 : vector<16x1xf32>
    %352 = math.rsqrt %351 : vector<16x1xf32>
    %353 = vector.broadcast %352 : vector<16x1xf32> to vector<16x128xf32>
    %354 = arith.mulf %349, %353 : vector<16x128xf32>
    %355 = vector.broadcast %334 : vector<1x128xf32> to vector<16x128xf32>
    %356 = arith.mulf %354, %355 : vector<16x128xf32>
    %357 = vector.broadcast %336 : vector<1x128xf32> to vector<16x128xf32>
    %358 = arith.addf %356, %357 : vector<16x128xf32>
    %359 = arith.truncf %358 : vector<16x128xf32> to vector<16x128xbf16>
    %c0_131 = arith.constant 0 : index
    %c0_132 = arith.constant 0 : index
    %c0_133 = arith.constant 0 : index
    %360 = vector.load %arg20[%c0_131, %c0_132, %c0_133] : memref<1x128x256xbf16, #tpu.memory_space<vmem>>, vector<1x128x256xbf16>
    %361 = vector.shape_cast %360 : vector<1x128x256xbf16> to vector<128x256xbf16>
    %cst_134 = arith.constant dense<0.000000e+00> : vector<16x256xf32>
    %362 = tpu.matmul %359, %361, %cst_134 {dimension_numbers = #tpu.dot_dimension_numbers<[1], [0], [0], [1], [0, 0, 1, 1], [], []>} : vector<16x128xbf16>, vector<128x256xbf16>, vector<16x256xf32> -> vector<16x256xf32>
    %c0_135 = arith.constant 0 : index
    %c0_136 = arith.constant 0 : index
    %c0_137 = arith.constant 0 : index
    %363 = vector.load %arg21[%c0_135, %c0_136, %c0_137] : memref<1x1x256xf32, #tpu.memory_space<vmem>>, vector<1x1x256xf32>
    %364 = vector.shape_cast %363 : vector<1x1x256xf32> to vector<1x256xf32>
    %365 = vector.broadcast %364 : vector<1x256xf32> to vector<16x256xf32>
    %366 = arith.addf %362, %365 : vector<16x256xf32>
    %cst_138 = arith.constant 0.000000e+00 : f32
    %367 = vector.broadcast %cst_138 : f32 to vector<16x256xf32>
    %368 = arith.maximumf %366, %367 : vector<16x256xf32>
    %369 = arith.truncf %368 : vector<16x256xf32> to vector<16x256xbf16>
    %c0_139 = arith.constant 0 : index
    %c0_140 = arith.constant 0 : index
    %c0_141 = arith.constant 0 : index
    %370 = vector.load %arg22[%c0_139, %c0_140, %c0_141] : memref<1x256x128xbf16, #tpu.memory_space<vmem>>, vector<1x256x128xbf16>
    %371 = vector.shape_cast %370 : vector<1x256x128xbf16> to vector<256x128xbf16>
    %cst_142 = arith.constant dense<0.000000e+00> : vector<16x128xf32>
    %372 = tpu.matmul %369, %371, %cst_142 {dimension_numbers = #tpu.dot_dimension_numbers<[1], [0], [0], [1], [0, 0, 1, 1], [], []>} : vector<16x256xbf16>, vector<256x128xbf16>, vector<16x128xf32> -> vector<16x128xf32>
    %c0_143 = arith.constant 0 : index
    %c0_144 = arith.constant 0 : index
    %c0_145 = arith.constant 0 : index
    %373 = vector.load %arg23[%c0_143, %c0_144, %c0_145] : memref<1x1x128xf32, #tpu.memory_space<vmem>>, vector<1x1x128xf32>
    %374 = vector.shape_cast %373 : vector<1x1x128xf32> to vector<1x128xf32>
    %375 = vector.broadcast %374 : vector<1x128xf32> to vector<16x128xf32>
    %376 = arith.addf %372, %375 : vector<16x128xf32>
    %377 = arith.addf %358, %376 : vector<16x128xf32>
    %c0_146 = arith.constant 0 : index
    %c0_147 = arith.constant 0 : index
    %c0_148 = arith.constant 0 : index
    %378 = vector.load %arg28[%c0_146, %c0_147, %c0_148] : memref<1x1x128xf32, #tpu.memory_space<vmem>>, vector<1x1x128xf32>
    %379 = vector.shape_cast %378 : vector<1x1x128xf32> to vector<1x128xf32>
    %c0_149 = arith.constant 0 : index
    %c0_150 = arith.constant 0 : index
    %c0_151 = arith.constant 0 : index
    %380 = vector.load %arg29[%c0_149, %c0_150, %c0_151] : memref<1x1x128xf32, #tpu.memory_space<vmem>>, vector<1x1x128xf32>
    %381 = vector.shape_cast %380 : vector<1x1x128xf32> to vector<1x128xf32>
    %cst_152 = arith.constant dense<0.000000e+00> : vector<16xf32>
    %382 = vector.multi_reduction <add>, %377, %cst_152 [1] : vector<16x128xf32> to vector<16xf32>
    %383 = vector.shape_cast %382 : vector<16xf32> to vector<16x1xf32>
    %cst_153 = arith.constant 1.280000e+02 : f32
    %384 = vector.broadcast %cst_153 : f32 to vector<16x1xf32>
    %385 = arith.divf %383, %384 : vector<16x1xf32>
    %386 = vector.broadcast %385 : vector<16x1xf32> to vector<16x128xf32>
    %387 = arith.subf %377, %386 : vector<16x128xf32>
    %388 = arith.mulf %387, %387 : vector<16x128xf32>
    %cst_154 = arith.constant dense<0.000000e+00> : vector<16xf32>
    %389 = vector.multi_reduction <add>, %388, %cst_154 [1] : vector<16x128xf32> to vector<16xf32>
    %390 = vector.shape_cast %389 : vector<16xf32> to vector<16x1xf32>
    %cst_155 = arith.constant 1.280000e+02 : f32
    %391 = vector.broadcast %cst_155 : f32 to vector<16x1xf32>
    %392 = arith.divf %390, %391 : vector<16x1xf32>
    %393 = vector.broadcast %385 : vector<16x1xf32> to vector<16x128xf32>
    %394 = arith.subf %377, %393 : vector<16x128xf32>
    %cst_156 = arith.constant 9.99999974E-6 : f32
    %395 = vector.broadcast %cst_156 : f32 to vector<16x1xf32>
    %396 = arith.addf %392, %395 : vector<16x1xf32>
    %397 = math.rsqrt %396 : vector<16x1xf32>
    %398 = vector.broadcast %397 : vector<16x1xf32> to vector<16x128xf32>
    %399 = arith.mulf %394, %398 : vector<16x128xf32>
    %400 = vector.broadcast %379 : vector<1x128xf32> to vector<16x128xf32>
    %401 = arith.mulf %399, %400 : vector<16x128xf32>
    %402 = vector.broadcast %381 : vector<1x128xf32> to vector<16x128xf32>
    %403 = arith.addf %401, %402 : vector<16x128xf32>
    %c0_157 = arith.constant 0 : index
    %c0_158 = arith.constant 0 : index
    %404 = vector.load %arg38[%c0_157, %c0_158] : memref<16x128xf32, #tpu.memory_space<vmem>>, vector<16x128xf32>
    tpu.vector_store %arg38[%c0_157, %c0_158], %403 {strides = array<i32>} : memref<16x128xf32, #tpu.memory_space<vmem>>, vector<16x128xf32>,
    %c1_i32_159 = arith.constant 1 : i32
    %405 = arith.cmpi eq, %arg1, %c1_i32_159 : i32
    %406 = arith.extui %405 : i1 to i32
    %c0_i32_160 = arith.constant 0 : i32
    %407 = arith.cmpi ne, %406, %c0_i32_160 : i32
    scf.if %407 {
      %c0_161 = arith.constant 0 : index
      %c0_162 = arith.constant 0 : index
      %408 = vector.load %arg30[%c0_161, %c0_162] : memref<1x128xf32, #tpu.memory_space<vmem>>, vector<1x128xf32>
      %c0_163 = arith.constant 0 : index
      %c0_164 = arith.constant 0 : index
      %409 = vector.load %arg31[%c0_163, %c0_164] : memref<1x128xf32, #tpu.memory_space<vmem>>, vector<1x128xf32>
      %cst_165 = arith.constant dense<0.000000e+00> : vector<16xf32>
      %410 = vector.multi_reduction <add>, %403, %cst_165 [1] : vector<16x128xf32> to vector<16xf32>
      %411 = vector.shape_cast %410 : vector<16xf32> to vector<16x1xf32>
      %cst_166 = arith.constant 1.280000e+02 : f32
      %412 = vector.broadcast %cst_166 : f32 to vector<16x1xf32>
      %413 = arith.divf %411, %412 : vector<16x1xf32>
      %414 = vector.broadcast %413 : vector<16x1xf32> to vector<16x128xf32>
      %415 = arith.subf %403, %414 : vector<16x128xf32>
      %416 = arith.mulf %415, %415 : vector<16x128xf32>
      %cst_167 = arith.constant dense<0.000000e+00> : vector<16xf32>
      %417 = vector.multi_reduction <add>, %416, %cst_167 [1] : vector<16x128xf32> to vector<16xf32>
      %418 = vector.shape_cast %417 : vector<16xf32> to vector<16x1xf32>
      %cst_168 = arith.constant 1.280000e+02 : f32
      %419 = vector.broadcast %cst_168 : f32 to vector<16x1xf32>
      %420 = arith.divf %418, %419 : vector<16x1xf32>
      %421 = vector.broadcast %413 : vector<16x1xf32> to vector<16x128xf32>
      %422 = arith.subf %403, %421 : vector<16x128xf32>
      %cst_169 = arith.constant 9.99999974E-6 : f32
      %423 = vector.broadcast %cst_169 : f32 to vector<16x1xf32>
      %424 = arith.addf %420, %423 : vector<16x1xf32>
      %425 = math.rsqrt %424 : vector<16x1xf32>
      %426 = vector.broadcast %425 : vector<16x1xf32> to vector<16x128xf32>
      %427 = arith.mulf %422, %426 : vector<16x128xf32>
      %428 = vector.broadcast %408 : vector<1x128xf32> to vector<16x128xf32>
      %429 = arith.mulf %427, %428 : vector<16x128xf32>
      %430 = vector.broadcast %409 : vector<1x128xf32> to vector<16x128xf32>
      %431 = arith.addf %429, %430 : vector<16x128xf32>
      %432 = vector.shape_cast %431 : vector<16x128xf32> to vector<2x8x128xf32>
      %c0_170 = arith.constant 0 : index
      %c0_171 = arith.constant 0 : index
      %c0_172 = arith.constant 0 : index
      %433 = vector.load %arg32[%c0_170, %c0_171, %c0_172] : memref<2x8x128xf32, #tpu.memory_space<vmem>>, vector<2x8x128xf32>
      tpu.vector_store %arg32[%c0_170, %c0_171, %c0_172], %432 {strides = array<i32>} : memref<2x8x128xf32, #tpu.memory_space<vmem>>, vector<2x8x128xf32>,
    } else {
    }
    return
  }
  func.func @transform_0(%arg0: i32, %arg1: i32) -> (i32, i32, i32) {
    %c0_i32 = arith.constant 0 : i32
    %c0_i32_0 = arith.constant 0 : i32
    %c0_i32_1 = arith.constant 0 : i32
    return %arg0, %c0_i32, %c0_i32_0 : i32, i32, i32
  }
  func.func @transform_1(%arg0: i32, %arg1: i32) -> (i32, i32, i32) {
    %c0_i32 = arith.constant 0 : i32
    %c0_i32_0 = arith.constant 0 : i32
    %c0_i32_1 = arith.constant 0 : i32
    return %arg0, %c0_i32, %c0_i32_0 : i32, i32, i32
  }
  func.func @transform_2(%arg0: i32, %arg1: i32) -> (i32, i32, i32) {
    %c0_i32 = arith.constant 0 : i32
    %c0_i32_0 = arith.constant 0 : i32
    %c0_i32_1 = arith.constant 0 : i32
    return %arg1, %c0_i32, %c0_i32_0 : i32, i32, i32
  }
  func.func @transform_3(%arg0: i32, %arg1: i32) -> (i32, i32, i32) {
    %c0_i32 = arith.constant 0 : i32
    %c0_i32_0 = arith.constant 0 : i32
    %c0_i32_1 = arith.constant 0 : i32
    return %arg1, %c0_i32, %c0_i32_0 : i32, i32, i32
  }
  func.func @transform_4(%arg0: i32, %arg1: i32) -> (i32, i32, i32) {
    %c0_i32 = arith.constant 0 : i32
    %c0_i32_0 = arith.constant 0 : i32
    %c0_i32_1 = arith.constant 0 : i32
    return %arg1, %c0_i32, %c0_i32_0 : i32, i32, i32
  }
  func.func @transform_5(%arg0: i32, %arg1: i32) -> (i32, i32, i32) {
    %c0_i32 = arith.constant 0 : i32
    %c0_i32_0 = arith.constant 0 : i32
    %c0_i32_1 = arith.constant 0 : i32
    return %arg1, %c0_i32, %c0_i32_0 : i32, i32, i32
  }
  func.func @transform_6(%arg0: i32, %arg1: i32) -> (i32, i32, i32) {
    %c0_i32 = arith.constant 0 : i32
    %c0_i32_0 = arith.constant 0 : i32
    %c0_i32_1 = arith.constant 0 : i32
    return %arg1, %c0_i32, %c0_i32_0 : i32, i32, i32
  }
  func.func @transform_7(%arg0: i32, %arg1: i32) -> (i32, i32, i32) {
    %c0_i32 = arith.constant 0 : i32
    %c0_i32_0 = arith.constant 0 : i32
    %c0_i32_1 = arith.constant 0 : i32
    return %arg1, %c0_i32, %c0_i32_0 : i32, i32, i32
  }
  func.func @transform_8(%arg0: i32, %arg1: i32) -> (i32, i32, i32) {
    %c0_i32 = arith.constant 0 : i32
    %c0_i32_0 = arith.constant 0 : i32
    %c0_i32_1 = arith.constant 0 : i32
    return %arg1, %c0_i32, %c0_i32_0 : i32, i32, i32
  }
  func.func @transform_9(%arg0: i32, %arg1: i32) -> (i32, i32, i32) {
    %c0_i32 = arith.constant 0 : i32
    %c0_i32_0 = arith.constant 0 : i32
    %c0_i32_1 = arith.constant 0 : i32
    return %arg1, %c0_i32, %c0_i32_0 : i32, i32, i32
  }
  func.func @transform_10(%arg0: i32, %arg1: i32) -> (i32, i32, i32) {
    %c0_i32 = arith.constant 0 : i32
    %c0_i32_0 = arith.constant 0 : i32
    %c0_i32_1 = arith.constant 0 : i32
    return %arg1, %c0_i32, %c0_i32_0 : i32, i32, i32
  }
  func.func @transform_11(%arg0: i32, %arg1: i32) -> (i32, i32, i32) {
    %c0_i32 = arith.constant 0 : i32
    %c0_i32_0 = arith.constant 0 : i32
    %c0_i32_1 = arith.constant 0 : i32
    return %arg1, %c0_i32, %c0_i32_0 : i32, i32, i32
  }
  func.func @transform_12(%arg0: i32, %arg1: i32) -> (i32, i32, i32) {
    %c0_i32 = arith.constant 0 : i32
    %c0_i32_0 = arith.constant 0 : i32
    %c0_i32_1 = arith.constant 0 : i32
    return %arg1, %c0_i32, %c0_i32_0 : i32, i32, i32
  }
  func.func @transform_13(%arg0: i32, %arg1: i32) -> (i32, i32, i32) {
    %c0_i32 = arith.constant 0 : i32
    %c0_i32_0 = arith.constant 0 : i32
    %c0_i32_1 = arith.constant 0 : i32
    return %arg1, %c0_i32, %c0_i32_0 : i32, i32, i32
  }
  func.func @transform_14(%arg0: i32, %arg1: i32) -> (i32, i32, i32) {
    %c0_i32 = arith.constant 0 : i32
    %c0_i32_0 = arith.constant 0 : i32
    %c0_i32_1 = arith.constant 0 : i32
    return %arg1, %c0_i32, %c0_i32_0 : i32, i32, i32
  }
  func.func @transform_15(%arg0: i32, %arg1: i32) -> (i32, i32, i32) {
    %c0_i32 = arith.constant 0 : i32
    %c0_i32_0 = arith.constant 0 : i32
    %c0_i32_1 = arith.constant 0 : i32
    return %arg1, %c0_i32, %c0_i32_0 : i32, i32, i32
  }
  func.func @transform_16(%arg0: i32, %arg1: i32) -> (i32, i32, i32) {
    %c0_i32 = arith.constant 0 : i32
    %c0_i32_0 = arith.constant 0 : i32
    %c0_i32_1 = arith.constant 0 : i32
    return %arg1, %c0_i32, %c0_i32_0 : i32, i32, i32
  }
  func.func @transform_17(%arg0: i32, %arg1: i32) -> (i32, i32, i32) {
    %c0_i32 = arith.constant 0 : i32
    %c0_i32_0 = arith.constant 0 : i32
    %c0_i32_1 = arith.constant 0 : i32
    return %arg1, %c0_i32, %c0_i32_0 : i32, i32, i32
  }
  func.func @transform_18(%arg0: i32, %arg1: i32) -> (i32, i32, i32) {
    %c0_i32 = arith.constant 0 : i32
    %c0_i32_0 = arith.constant 0 : i32
    %c0_i32_1 = arith.constant 0 : i32
    return %arg1, %c0_i32, %c0_i32_0 : i32, i32, i32
  }
  func.func @transform_19(%arg0: i32, %arg1: i32) -> (i32, i32, i32) {
    %c0_i32 = arith.constant 0 : i32
    %c0_i32_0 = arith.constant 0 : i32
    %c0_i32_1 = arith.constant 0 : i32
    return %arg1, %c0_i32, %c0_i32_0 : i32, i32, i32
  }
  func.func @transform_20(%arg0: i32, %arg1: i32) -> (i32, i32, i32) {
    %c0_i32 = arith.constant 0 : i32
    %c0_i32_0 = arith.constant 0 : i32
    %c0_i32_1 = arith.constant 0 : i32
    return %arg1, %c0_i32, %c0_i32_0 : i32, i32, i32
  }
  func.func @transform_21(%arg0: i32, %arg1: i32) -> (i32, i32, i32) {
    %c0_i32 = arith.constant 0 : i32
    %c0_i32_0 = arith.constant 0 : i32
    %c0_i32_1 = arith.constant 0 : i32
    return %arg1, %c0_i32, %c0_i32_0 : i32, i32, i32
  }
  func.func @transform_22(%arg0: i32, %arg1: i32) -> (i32, i32, i32) {
    %c0_i32 = arith.constant 0 : i32
    %c0_i32_0 = arith.constant 0 : i32
    %c0_i32_1 = arith.constant 0 : i32
    return %arg1, %c0_i32, %c0_i32_0 : i32, i32, i32
  }
  func.func @transform_23(%arg0: i32, %arg1: i32) -> (i32, i32, i32) {
    %c0_i32 = arith.constant 0 : i32
    %c0_i32_0 = arith.constant 0 : i32
    %c0_i32_1 = arith.constant 0 : i32
    return %arg1, %c0_i32, %c0_i32_0 : i32, i32, i32
  }
  func.func @transform_24(%arg0: i32, %arg1: i32) -> (i32, i32, i32) {
    %c0_i32 = arith.constant 0 : i32
    %c0_i32_0 = arith.constant 0 : i32
    %c0_i32_1 = arith.constant 0 : i32
    return %arg1, %c0_i32, %c0_i32_0 : i32, i32, i32
  }
  func.func @transform_25(%arg0: i32, %arg1: i32) -> (i32, i32, i32) {
    %c0_i32 = arith.constant 0 : i32
    %c0_i32_0 = arith.constant 0 : i32
    %c0_i32_1 = arith.constant 0 : i32
    return %arg1, %c0_i32, %c0_i32_0 : i32, i32, i32
  }
  func.func @transform_26(%arg0: i32, %arg1: i32) -> (i32, i32, i32) {
    %c0_i32 = arith.constant 0 : i32
    %c0_i32_0 = arith.constant 0 : i32
    %c0_i32_1 = arith.constant 0 : i32
    return %arg1, %c0_i32, %c0_i32_0 : i32, i32, i32
  }
  func.func @transform_27(%arg0: i32, %arg1: i32) -> (i32, i32, i32) {
    %c0_i32 = arith.constant 0 : i32
    %c0_i32_0 = arith.constant 0 : i32
    %c0_i32_1 = arith.constant 0 : i32
    return %arg1, %c0_i32, %c0_i32_0 : i32, i32, i32
  }
  func.func @transform_28(%arg0: i32, %arg1: i32) -> (i32, i32) {
    %c0_i32 = arith.constant 0 : i32
    %c0_i32_0 = arith.constant 0 : i32
    %c0_i32_1 = arith.constant 0 : i32
    return %c0_i32, %c0_i32_0 : i32, i32
  }
  func.func @transform_29(%arg0: i32, %arg1: i32) -> (i32, i32) {
    %c0_i32 = arith.constant 0 : i32
    %c0_i32_0 = arith.constant 0 : i32
    %c0_i32_1 = arith.constant 0 : i32
    return %c0_i32, %c0_i32_0 : i32, i32
  }
  func.func @transform_30(%arg0: i32, %arg1: i32) -> (i32, i32, i32) {
    %c0_i32 = arith.constant 0 : i32
    %c0_i32_0 = arith.constant 0 : i32
    %c0_i32_1 = arith.constant 0 : i32
    return %arg0, %c0_i32, %c0_i32_0 : i32, i32, i32
  }
  func.func @transform_31(%arg0: i32, %arg1: i32) -> (i32, i32, i32) {
    %c0_i32 = arith.constant 0 : i32
    %c0_i32_0 = arith.constant 0 : i32
    %c0_i32_1 = arith.constant 0 : i32
    return %arg0, %c0_i32, %c0_i32_0 : i32, i32, i32
  }
  func.func @transform_32(%arg0: i32, %arg1: i32) -> (i32, i32, i32) {
    %c0_i32 = arith.constant 0 : i32
    %c0_i32_0 = arith.constant 0 : i32
    %c0_i32_1 = arith.constant 0 : i32
    return %arg0, %c0_i32, %c0_i32_0 : i32, i32, i32
  }
  func.func @transform_33(%arg0: i32, %arg1: i32) -> (i32, i32, i32) {
    %c0_i32 = arith.constant 0 : i32
    %c0_i32_0 = arith.constant 0 : i32
    %c0_i32_1 = arith.constant 0 : i32
    return %arg0, %c0_i32, %c0_i32_0 : i32, i32, i32
  }
  func.func @transform_34(%arg0: i32, %arg1: i32) -> (i32, i32, i32) {
    %c0_i32 = arith.constant 0 : i32
    %c0_i32_0 = arith.constant 0 : i32
    %c0_i32_1 = arith.constant 0 : i32
    return %arg0, %c0_i32, %c0_i32_0 : i32, i32, i32
  }
  func.func @transform_35(%arg0: i32, %arg1: i32) -> (i32, i32, i32) {
    %c0_i32 = arith.constant 0 : i32
    %c0_i32_0 = arith.constant 0 : i32
    %c0_i32_1 = arith.constant 0 : i32
    return %arg0, %c0_i32, %c0_i32_0 : i32, i32, i32
  }
}

</mosaic_0001>

<bundles_post_ra>
// kernel: tpu_custom_call.1
= control target key start
LH: loop header
LB: loop body
LE: loop exit
PB: predicated region body
PF: predicated region fallthrough
CT: control target
= control target key end

     0   :  { %s8338_s6 = smov 1   ;;  %s8339_s10 = smov 2   ;;  %s11000_s0 = inlined_call_operand.smem [shape: u32[36], index: -1, kind: input, shape index: {}] }
   0x1   :  { %s8409_s5 = sld [smem:[%s11000_s0]]   ;;  %s8340_s14 = smov 3  }
   0x2   :  { %s8414_s9 = sld [smem:[%s11000_s0 + %s8338_s6]]   ;;  %s8341_s18 = smov 4  }
   0x3   :  { %s8419_s13 = sld [smem:[%s11000_s0 + %s8339_s10]]   ;;  %s8342_s22 = smov 5  }
   0x4   :  { %s8424_s17 = sld [smem:[%s11000_s0 + %s8340_s14]]   ;;  %s8343_s26 = smov 6  }
   0x5   :  { %s8429_s21 = sld [smem:[%s11000_s0 + %s8341_s18]]   ;;  %s8344_s30 = smov 7  }
   0x6   :  { %s8434_s25 = sld [smem:[%s11000_s0 + %s8342_s22]]   ;;  %s8345_s4 = smov 8  }
   0x7   :  { %11143 = sst [smem:[#allocation44_spill]] %s8409_s5  ;;  %s8346_s10 = smov 9  }
   0x8   :  { %11144 = sst [smem:[#allocation45_spill]] %s8414_s9  ;;  %s8347_s15 = smov 10  }
   0x9   :  { %11145 = sst [smem:[#allocation46_spill]] %s8419_s13  ;;  %s8348_s20 = smov 11  }
   0xa   :  { %11146 = sst [smem:[#allocation47_spill]] %s8424_s17  ;;  %s8350_s1 = smov 13  }
   0xb   :  { %11147 = sst [smem:[#allocation48_spill]] %s8429_s21  ;;  %s8351_s7 = smov 14  }
   0xc   :  { %11148 = sst [smem:[#allocation49_spill]] %s8434_s25  ;;  %s8353_s22 = smov 16  }
   0xd   :  { %s8439_s29 = sld [smem:[%s11000_s0 + %s8343_s26]]   ;;  %s8349_s26 = smov 12  }
   0xe   :  { %s8444_s3 = sld [smem:[%s11000_s0 + %s8344_s30]]   ;;  %s8354_s28 = smov 17  }
   0xf   :  { %s8449_s8 = sld [smem:[%s11000_s0 + %s8345_s4]]  }
  0x10   :  { %s8454_s14 = sld [smem:[%s11000_s0 + %s8346_s10]]  }
  0x11   :  { %s8459_s19 = sld [smem:[%s11000_s0 + %s8347_s15]]   ;;  %s8352_s15 = smov 15  }
  0x12   :  { %s8464_s24 = sld [smem:[%s11000_s0 + %s8348_s20]]  }
  0x13   :  { %11149 = sst [smem:[#allocation50_spill]] %s8439_s29 }
  0x14   :  { %11150 = sst [smem:[#allocation51_spill]] %s8444_s3 }
  0x15   :  { %11151 = sst [smem:[#allocation52_spill]] %s8449_s8 }
  0x16   :  { %11152 = sst [smem:[#allocation53_spill]] %s8454_s14 }
  0x17   :  { %11153 = sst [smem:[#allocation54_spill]] %s8459_s19 }
  0x18   :  { %11154 = sst [smem:[#allocation55_spill]] %s8464_s24 }
  0x19   :  { %s8469_s30 = sld [smem:[%s11000_s0 + %s8349_s26]]  }
  0x1a   :  { %s8474_s6 = sld [smem:[%s11000_s0 + %s8350_s1]]  }
  0x1b   :  { %s8479_s12 = sld [smem:[%s11000_s0 + %s8351_s7]]   ;;  %s8355_s7 = smov 18  }
  0x1c   :  { %s8484_s20 = sld [smem:[%s11000_s0 + %s8352_s15]]   ;;  %s8356_s15 = smov 19  }
  0x1d   :  { %s8489_s27 = sld [smem:[%s11000_s0 + %s8353_s22]]   ;;  %s8357_s22 = smov 20  }
  0x1e   :  { %s8494_s4 = sld [smem:[%s11000_s0 + %s8354_s28]]   ;;  %s8358_s28 = smov 21  }
  0x1f   :  { %11155 = sst [smem:[#allocation56_spill]] %s8469_s30 }
  0x20   :  { %11156 = sst [smem:[#allocation57_spill]] %s8474_s6 }
  0x21   :  { %11157 = sst [smem:[#allocation58_spill]] %s8479_s12 }
  0x22   :  { %11158 = sst [smem:[#allocation59_spill]] %s8484_s20 }
  0x23   :  { %11159 = sst [smem:[#allocation60_spill]] %s8489_s27 }
  0x24   :  { %11160 = sst [smem:[#allocation61_spill]] %s8494_s4 }
  0x25   :  { %s8499_s6 = sld [smem:[%s11000_s0 + %s8355_s7]]   ;;  %s8359_s7 = smov 22  }
  0x26   :  { %s8504_s20 = sld [smem:[%s11000_s0 + %s8356_s15]]   ;;  %s8360_s15 = smov 23  }
  0x27   :  { %s8509_s24 = sld [smem:[%s11000_s0 + %s8357_s22]]   ;;  %s8361_s22 = smov 24  }
  0x28   :  { %s8514_s4 = sld [smem:[%s11000_s0 + %s8358_s28]]   ;;  %s8362_s28 = smov 25  }
  0x29   :  { %s8519_s14 = sld [smem:[%s11000_s0 + %s8359_s7]]   ;;  %s8363_s7 = smov 26  }
  0x2a   :  { %s8529_s3 = sld [smem:[%s11000_s0 + %s8361_s22]]   ;;  %s8365_s22 = smov 28  }
  0x2b   :  { %11161 = sst [smem:[#allocation62_spill]] %s8499_s6 }
  0x2c   :  { %11162 = sst [smem:[#allocation63_spill]] %s8504_s20 }
  0x2d   :  { %11163 = sst [smem:[#allocation64_spill]] %s8509_s24 }
  0x2e   :  { %11164 = sst [smem:[#allocation65_spill]] %s8514_s4 }
  0x2f   :  { %11165 = sst [smem:[#allocation66_spill]] %s8519_s14 }
  0x30   :  { %s8524_s20 = sld [smem:[%s11000_s0 + %s8360_s15]]   ;;  %s8364_s15 = smov 27  }
  0x31   :  { %11167 = sst [smem:[#allocation68_spill]] %s8529_s3 }
  0x32   :  { %s8534_s4 = sld [smem:[%s11000_s0 + %s8362_s28]]   ;;  %s8366_s28 = smov 29  }
  0x33   :  { %s8539_s14 = sld [smem:[%s11000_s0 + %s8363_s7]]   ;;  %s8367_s7 = smov 30  }
  0x34   :  { %s8549_s3 = sld [smem:[%s11000_s0 + %s8365_s22]]   ;;  %s8369_s22 = smov 32  }
  0x36   :  { %11166 = sst [smem:[#allocation67_spill]] %s8524_s20 }
  0x37   :  { %s8544_s20 = sld [smem:[%s11000_s0 + %s8364_s15]]   ;;  %s8368_s15 = smov 31  }
  0x38   :  { %11168 = sst [smem:[#allocation69_spill]] %s8534_s4 }
  0x39   :  { %11169 = sst [smem:[#allocation70_spill]] %s8539_s14 }
  0x3a   :  { %11171 = sst [smem:[#allocation72_spill]] %s8549_s3 }
  0x3b   :  { %s8554_s4 = sld [smem:[%s11000_s0 + %s8366_s28]]   ;;  %s8370_s28 = smov 33  }
  0x3c   :  { %s8559_s14 = sld [smem:[%s11000_s0 + %s8367_s7]]   ;;  %s8371_s7 = smov 34  }
  0x3d   :  { %11170 = sst [smem:[#allocation71_spill]] %s8544_s20 }
  0x3e   :  { %s8564_s20 = sld [smem:[%s11000_s0 + %s8368_s15]]   ;;  %s8372_s15 = smov 35  }
  0x3f   :  { %s8569_s3 = sld [smem:[%s11000_s0 + %s8369_s22]]  }
  0x41   :  { %11172 = sst [smem:[#allocation73_spill]] %s8554_s4 }
  0x42   :  { %11173 = sst [smem:[#allocation74_spill]] %s8559_s14 }
  0x43   :  { %s8574_s4 = sld [smem:[%s11000_s0 + %s8370_s28]]  }
  0x44   :  { %11174 = sst [smem:[#allocation75_spill]] %s8564_s20 }
  0x45   :  { %11175 = sst [smem:[#allocation76_spill]] %s8569_s3 }
  0x46   :  { %s8579_s14 = sld [smem:[%s11000_s0 + %s8371_s7]]  }
  0x47   :  { %s8584_s20 = sld [smem:[%s11000_s0 + %s8372_s15]]  }
  0x49   :  { %11176 = sst [smem:[#allocation77_spill]] %s8574_s4 }
  0x4c   :  { %11177 = sst [smem:[#allocation78_spill]] %s8579_s14 }
  0x4d   :  { %11178 = sst [smem:[#allocation79_spill]] %s8584_s20 }
  0x4e   :  { %77 = vsyncpa [#allocation4], 0 }
  0x4f   :  { %79 = vsyncpa [#allocation4 + $0x1], 0 }
  0x50   :  { %80 = vsyncpa [#allocation7], 0 }
  0x51   :  { %82 = vsyncpa [#allocation7 + $0x1], 0 }
  0x52   :  { %83 = vsyncpa [#allocation10], 0 }
  0x53   :  { %85 = vsyncpa [#allocation10 + $0x1], 0 }
  0x54   :  { %86 = vsyncpa [#allocation13], 0 }
  0x55   :  { %88 = vsyncpa [#allocation13 + $0x1], 0 }
  0x56   :  { %89 = vsyncpa [#allocation16], 0 }
  0x57   :  { %91 = vsyncpa [#allocation16 + $0x1], 0 }
  0x58   :  { %92 = vsyncpa [#allocation19], 0 }
  0x59   :  { %94 = vsyncpa [#allocation19 + $0x1], 0 }
  0x5a   :  { %95 = vsyncpa [#allocation22], 0 }
  0x5b   :  { %97 = vsyncpa [#allocation22 + $0x1], 0 }
  0x5c   :  { %98 = vsyncpa [#allocation5], 0 }
  0x5d   :  { %100 = vsyncpa [#allocation5 + $0x1], 0 }
  0x5e   :  { %101 = vsyncpa [#allocation25], 0 }
  0x5f   :  { %103 = vsyncpa [#allocation25 + $0x1], 0 }
  0x60   :  { %104 = vsyncpa [#allocation28], 0 }
  0x61   :  { %106 = vsyncpa [#allocation28 + $0x1], 0 }
  0x62   :  { %107 = vsyncpa [#allocation31], 0 }
  0x63   :  { %109 = vsyncpa [#allocation31 + $0x1], 0  ;;  %s8586_s0 = smov 0   ;;  %s8588_s22 = smov 0  }
  0x64   :  { %s8590_s23 = smov 0   ;;  %s8592_s26 = smov 0  }
  0x65   :  { %s8594_s28 = smov 0   ;;  %s8596_s1 = smov 0  }
  0x66   :  { %s8598_s2 = smov 0   ;;  %s8600_s7 = smov 0  }
  0x67   :  { %s8602_s10 = smov 0   ;;  %s8604_s11 = smov 0  }
  0x68   :  { %s8606_s15 = smov 0  }
  0x69 LB: > { %s11179_s30 = sld [smem:[#allocation56_spill]]  ;;  %s8642_s16 = sadd.s32 4294967295, %s8336_s15   ;;  %s8336_s15 = sphi %s8606_s15, %s115_s15   ;;  %s8332_s11 = sphi %s8604_s11, %s11474_s11   ;;  %s8328_s10 = sphi %s8602_s10, %s11473_s10   ;;  %s8324_s7 = sphi %s8600_s7, %s11472_s7   ;;  %s8320_s2 = sphi %s8598_s2, %s11471_s2   ;;  %s8316_s1 = sphi %s8596_s1, %s11470_s1   ;;  %s8312_s28 = sphi %s8594_s28, %s11469_s28   ;;  %s8308_s26 = sphi %s8592_s26, %s11468_s26   ;;  %s8304_s23 = sphi %s8590_s23, %s11467_s23   ;;  %s8300_s22 = sphi %s8588_s22, %s11466_s22   ;;  %s8296_s0 = sphi %s8586_s0, %s11465_s0  }
  0x6a   : > { %s11180_s29 = sld [smem:[#allocation50_spill]]  ;;  %s124_s20 = sadd.s32 1, %s8328_s10 }
  0x6b   : > { %s11181_s19 = sld [smem:[#allocation54_spill]]  ;;  %s127_s14 = sadd.s32 1, %s8332_s11 }
  0x6c   : > { %s11182_s13 = sld [smem:[#allocation46_spill]]  ;;  %p125_p0 = scmp.ge.s32.totalorder %s124_s20, 2 }
  0x6d   : > { %s11183_s12 = sld [smem:[#allocation58_spill]]  ;;  %s134_s4 = sadd.s32 1, %s8316_s1 }
  0x6e   : > { %s11184_s6 = sld [smem:[#allocation62_spill]]  ;;  %p141_p1 = scmp.ne.s32.totalorder %s8316_s1, %s8312_s28 }
  0x6f   : > { %s11185_s5 = sld [smem:[#allocation44_spill]]  ;;  %p142_p2 = scmp.eq.s32.totalorder %s8336_s15, 0 }
  0x70   : > { %s11186_s27 = sld [smem:[#allocation60_spill]]  ;;  %s11476_s20 = smov (%p125_p0, %s124_s20), 0 }
  0x71   : > { %s11187_s8 = sld [smem:[#allocation52_spill]]  ;;  %s11478_s14 = smov (!%p125_p0, %s127_s14), %s8332_s11 }
  0x72   : > { %s11188_s21 = sld [smem:[#allocation48_spill]]  ;;  %p8659_p3 = por %p142_p2, %p141_p1 }
  0x73   : > { %s11189_s9 = sld [smem:[#allocation45_spill]]  ;;  %p11013_p4 = scmp.ne.s32.totalorder %s8312_s28, %s8308_s26 }
  0x74   : > { %11190 = sst [smem:[#allocation80_spill]] %s8300_s22  ;;  %p129_p5 = scmp.ge.s32.totalorder %s11478_s14, 2 }
  0x75   : > { %11191 = sst [smem:[#allocation81_spill]] %s8304_s23  ;;  %p148_p6 = scmp.eq.s32.totalorder %s8642_s16, 0 }
  0x76   : > { %11192 = sst [smem:[#allocation82_spill]] %s8308_s26  ;;  %s183_s3 = ssub.s32 %s8328_s10, %s11476_s20 }
  0x77   : > { %11193 = sst [smem:[#allocation83_spill]] %s8312_s28  ;;  %s11480_s14 = smov (%p129_p5, %s11478_s14), 0 }
  0x78   : > { %11194 = sst [smem:[#allocation84_spill]] %s8316_s1  ;;  %p8676_p7 = por %p148_p6, %p11013_p4 }
  0x79   : > { %11195 = sst [smem:[#allocation85_spill]] %s8320_s2  ;;  %p184_p8 = scmp.eq.s32.totalorder %s183_s3, 0 }
  0x7a   : > { %11196 = sst [smem:[#allocation86_spill]] %s8324_s7  ;;  %s186_s7 = sadd.s32 1, %s8304_s23 }
  0x7b   : > { %11197 = sst [smem:[#allocation87_spill]] %s8328_s10  ;;  %s131_s17 = ssub.s32 %s8332_s11, %s11480_s14 }
  0x7c   : > { %11198 = sst [smem:[#allocation88_spill]] %s8332_s11  ;;  %p193_p9 = scmp.ne.s32.totalorder %s8304_s23, %s8300_s22 }
  0x7d   : > { %11199 = sst [smem:[#allocation89_spill]] %s8336_s15  ;;  %p132_p10 = scmp.eq.s32.totalorder %s131_s17, 0 }
  0x7e   : > { %11200 = sst [smem:[#allocation90_spill]] %s8642_s16  ;;  %p199_p11 = scmp.ne.s32.totalorder %s8300_s22, %s8296_s0 }
  0x7f   : > { %11201 = sst [smem:[#allocation91_spill]] %s11476_s20  ;;  %p8694_p12 = por %p193_p9, %p142_p2 }
  0x80   : > { %11203 = sst [smem:[#allocation92_spill]] %s11480_s14  ;;  %p8700_p13 = por %p199_p11, %p148_p6 }
  0x81   : > { %s11204_s25 = scalar_select %p8676_p7, 1, 0 }
  0x82   : > { %s8687_s20 = scalar_select %p184_p8, %s8304_s23, %s186_s7  }
  0x83   : > { %11205 = sst [smem:[#allocation93_spill]] %s11204_s25  ;;  %p915_p0 = scmp.eq.s32.totalorder %s8642_s16, 3 }
  0x84   : > { %11206 = sst [smem:[#allocation94_spill]] %s8687_s20  ;;  %s11211_s14 = sadd.s32 4294967294, %s8336_s15  }
  0x85   : > { %s8690_s2 = scalar_select %p132_p10, %s8316_s1, %s134_s4  }
  0x86   : > { %s11209_s3 = scalar_select %p8700_p13, 1, 0 }
  0x87   : > { %11207 = sst [smem:[#allocation95_spill]] %s8690_s2  ;;  %p921_p5 = scmp.eq.s32.totalorder %s11211_s14, 3 }
  0x88   : > { %11210 = sst [smem:[#allocation96_spill]] %s11209_s3  ;;  %p7389_p4 = scmp.lt.s32.totalorder %s8336_s15, 4 }
  0x89   : > { %p8711_p8 = por %p915_p0, %p141_p1  ;;  %p11214_p10 = scmp.ne.s32.totalorder %s8312_s28, %s8308_s26 }
  0x8a   : > { %s8723_s0 = sand.u32 1, %s8316_s1   ;;  %p8727_p6 = pnand %p7389_p4, %p8659_p3 }
  0x8b   : > { %s11212_s17 = scalar_select %p8711_p8, 1, 0 }
  0x8c   : > { %p8718_p2 = por %p921_p5, %p11214_p10  ;;  %s8732_s14 = sand.u32 1, %s8336_s15  }
  0x8d   : > { %11213 = sst [smem:[#allocation97_spill]] %s11212_s17  ;;  %s6140_s2 = sshll.u32 %s8723_s0, 8 }
  0x8e   : > { %s11215_s4 = scalar_select %p8718_p2, 1, 0 }
  0x8f   : > { %s11217_s7 = scalar_select %p8727_p6, 1, 0 }
  0x90   : > { %11216 = sst [smem:[#allocation98_spill]] %s11215_s4  ;;  %s6346_s20 = sshll.u32 %s8332_s11, 12 }
  0x91   : > { %s8737_s26 = scalar_lea.hbm %s11189_s9, %s6346_s20  ;;  %s1102_s18 = scalar_lea.vmem [#allocation6], %s6140_s2 }
  0x92   : > { %s1110_s1 = sshll.u32 %s1102_s18, 4  ;;  %p8743_p1 = pnand %p7389_p4, %p8694_p12  ;;  %s8739_s1 = int_to_ptr.vmem [resolvable:$true] %s1110_s1 }
  0x93   : > { %s7710_s3 = scalar_lea.hbm %s8737_s26, 4096  ;;  %p11031_p9 = pneg %p8727_p6 }
  0x94   : > { %s11218_s4 = scalar_select %p8743_p1, 1, 0 }
  0x95   : > { %p7711_p3 = scmp.ne.s32.totalorder %s8737_s26, %s7710_s3  ;;  %s7715_s20 = scalar_lea.hbm %s11189_s9, 8192 }
  0x96   : > { %p7716_p5 = scmp.lt.s32.totalorder %s8737_s26, %s11189_s9  ;;  %p7717_p10 = scmp.lt.s32.totalorder %s7715_s20, %s7710_s3 }
  0x97   : > { %p7713_p11 = pnand %p11031_p9, %p7711_p3 }
  0x98   : > { %p7718_p2 = por %p7717_p10, %p7716_p5 }
  0x99   : > { %p7714_p0 = pneg %p7713_p11 }
  0x9b   : > { %p7719_p8 = pnand %p7718_p2, %p7714_p0 }
  0x9d   : > { %7722 = shalt.err (!%p7719_p8)
}
  0x9e   : > { %s7723_s24 = scalar_lea.vmem %s8739_s1, 4096  ;;  %s8373_s2 = smov [#allocation6]  }
  0x9f   : > { %p7724_p4 = scmp.ne.s32.totalorder %s8739_s1, %s7723_s24  ;;  %s7728_s18 = sshll.u32 %s8373_s2, 4  ;;  %s7729_s18 = int_to_ptr.vmem [resolvable:$false] %s7728_s18 }
  0xa0   : > { %s7730_s17 = scalar_lea.vmem %s7729_s18, 8192  ;;  %p7731_p3 = scmp.lt.s32.totalorder %s8739_s1, %s7729_s18 }
  0xa1   : > { %p7726_p12 = pnand %p7724_p4, %p11031_p9  ;;  %p7732_p11 = scmp.lt.s32.totalorder %s7730_s17, %s7723_s24 }
  0xa3   : > { %p7727_p13 = pneg %p7726_p12  ;;  %p7733_p7 = por %p7732_p11, %p7731_p3 }
  0xa5   : > { %p7734_p5 = pnand %p7733_p7, %p7727_p13 }
  0xa7   : > { %7737 = shalt.err (!%p7734_p5)
}
  0xa8   : > { %s11026_s3 = smov 128   ;;  %s11028_s20 = smov 8  }
  0xa9   : > { %s11219_s17 = scalar_lea.sflag [#allocation7], %s8732_s14  ;;  %p6174_p7 = scmp.ge.s32.totalorder %s8336_s15, 1 }
  0xaa   : > { %7339 = dma.hbm_to_vmem [thread:$0]  (!%p8727_p6), %s8737_s26, 4096, %s8739_s1, %s11219_s17, %s11026_s3, %s11026_s3, %s11028_s20  }
  0xab   : > { %p1425_p13 = scmp.lt.s32.totalorder %s8336_s15, 5  ;;  %s8776_s24 = sand.u32 1, %s8304_s23  }
  0xac   : > { %s8779_s2 = sshll.u32 %s8776_s24, 6  ;;  %s8782_s18 = sshll.u32 %s8328_s10, 10 }
  0xad   : > { %p8784_p8 = pnand %p6174_p7, %p1425_p13  ;;  %s8790_s22 = scalar_lea.hbm %s11188_s21, %s8782_s18 }
  0xae   : > { %s1151_s26 = scalar_lea.vmem [#allocation9], %s8779_s2  ;;  %s7738_s3 = scalar_lea.hbm %s8790_s22, 1024 }
  0xaf   : > { %s11220_s9 = scalar_select %p8784_p8, 1, 0 }
  0xb0   : > { %s1158_s1 = sshll.u32 %s1151_s26, 4  ;;  %p7739_p2 = scmp.ne.s32.totalorder %s8790_s22, %s7738_s3  ;;  %s8793_s1 = int_to_ptr.vmem [resolvable:$true] %s1158_s1 }
  0xb1   : > { %p8800_p0 = pneg %p8743_p1  ;;  %s7743_s23 = scalar_lea.hbm %s11188_s21, 2048 }
  0xb2   : > { %p7744_p12 = scmp.lt.s32.totalorder %s8790_s22, %s11188_s21  ;;  %p7745_p3 = scmp.lt.s32.totalorder %s7743_s23, %s7738_s3 }
  0xb3   : > { %p7741_p10 = pnand %p8800_p0, %p7739_p2 }
  0xb4   : > { %p7746_p11 = por %p7745_p3, %p7744_p12 }
  0xb5   : > { %p7742_p4 = pneg %p7741_p10 }
  0xb7   : > { %p7747_p5 = pnand %p7746_p11, %p7742_p4 }
  0xb9   : > { %7750 = shalt.err (!%p7747_p5)
}
  0xba   : > { %s7751_s26 = scalar_lea.vmem %s8793_s1, 1024  ;;  %s8376_s17 = smov [#allocation9]  }
  0xbb   : > { %p7752_p7 = scmp.ne.s32.totalorder %s8793_s1, %s7751_s26  ;;  %s7756_s15 = sshll.u32 %s8376_s17, 4  ;;  %s7757_s15 = int_to_ptr.vmem [resolvable:$false] %s7756_s15 }
  0xbc   : > { %s7758_s16 = scalar_lea.vmem %s7757_s15, 2048  ;;  %p7759_p2 = scmp.lt.s32.totalorder %s8793_s1, %s7757_s15 }
  0xbd   : > { %p7754_p13 = pnand %p7752_p7, %p8800_p0  ;;  %p7760_p10 = scmp.lt.s32.totalorder %s7758_s16, %s7751_s26 }
  0xbf   : > { %p7755_p9 = pneg %p7754_p13  ;;  %p7761_p8 = por %p7760_p10, %p7759_p2 }
  0xc1   : > { %p7762_p6 = pnand %p7761_p8, %p7755_p9 }
  0xc3   : > { %7765 = shalt.err (!%p7762_p6)
}
  0xc4   : > { %s8377_s23 = smov 64   ;;  %s8378_s3 = smov 4  }
  0xc5   : > { %s11222_s15 = scalar_lea.sflag [#allocation10], %s8732_s14  ;;  %s8825_s16 = scalar_lea.hbm %s11187_s8, %s8782_s18 }
  0xc6   : > { %7345 = dma.hbm_to_vmem [thread:$0]  (!%p8743_p1), %s8790_s22, 1024, %s8793_s1, %s11222_s15, %s8377_s23, %s8377_s23, %s8378_s3  }
  0xc7   : > { %s1205_s17 = scalar_lea.vmem [#allocation12], %s8779_s2  ;;  %s11041_s21 = scalar_lea.sflag [#allocation13], %s8732_s14 }
  0xc8   : > { %s1212_s26 = sshll.u32 %s1205_s17, 4  ;;  %s7766_s25 = scalar_lea.hbm %s8825_s16, 1024  ;;  %s8828_s26 = int_to_ptr.vmem [resolvable:$true] %s1212_s26 }
  0xc9   : > { %p7767_p6 = scmp.ne.s32.totalorder %s8825_s16, %s7766_s25  ;;  %s7771_s28 = scalar_lea.hbm %s11187_s8, 2048 }
  0xca   : > { %p7772_p4 = scmp.lt.s32.totalorder %s8825_s16, %s11187_s8  ;;  %p7773_p12 = scmp.lt.s32.totalorder %s7771_s28, %s7766_s25 }
  0xcb   : > { %p7769_p9 = pnand %p7767_p6, %p8800_p0 }
  0xcc   : > { %p7774_p3 = por %p7773_p12, %p7772_p4 }
  0xcd   : > { %p7770_p8 = pneg %p7769_p9 }
  0xcf   : > { %p7775_p11 = pnand %p7774_p3, %p7770_p8 }
  0xd1   : > { %7778 = shalt.err (!%p7775_p11)
}
  0xd2   : > { %s7779_s22 = scalar_lea.vmem %s8828_s26, 1024  ;;  %s8379_s1 = smov [#allocation12]  }
  0xd3   : > { %p7780_p5 = scmp.ne.s32.totalorder %s8828_s26, %s7779_s22  ;;  %s7784_s15 = sshll.u32 %s8379_s1, 4  ;;  %s7785_s15 = int_to_ptr.vmem [resolvable:$false] %s7784_s15 }
  0xd4   : > { %s7786_s17 = scalar_lea.vmem %s7785_s15, 2048  ;;  %p7787_p2 = scmp.lt.s32.totalorder %s8828_s26, %s7785_s15 }
  0xd5   : > { %p7782_p7 = pnand %p7780_p5, %p8800_p0  ;;  %p7788_p10 = scmp.lt.s32.totalorder %s7786_s17, %s7779_s22 }
  0xd7   : > { %p7783_p13 = pneg %p7782_p7  ;;  %p7789_p6 = por %p7788_p10, %p7787_p2 }
  0xd9   : > { %p7790_p9 = pnand %p7789_p6, %p7783_p13 }
  0xdb   : > { %7793 = shalt.err (!%p7790_p9)
}
  0xdc   : > { %7351 = dma.hbm_to_vmem [thread:$0]  (!%p8743_p1), %s8825_s16, 1024, %s8828_s26, %s11041_s21, %s8377_s23, %s8377_s23, %s8378_s3  }
  0xdd   : > { %s8854_s25 = scalar_lea.hbm %s11179_s30, %s8782_s18  ;;  %s1259_s28 = scalar_lea.vmem [#allocation15], %s8779_s2 }
  0xde   : > { %s1266_s22 = sshll.u32 %s1259_s28, 4  ;;  %s11042_s1 = scalar_lea.sflag [#allocation16], %s8732_s14  ;;  %s8857_s22 = int_to_ptr.vmem [resolvable:$true] %s1266_s22 }
  0xdf   : > { %s7794_s15 = scalar_lea.hbm %s8854_s25, 1024  ;;  %s7799_s17 = scalar_lea.hbm %s11179_s30, 2048 }
  0xe0   : > { %p7795_p8 = scmp.ne.s32.totalorder %s8854_s25, %s7794_s15  ;;  %p7800_p3 = scmp.lt.s32.totalorder %s8854_s25, %s11179_s30 }
  0xe1   : > { %p7801_p11 = scmp.lt.s32.totalorder %s7799_s17, %s7794_s15 }
  0xe2   : > { %p7797_p4 = pnand %p7795_p8, %p8800_p0 }
  0xe3   : > { %p7802_p5 = por %p7801_p11, %p7800_p3 }
  0xe4   : > { %p7798_p12 = pneg %p7797_p4 }
  0xe6   : > { %p7803_p7 = pnand %p7802_p5, %p7798_p12 }
  0xe8   : > { %7806 = shalt.err (!%p7803_p7)
}
  0xe9   : > { %s7807_s16 = scalar_lea.vmem %s8857_s22, 1024  ;;  %s8380_s26 = smov [#allocation15]  }
  0xea   : > { %p7808_p13 = scmp.ne.s32.totalorder %s8857_s22, %s7807_s16  ;;  %s7812_s28 = sshll.u32 %s8380_s26, 4  ;;  %s7813_s28 = int_to_ptr.vmem [resolvable:$false] %s7812_s28 }
  0xeb   : > { %s7814_s21 = scalar_lea.vmem %s7813_s28, 2048  ;;  %p7815_p6 = scmp.lt.s32.totalorder %s8857_s22, %s7813_s28 }
  0xec   : > { %p7810_p2 = pnand %p7808_p13, %p8800_p0  ;;  %p7816_p9 = scmp.lt.s32.totalorder %s7814_s21, %s7807_s16 }
  0xee   : > { %p7811_p10 = pneg %p7810_p2  ;;  %p7817_p8 = por %p7816_p9, %p7815_p6 }
  0xf0   : > { %p7818_p4 = pnand %p7817_p8, %p7811_p10 }
  0xf2   : > { %7821 = shalt.err (!%p7818_p4)
}
  0xf3   : > { %7357 = dma.hbm_to_vmem [thread:$0]  (!%p8743_p1), %s8854_s25, 1024, %s8857_s22, %s11042_s1, %s8377_s23, %s8377_s23, %s8378_s3  }
  0xf4   : > { %s8883_s21 = scalar_lea.hbm %s11186_s27, %s8782_s18  ;;  %s1313_s15 = scalar_lea.vmem [#allocation18], %s8779_s2 }
  0xf5   : > { %s1320_s17 = sshll.u32 %s1313_s15, 4  ;;  %s1310_s16 = scalar_lea.sflag [#allocation19], %s8732_s14  ;;  %s8886_s17 = int_to_ptr.vmem [resolvable:$true] %s1320_s17 }
  0xf6   : > { %s7822_s26 = scalar_lea.hbm %s8883_s21, 1024  ;;  %s7827_s28 = scalar_lea.hbm %s11186_s27, 2048 }
  0xf7   : > { %p7823_p12 = scmp.ne.s32.totalorder %s8883_s21, %s7822_s26  ;;  %p7828_p5 = scmp.lt.s32.totalorder %s8883_s21, %s11186_s27 }
  0xf8   : > { %p7829_p7 = scmp.lt.s32.totalorder %s7827_s28, %s7822_s26 }
  0xf9   : > { %p7825_p3 = pnand %p7823_p12, %p8800_p0 }
  0xfa   : > { %p7830_p13 = por %p7829_p7, %p7828_p5 }
  0xfb   : > { %p7826_p11 = pneg %p7825_p3 }
  0xfd   : > { %p7831_p2 = pnand %p7830_p13, %p7826_p11 }
  0xff   : > { %7834 = shalt.err (!%p7831_p2)
}
 0x100   : > { %s7835_s25 = scalar_lea.vmem %s8886_s17, 1024  ;;  %s8381_s22 = smov [#allocation18]  }
 0x101   : > { %p7836_p10 = scmp.ne.s32.totalorder %s8886_s17, %s7835_s25  ;;  %s7840_s15 = sshll.u32 %s8381_s22, 4  ;;  %s7841_s15 = int_to_ptr.vmem [resolvable:$false] %s7840_s15 }
 0x102   : > { %s7842_s1 = scalar_lea.vmem %s7841_s15, 2048  ;;  %p7843_p8 = scmp.lt.s32.totalorder %s8886_s17, %s7841_s15 }
 0x103   : > { %p7838_p6 = pnand %p7836_p10, %p8800_p0  ;;  %p7844_p4 = scmp.lt.s32.totalorder %s7842_s1, %s7835_s25 }
 0x105   : > { %p7839_p9 = pneg %p7838_p6  ;;  %p7845_p12 = por %p7844_p4, %p7843_p8 }
 0x107   : > { %p7846_p3 = pnand %p7845_p12, %p7839_p9 }
 0x109   : > { %7849 = shalt.err (!%p7846_p3)
}
 0x10a   : > { %7363 = dma.hbm_to_vmem [thread:$0]  (!%p8743_p1), %s8883_s21, 1024, %s8886_s17, %s1310_s16, %s8377_s23, %s8377_s23, %s8378_s3  }
 0x10b   : > { %s6137_s1 = sshll.u32 %s8723_s0, 4  ;;  %s6344_s26 = sshll.u32 %s8332_s11, 8 }
 0x10c   : > { %s8913_s28 = scalar_lea.hbm %s11185_s5, %s6344_s26  ;;  %s1081_s25 = scalar_lea.vmem [#allocation3], %s6137_s1 }
 0x10d   : > { %s1088_s22 = sshll.u32 %s1081_s25, 4  ;;  %s8919_s15 = scalar_lea.hbm %s11182_s13, %s8782_s18  ;;  %s8915_s22 = int_to_ptr.vmem [resolvable:$true] %s1088_s22 }
 0x10e   : > { %s1078_s8 = scalar_lea.sflag [#allocation4], %s8723_s0  ;;  %s7850_s27 = scalar_lea.hbm %s8913_s28, 256 }
 0x10f   : > { %p7851_p11 = scmp.ne.s32.totalorder %s8913_s28, %s7850_s27  ;;  %p11223_p5 = scmp.ne.s32.totalorder %s11217_s7, 0 }
 0x110   : > { %s7855_s21 = scalar_lea.hbm %s11185_s5, 512  ;;  %p7856_p10 = scmp.lt.s32.totalorder %s8913_s28, %s11185_s5 }
 0x111   : > { %p11224_p7 = pneg %p11223_p5  ;;  %p7857_p6 = scmp.lt.s32.totalorder %s7855_s21, %s7850_s27 }
 0x113   : > { %p7853_p13 = pnand %p7851_p11, %p11224_p7  ;;  %p7858_p9 = por %p7857_p6, %p7856_p10 }
 0x115   : > { %p7854_p2 = pneg %p7853_p13 }
 0x117   : > { %p7859_p8 = pnand %p7858_p9, %p7854_p2 }
 0x119   : > { %7862 = shalt.err (!%p7859_p8)
}
 0x11a   : > { %s7863_s17 = scalar_lea.vmem %s8915_s22, 256  ;;  %p11225_p12 = pmov %p11224_p7 }
 0x11b   : > { %p7864_p4 = scmp.ne.s32.totalorder %s8915_s22, %s7863_s17  ;;  %s8382_s0 = smov [#allocation3]  }
 0x11c   : > { %s7868_s1 = sshll.u32 %s8382_s0, 4  ;;  %s7869_s1 = int_to_ptr.vmem [resolvable:$false] %s7868_s1 }
 0x11d   : > { %p7866_p3 = pnand %p7864_p4, %p11225_p12  ;;  %s7870_s26 = scalar_lea.vmem %s7869_s1, 512 }
 0x11e   : > { %p7871_p11 = scmp.lt.s32.totalorder %s8915_s22, %s7869_s1  ;;  %p7872_p7 = scmp.lt.s32.totalorder %s7870_s26, %s7863_s17 }
 0x11f   : > { %p7867_p1 = pneg %p7866_p3 }
 0x120   : > { %p7873_p13 = por %p7872_p7, %p7871_p11 }
 0x122   : > { %p7874_p10 = pnand %p7873_p13, %p7867_p1 }
 0x124   : > { %7877 = shalt.err (!%p7874_p10)
}
 0x125   : > { %s11226_s27 = smov 8   ;;  %s11227_s25 = smov 128  }
 0x126   : > { %7336 = dma.hbm_to_vmem [thread:$0]  (!%p11223_p5), %s8913_s28, 256, %s8915_s22, %s1078_s8, %s11227_s25, %s11227_s25, %s11226_s27  }
 0x127   : > { %s1124_s21 = scalar_lea.vmem [#allocation8], %s8779_s2  ;;  %s8948_s7 = scalar_lea.hbm %s11180_s29, %s8782_s18 }
 0x128   : > { %s1131_s17 = sshll.u32 %s1124_s21, 4  ;;  %s7878_s0 = scalar_lea.hbm %s8919_s15, 1024  ;;  %s8944_s17 = int_to_ptr.vmem [resolvable:$true] %s1131_s17 }
 0x129   : > { %p7879_p1 = scmp.ne.s32.totalorder %s8919_s15, %s7878_s0  ;;  %s7883_s1 = scalar_lea.hbm %s11182_s13, 2048 }
 0x12a   : > { %p7884_p9 = scmp.lt.s32.totalorder %s8919_s15, %s11182_s13  ;;  %p7885_p8 = scmp.lt.s32.totalorder %s7883_s1, %s7878_s0 }
 0x12b   : > { %p7881_p2 = pnand %p7879_p1, %p8800_p0 }
 0x12c   : > { %p7886_p4 = por %p7885_p8, %p7884_p9 }
 0x12d   : > { %p7882_p6 = pneg %p7881_p2 }
 0x12f   : > { %p7887_p12 = pnand %p7886_p4, %p7882_p6 }
 0x131   : > { %7890 = shalt.err (!%p7887_p12)
}
 0x132   : > { %s7891_s8 = scalar_lea.vmem %s8944_s17, 1024  ;;  %s8383_s28 = smov [#allocation8]  }
 0x133   : > { %p7892_p5 = scmp.ne.s32.totalorder %s8944_s17, %s7891_s8  ;;  %s7896_s22 = sshll.u32 %s8383_s28, 4  ;;  %s7897_s22 = int_to_ptr.vmem [resolvable:$false] %s7896_s22 }
 0x134   : > { %s7898_s26 = scalar_lea.vmem %s7897_s22, 2048  ;;  %p7899_p7 = scmp.lt.s32.totalorder %s8944_s17, %s7897_s22 }
 0x135   : > { %p7894_p3 = pnand %p7892_p5, %p8800_p0  ;;  %p7900_p13 = scmp.lt.s32.totalorder %s7898_s26, %s7891_s8 }
 0x137   : > { %p7895_p11 = pneg %p7894_p3  ;;  %p7901_p10 = por %p7900_p13, %p7899_p7 }
 0x139   : > { %p7902_p1 = pnand %p7901_p10, %p7895_p11 }
 0x13b   : > { %7905 = shalt.err (!%p7902_p1)
}
 0x13c   : > { %p11228_p2 = scmp.ne.s32.totalorder %s11218_s4, 0  ;;  %s11229_s21 = scalar_lea.sflag [#allocation7], %s8732_s14 }
 0x13d   : > { %s1178_s0 = scalar_lea.vmem [#allocation11], %s8779_s2  ;;  %s8976_s8 = scalar_lea.hbm %s11181_s19, %s8782_s18 }
 0x13e   : > { %7342 = dma.hbm_to_vmem [thread:$0]  (!%p11228_p2), %s8919_s15, 1024, %s8944_s17, %s11229_s21, %s8377_s23, %s8377_s23, %s8378_s3  }
 0x13f   : > { %s1185_s1 = sshll.u32 %s1178_s0, 4  ;;  %s7906_s28 = scalar_lea.hbm %s8948_s7, 1024  ;;  %s8972_s1 = int_to_ptr.vmem [resolvable:$true] %s1185_s1 }
 0x140   : > { %p7907_p6 = scmp.ne.s32.totalorder %s8948_s7, %s7906_s28  ;;  %s7911_s22 = scalar_lea.hbm %s11180_s29, 2048 }
 0x141   : > { %p7912_p4 = scmp.lt.s32.totalorder %s8948_s7, %s11180_s29  ;;  %p7913_p12 = scmp.lt.s32.totalorder %s7911_s22, %s7906_s28 }
 0x142   : > { %p7909_p9 = pnand %p7907_p6, %p8800_p0 }
 0x143   : > { %p7914_p5 = por %p7913_p12, %p7912_p4 }
 0x144   : > { %p7910_p8 = pneg %p7909_p9 }
 0x146   : > { %p7915_p3 = pnand %p7914_p5, %p7910_p8 }
 0x148   : > { %7918 = shalt.err (!%p7915_p3)
}
 0x149   : > { %s7919_s15 = scalar_lea.vmem %s8972_s1, 1024  ;;  %s8384_s17 = smov [#allocation11]  }
 0x14a   : > { %p7920_p11 = scmp.ne.s32.totalorder %s8972_s1, %s7919_s15  ;;  %s7924_s26 = sshll.u32 %s8384_s17, 4  ;;  %s7925_s26 = int_to_ptr.vmem [resolvable:$false] %s7924_s26 }
 0x14b   : > { %s7926_s21 = scalar_lea.vmem %s7925_s26, 2048  ;;  %p7927_p10 = scmp.lt.s32.totalorder %s8972_s1, %s7925_s26 }
 0x14c   : > { %p7922_p7 = pnand %p7920_p11, %p8800_p0  ;;  %p7928_p1 = scmp.lt.s32.totalorder %s7926_s21, %s7919_s15 }
 0x14e   : > { %p7923_p13 = pneg %p7922_p7  ;;  %p7929_p6 = por %p7928_p1, %p7927_p10 }
 0x150   : > { %p7930_p9 = pnand %p7929_p6, %p7923_p13 }
 0x152   : > { %7933 = shalt.err (!%p7930_p9)
}
 0x153   : > { %s11230_s0 = scalar_lea.sflag [#allocation10], %s8732_s14  ;;  %s1232_s28 = scalar_lea.vmem [#allocation14], %s8779_s2 }
 0x154   : > { %7348 = dma.hbm_to_vmem [thread:$0]  (!%p11228_p2), %s8948_s7, 1024, %s8972_s1, %s11230_s0, %s8377_s23, %s8377_s23, %s8378_s3  }
 0x155   : > { %s1239_s22 = sshll.u32 %s1232_s28, 4  ;;  %s9004_s15 = scalar_lea.hbm %s11183_s12, %s8782_s18  ;;  %s9000_s22 = int_to_ptr.vmem [resolvable:$true] %s1239_s22 }
 0x156   : > { %s7934_s17 = scalar_lea.hbm %s8976_s8, 1024  ;;  %s7939_s26 = scalar_lea.hbm %s11181_s19, 2048 }
 0x157   : > { %p7935_p8 = scmp.ne.s32.totalorder %s8976_s8, %s7934_s17  ;;  %p7940_p5 = scmp.lt.s32.totalorder %s8976_s8, %s11181_s19 }
 0x158   : > { %p7941_p3 = scmp.lt.s32.totalorder %s7939_s26, %s7934_s17 }
 0x159   : > { %p7937_p4 = pnand %p7935_p8, %p8800_p0 }
 0x15a   : > { %p7942_p11 = por %p7941_p3, %p7940_p5 }
 0x15b   : > { %p7938_p12 = pneg %p7937_p4 }
 0x15d   : > { %p7943_p7 = pnand %p7942_p11, %p7938_p12 }
 0x15f   : > { %7946 = shalt.err (!%p7943_p7)
}
 0x160   : > { %s7947_s7 = scalar_lea.vmem %s9000_s22, 1024  ;;  %s8385_s18 = smov [#allocation14]  }
 0x161   : > { %p7948_p13 = scmp.ne.s32.totalorder %s9000_s22, %s7947_s7  ;;  %s7952_s1 = sshll.u32 %s8385_s18, 4  ;;  %s7953_s1 = int_to_ptr.vmem [resolvable:$false] %s7952_s1 }
 0x162   : > { %s7954_s21 = scalar_lea.vmem %s7953_s1, 2048  ;;  %p7955_p6 = scmp.lt.s32.totalorder %s9000_s22, %s7953_s1 }
 0x163   : > { %p7950_p10 = pnand %p7948_p13, %p8800_p0  ;;  %p7956_p9 = scmp.lt.s32.totalorder %s7954_s21, %s7947_s7 }
 0x165   : > { %p7951_p1 = pneg %p7950_p10  ;;  %p7957_p8 = por %p7956_p9, %p7955_p6 }
 0x167   : > { %p7958_p4 = pnand %p7957_p8, %p7951_p1 }
 0x169   : > { %7961 = shalt.err (!%p7958_p4)
}
 0x16a   : > { %s11231_s0 = scalar_lea.sflag [#allocation13], %s8732_s14  ;;  %s1286_s28 = scalar_lea.vmem [#allocation17], %s8779_s2 }
 0x16b   : > { %7354 = dma.hbm_to_vmem [thread:$0]  (!%p11228_p2), %s8976_s8, 1024, %s9000_s22, %s11231_s0, %s8377_s23, %s8377_s23, %s8378_s3  }
 0x16c   : > { %s1293_s17 = sshll.u32 %s1286_s28, 4  ;;  %s6168_s26 = sshll.u32 %s8776_s24, 7  ;;  %s1294_s17 = int_to_ptr.vmem [resolvable:$true] %s1293_s17 }
 0x16d   : > { %s7962_s7 = scalar_lea.hbm %s9004_s15, 1024  ;;  %s7967_s18 = scalar_lea.hbm %s11183_s12, 2048 }
 0x16e   : > { %p7963_p12 = scmp.ne.s32.totalorder %s9004_s15, %s7962_s7  ;;  %p7968_p11 = scmp.lt.s32.totalorder %s9004_s15, %s11183_s12 }
 0x16f   : > { %p7969_p7 = scmp.lt.s32.totalorder %s7967_s18, %s7962_s7 }
 0x170   : > { %p7965_p5 = pnand %p7963_p12, %p8800_p0 }
 0x171   : > { %p7970_p13 = por %p7969_p7, %p7968_p11 }
 0x172   : > { %p7966_p3 = pneg %p7965_p5 }
 0x174   : > { %p7971_p10 = pnand %p7970_p13, %p7966_p3 }
 0x176   : > { %7974 = shalt.err (!%p7971_p10)
}
 0x177   : > { %s7975_s1 = scalar_lea.vmem %s1294_s17, 1024  ;;  %s8386_s2 = smov [#allocation17]  }
 0x178   : > { %p7976_p1 = scmp.ne.s32.totalorder %s1294_s17, %s7975_s1  ;;  %s7980_s8 = sshll.u32 %s8386_s2, 4  ;;  %s7981_s8 = int_to_ptr.vmem [resolvable:$false] %s7980_s8 }
 0x179   : > { %s7982_s22 = scalar_lea.vmem %s7981_s8, 2048  ;;  %p7983_p8 = scmp.lt.s32.totalorder %s1294_s17, %s7981_s8 }
 0x17a   : > { %p7978_p6 = pnand %p7976_p1, %p8800_p0  ;;  %p7984_p4 = scmp.lt.s32.totalorder %s7982_s22, %s7975_s1 }
 0x17c   : > { %p7979_p9 = pneg %p7978_p6  ;;  %p7985_p12 = por %p7984_p4, %p7983_p8 }
 0x17e   : > { %p7986_p5 = pnand %p7985_p12, %p7979_p9 }
 0x180   : > { %7989 = shalt.err (!%p7986_p5)
}
 0x181   : > { %s11232_s21 = scalar_lea.sflag [#allocation16], %s8732_s14  ;;  %s6355_s0 = sshll.u32 %s8328_s10, 11 }
 0x182   : > { %7360 = dma.hbm_to_vmem [thread:$0]  (!%p11228_p2), %s9004_s15, 1024, %s1294_s17, %s11232_s21, %s8377_s23, %s8377_s23, %s8378_s3  }
 0x183   : > { %s1340_s28 = scalar_lea.vmem [#allocation20], %s6168_s26  ;;  %s9052_s18 = scalar_lea.hbm %s11184_s6, %s6355_s0 }
 0x184   : > { %s1347_s7 = sshll.u32 %s1340_s28, 4  ;;  %s7990_s1 = scalar_lea.hbm %s9052_s18, 2048  ;;  %s1348_s7 = int_to_ptr.vmem [resolvable:$true] %s1347_s7 }
 0x185   : > { %p7991_p3 = scmp.ne.s32.totalorder %s9052_s18, %s7990_s1  ;;  %s7995_s2 = scalar_lea.hbm %s11184_s6, 4096 }
 0x186   : > { %p7996_p13 = scmp.lt.s32.totalorder %s9052_s18, %s11184_s6  ;;  %p7997_p10 = scmp.lt.s32.totalorder %s7995_s2, %s7990_s1 }
 0x187   : > { %p7993_p11 = pnand %p7991_p3, %p8800_p0 }
 0x188   : > { %p7998_p1 = por %p7997_p10, %p7996_p13 }
 0x189   : > { %p7994_p7 = pneg %p7993_p11 }
 0x18b   : > { %p7999_p6 = pnand %p7998_p1, %p7994_p7 }
 0x18d   : > { %8002 = shalt.err (!%p7999_p6)
}
 0x18e   : > { %s8003_s15 = scalar_lea.vmem %s1348_s7, 2048  ;;  %s8387_s17 = smov [#allocation20]  }
 0x18f   : > { %p8004_p9 = scmp.ne.s32.totalorder %s1348_s7, %s8003_s15  ;;  %s8008_s8 = sshll.u32 %s8387_s17, 4  ;;  %s8009_s8 = int_to_ptr.vmem [resolvable:$false] %s8008_s8 }
 0x190   : > { %s8010_s22 = scalar_lea.vmem %s8009_s8, 4096  ;;  %p8011_p12 = scmp.lt.s32.totalorder %s1348_s7, %s8009_s8 }
 0x191   : > { %p8006_p8 = pnand %p8004_p9, %p8800_p0  ;;  %p8012_p5 = scmp.lt.s32.totalorder %s8010_s22, %s8003_s15 }
 0x193   : > { %p8007_p4 = pneg %p8006_p8  ;;  %p8013_p3 = por %p8012_p5, %p8011_p12 }
 0x195   : > { %p8014_p11 = pnand %p8013_p3, %p8007_p4 }
 0x197   : > { %8017 = shalt.err (!%p8014_p11)
}
 0x198   : > { %s11233_s21 = sld [smem:[#allocation64_spill]]  ;;  %s1368_s1 = scalar_lea.vmem [#allocation21], %s6168_s26 }
 0x199   : > { %7366 = dma.hbm_to_vmem [thread:$0]  (!%p11228_p2), %s9052_s18, 2048, %s1348_s7, %s1310_s16, %s11227_s25, %s11227_s25, %s11226_s27  }
 0x19a   : > { %s1375_s2 = sshll.u32 %s1368_s1, 4  ;;  %s1365_s14 = scalar_lea.sflag [#allocation22], %s8776_s24  ;;  %s9078_s2 = int_to_ptr.vmem [resolvable:$true] %s1375_s2 }
 0x19e   : > { %s9074_s28 = scalar_lea.hbm %s11233_s21, %s6355_s0  ;;  %s8023_s17 = scalar_lea.hbm %s11233_s21, 4096 }
 0x19f   : > { %s8018_s15 = scalar_lea.hbm %s9074_s28, 2048  ;;  %p8024_p1 = scmp.lt.s32.totalorder %s9074_s28, %s11233_s21 }
 0x1a0   : > { %p8019_p7 = scmp.ne.s32.totalorder %s9074_s28, %s8018_s15  ;;  %p8025_p6 = scmp.lt.s32.totalorder %s8023_s17, %s8018_s15 }
 0x1a2   : > { %p8021_p13 = pnand %p8019_p7, %p8800_p0  ;;  %p8026_p9 = por %p8025_p6, %p8024_p1 }
 0x1a4   : > { %p8022_p10 = pneg %p8021_p13 }
 0x1a6   : > { %p8027_p8 = pnand %p8026_p9, %p8022_p10 }
 0x1a8   : > { %8030 = shalt.err (!%p8027_p8)
}
 0x1a9   : > { %s8031_s16 = scalar_lea.vmem %s9078_s2, 2048  ;;  %s8388_s24 = smov [#allocation21]  }
 0x1aa   : > { %p8032_p4 = scmp.ne.s32.totalorder %s9078_s2, %s8031_s16  ;;  %s8036_s27 = sshll.u32 %s8388_s24, 4  ;;  %s8037_s27 = int_to_ptr.vmem [resolvable:$false] %s8036_s27 }
 0x1ab   : > { %s8038_s25 = scalar_lea.vmem %s8037_s27, 4096  ;;  %p8039_p3 = scmp.lt.s32.totalorder %s9078_s2, %s8037_s27 }
 0x1ac   : > { %p8034_p12 = pnand %p8032_p4, %p8800_p0  ;;  %p8040_p11 = scmp.lt.s32.totalorder %s8038_s25, %s8031_s16 }
 0x1ae   : > { %p8035_p5 = pneg %p8034_p12  ;;  %p8041_p7 = por %p8040_p11, %p8039_p3 }
 0x1b0   : > { %p8042_p13 = pnand %p8041_p7, %p8035_p5 }
 0x1b2   : > { %8045 = shalt.err (!%p8042_p13)
}
 0x1b3   : > { %7369 = dma.hbm_to_vmem [thread:$0]  (!%p11228_p2), %s9074_s28, 2048, %s9078_s2, %s1365_s14, %s8377_s23, %s8377_s23, %s8378_s3  }
 0x1b4   : > { %p11234_p0 = scmp.ne.s32.totalorder %s11220_s9, 0 }
 0x1b6   : > { %1429 = sbr.rel (%p11234_p0) target bundleno = 6934 (0x1b16), region = 140 }
 0x1bb   : > { %s11235_s20 = sld [smem:[#allocation83_spill]] }
 0x1bc   : > { %s11236_s26 = sld [smem:[#allocation93_spill]] }
 0x1c1   : > { %s9103_s0 = sand.u32 1, %s11235_s20  }
 0x1c2   : > { %11237 = sst [smem:[#allocation99_spill]] %s9103_s0  ;;  %s9106_s7 = sshll.u32 %s9103_s0, 4 }
 0x1c3   : > { %s1432_s18 = scalar_lea.sflag [#allocation4], %s9103_s0  ;;  %p11238_p10 = scmp.ne.s32.totalorder %s11236_s26, 0 }
 0x1c5   : > { %8247 = dma.done.wait (%p11238_p10), %s1432_s18, 256  }
 0x1c6   : > { %8249 = vsyncadd (%p11238_p10), %s1432_s18, 4294967040  ;;  %s11239_s23 = sld [smem:[#allocation90_spill]]  ;;  %s9118_s3 = sshll.u32 %s9103_s0, 8 }
 0x1c7   : > { %s9122_s22 = scalar_lea.vmem [#allocation6], %s9118_s3 }
 0x1c8   : > { %11241 = sst [smem:[#allocation101_spill]] %s9122_s22 }
 0x1cc   : > { %s9115_s9 = sand.u32 1, %s11239_s23  }
 0x1cd   : > { %11240 = sst [smem:[#allocation100_spill]] %s9115_s9  ;;  %s1441_s8 = scalar_lea.sflag [#allocation7], %s9115_s9 }
 0x1ce   : > { %8251 = dma.done.wait (%p11238_p10), %s1441_s8, 4096  }
 0x1cf   : > { %8253 = vsyncadd (%p11238_p10), %s1441_s8, 4294963200  ;;  %s11242_s28 = sld [smem:[#allocation80_spill]] }
 0x1d0   : > { %s11243_s1 = sld [smem:[#allocation96_spill]] }
 0x1d5   : > { %s9129_s2 = sand.u32 1, %s11242_s28  }
 0x1d6   : > { %s6177_s14 = sshll.u32 %s9129_s2, 6  ;;  %p11245_p2 = scmp.ne.s32.totalorder %s11243_s1, 0 }
 0x1d7   : > { %s9132_s15 = scalar_lea.vmem [#allocation8], %s6177_s14 }
 0x1d8   : > { %11244 = sst [smem:[#allocation102_spill]] %s9132_s15 }
 0x1d9   : > { %8255 = dma.done.wait (%p11245_p2), %s1441_s8, 1024  }
 0x1da   : > { %8257 = vsyncadd (%p11245_p2), %s1441_s8, 4294966272  ;;  %s1459_s17 = scalar_lea.sflag [#allocation10], %s9115_s9  ;;  %s9139_s16 = scalar_lea.vmem [#allocation9], %s6177_s14 }
 0x1db   : > { %11246 = sst [smem:[#allocation103_spill]] %s9139_s16 }
 0x1dc   : > { %8259 = dma.done.wait (%p11245_p2), %s1459_s17, 2048  }
 0x1dd   : > { %8261 = vsyncadd (%p11245_p2), %s1459_s17, 4294965248  ;;  %s9145_s24 = scalar_lea.vmem [#allocation11], %s6177_s14  ;;  %s1477_s27 = scalar_lea.sflag [#allocation13], %s9115_s9 }
 0x1de   : > { %11247 = sst [smem:[#allocation104_spill]] %s9145_s24  ;;  %s9148_s25 = scalar_lea.vmem [#allocation12], %s6177_s14 }
 0x1df   : > { %11248 = sst [smem:[#allocation105_spill]] %s9148_s25 }
 0x1e0   : > { %8263 = dma.done.wait (%p11245_p2), %s1477_s27, 2048  }
 0x1e1   : > { %8265 = vsyncadd (%p11245_p2), %s1477_s27, 4294965248  ;;  %s9154_s20 = scalar_lea.vmem [#allocation14], %s6177_s14  ;;  %s1495_s26 = scalar_lea.sflag [#allocation16], %s9115_s9 }
 0x1e2   : > { %11249 = sst [smem:[#allocation106_spill]] %s9154_s20  ;;  %s9157_s18 = scalar_lea.vmem [#allocation15], %s6177_s14 }
 0x1e3   : > { %11250 = sst [smem:[#allocation107_spill]] %s9157_s18 }
 0x1e4   : > { %8267 = dma.done.wait (%p11245_p2), %s1495_s26, 2048  }
 0x1e5   : > { %8269 = vsyncadd (%p11245_p2), %s1495_s26, 4294965248  ;;  %s9163_s23 = scalar_lea.vmem [#allocation17], %s6177_s14  ;;  %s1513_s8 = scalar_lea.sflag [#allocation19], %s9115_s9 }
 0x1e6   : > { %11251 = sst [smem:[#allocation108_spill]] %s9163_s23  ;;  %s9166_s28 = scalar_lea.vmem [#allocation18], %s6177_s14 }
 0x1e7   : > { %11252 = sst [smem:[#allocation109_spill]] %s9166_s28 }
 0x1e8   : > { %8271 = dma.done.wait (%p11245_p2), %s1513_s8, 3072  }
 0x1e9   : > { %8273 = vsyncadd (%p11245_p2), %s1513_s8, 4294964224  ;;  %s6185_s17 = sshll.u32 %s9129_s2, 7  ;;  %s1531_s4 = scalar_lea.sflag [#allocation22], %s9129_s2 }
 0x1ea   : > { %s9173_s27 = scalar_lea.vmem [#allocation20], %s6185_s17  ;;  %s9176_s26 = scalar_lea.vmem [#allocation21], %s6185_s17 }
 0x1eb   : > { %11253 = sst [smem:[#allocation110_spill]] %s9173_s27 }
 0x1ec   : > { %11254 = sst [smem:[#allocation111_spill]] %s9176_s26 }
 0x1ed   : > { %8275 = dma.done.wait (%p11245_p2), %s1531_s4, 2048  }
 0x1ee   : > { %8277 = vsyncadd (%p11245_p2), %s1531_s4, 4294965248  ;;  %s11255_s14 = sld [smem:[#allocation85_spill]]  ;;  %v11072_v0 = vlaneseq  ;;  %v11075_v2 = vmov 0.0   ;;  %v8390_v7 = vmov -1e+30   ;;  %s9236_s15 = scalar_lea.vmem [#allocation23], %s9106_s7 }
 0x1ef   : > { %s11260_s17 = sld [smem:[#allocation55_spill]]  ;;  %s9239_s16 = scalar_lea.vmem [#allocation24], %s9106_s7 }
 0x1f0   : > { %v1809_v1 = vand.u32 127, %v11072_v0  ;;  %s11261_s6 = sld [smem:[#allocation57_spill]] }
 0x1f1   : > { %s11262_s12 = sld [smem:[#allocation59_spill]] }
 0x1f2   : > { %vm1811_vm0 = vcmp.lt.s32.totalorder %v1809_v1, 32  ;;  %vm1816_vm1 = vcmp.ge.s32.totalorder %v1809_v1, 32  ;;  %vm1817_vm2 = vcmp.lt.s32.totalorder %v1809_v1, 64  ;;  %vm1822_vm3 = vcmp.ge.s32.totalorder %v1809_v1, 64  ;;  %s11263_s13 = sld [smem:[#allocation61_spill]] }
 0x1f3   : > { %v6194_v3 = vsel %vm1811_vm0, 1.0, %v11075_v2  ;;  %vm1818_vm4 = vmand %vm1816_vm1, %vm1817_vm2  ;;  %vm1823_vm5 = vcmp.lt.s32.totalorder %v1809_v1, 96  ;;  %vm1828_vm6 = vcmp.ge.s32.totalorder %v1809_v1, 96  ;;  %vm1834_vm7 = vcmp.lt.s32.totalorder %v1809_v1, 8  ;;  %s11264_s19 = sld [smem:[#allocation65_spill]] }
 0x1f4   : > { %p1752_p1 = scmp.lt.s32.totalorder %s11255_s14, 1  ;;  %v9188_v4 = vpack.c.bf16 %v6194_v3, %v6194_v3  ;;  %v6195_v5 = vsel %vm1818_vm4, 1.0, %v11075_v2  ;;  %vm1824_vm8 = vmand %vm1822_vm3, %vm1823_vm5  ;;  %v6197_v6 = vsel %vm1828_vm6, 1.0, %v11075_v2  ;;  %s11265_s21 = sld [smem:[#allocation63_spill]]  ;;  %v9192_v8 = vsel %vm1834_vm7, 0.0, %v8390_v7 }
 0x1f5   : > { %s11266_s29 = sld [smem:[#allocation66_spill]]  ;;  %v9198_v9 = vpack.c.bf16 %v6195_v5, %v6195_v5  ;;  %v6196_v10 = vsel %vm1824_vm8, 1.0, %v11075_v2  ;;  %v9201_v11 = vpack.c.bf16 %v6197_v6, %v6197_v6  ;;  %p6198_p6 = scmp.ne.s32.totalorder %s11255_s14, 0 }
 0x1f6   : > { %s9185_s2 = scalar_select %p1752_p1, %s11255_s14, 1  ;;  %v9207_v12 = vpack.c.bf16 %v6196_v10, %v6196_v10 }
 0x1f7   : > { %s11267_s11 = sld [smem:[#allocation67_spill]] }
 0x1f8   : > { %s11268_s0 = sld [smem:[#allocation68_spill]]  ;;  %s1766_s5 = scalar_lea.vmem %s11260_s17, %s9185_s2 }
 0x1f9   : > { %s11269_s9 = sld [smem:[#allocation69_spill]]  ;;  %s1769_s30 = scalar_lea.vmem %s11261_s6, %s9185_s2 }
 0x1fa   : > { %s11270_s26 = sld [smem:[#allocation70_spill]]  ;;  %s1772_s10 = scalar_lea.vmem %s11262_s12, %s9185_s2 }
 0x1fb   : > { %s11271_s27 = sld [smem:[#allocation71_spill]]  ;;  %s1775_s23 = scalar_lea.vmem %s11263_s13, %s9185_s2 }
 0x1fc   : > { %s6193_s20 = sshll.u32 %s9185_s2, 1  ;;  %s1782_s22 = scalar_lea.vmem %s11264_s19, %s9185_s2 }
 0x1fd   : > { %s9221_s18 = scalar_lea.vmem %s11265_s21, %s6193_s20  ;;  %s1785_s25 = scalar_lea.vmem %s11266_s29, %s9185_s2 }
 0x1fe   : > { %s1788_s24 = scalar_lea.vmem %s11267_s11, %s9185_s2  ;;  %s1791_s4 = scalar_lea.vmem %s11268_s0, %s9185_s2 }
 0x1ff   : > { %s1794_s28 = scalar_lea.vmem %s11269_s9, %s9185_s2  ;;  %s9242_s17 = scalar_lea.vmem [#allocation26], %s9118_s3 }
 0x200   : > { %s1797_s1 = scalar_lea.vmem %s11270_s26, %s9185_s2  ;;  %s9245_s6 = scalar_lea.vmem [#allocation27], %s9118_s3 }
 0x201   : > { %s1800_s8 = scalar_lea.vmem %s11271_s27, %s9185_s2  ;;  %s9248_s12 = scalar_lea.vmem [#allocation29], %s9106_s7 }
 0x202   : > { %s9251_s13 = scalar_lea.vmem [#allocation30], %s9106_s7  ;;  %1839 = sbr.rel (%p6198_p6) target bundleno = 521 (0x209), region = 192 }
 0x203   : > { %s11272_s29 = scalar_lea.vmem (!%p6198_p6), [#allocation3], %s9106_s7 }
 0x204   : > { %s11273_s19 = smov (!%p6198_p6), %s11272_s29 }
 0x207   : > { %v1840_v13 = vld [vmem:[%s11272_s29] sm:$0xff]  ;;  %v1841_v14 = vld [vmem:[%s11273_s19 + $0x8] sm:$0xff] }
 0x208   : > { %1842 = vst [vmem:[#allocation2] sm:$0xff] %v1840_v13  ;;  %1843 = vst [vmem:[#allocation2 + $0x8] sm:$0xff] %v1841_v14 }
 0x209 PF: > { %s11274_s11 = sld [smem:[#allocation103_spill]]  ;;  %6685 = vmatprep.subr.bf16.mxu1 %v11075_v2  ;;  %6665 = vmatprep.subr.bf16.mxu0 %v11075_v2  ;;  %vm8391_vm9 = vmmov 0   ;;  %vm2338_vm10 = vcmask 64512   ;;  %vm2478_vm11 = vcmask 1043456  }
 0x20a   : > { %s11275_s21 = sld [smem:[#allocation102_spill]]  ;;  %6701 = vmatprep.mubr.msk.bf16.mxu1 %vm8391_vm9, %v11075_v2  ;;  %6681 = vmatprep.mubr.msk.bf16.mxu0 %vm8391_vm9, %v11075_v2 }
 0x20b   : > { %s11276_s0 = sld [smem:[#allocation104_spill]] }
 0x20c   : > { %s11277_s7 = sld [smem:[#allocation49_spill]] }
 0x20d   : > { %s11278_s9 = sld [smem:[#allocation47_spill]] }
 0x20e   : > { %s11281_s27 = sld [smem:[#allocation51_spill]] }
 0x20f   : > { %v7524_v15 = vld [vmem:[%s11274_s11 + $0x38] sm:$0xff]   ;;  %v7526_v17 = vld [vmem:[%s11274_s11 + $0x30] sm:$0xff]   ;;  %v7528_v19 = vld [vmem:[%s11274_s11 + $0x28] sm:$0xff]   ;;  %s11283_s14 = sld [smem:[#allocation105_spill]] }
 0x210   : > { %v7525_v16 = vld [vmem:[%s11275_s21 + $0x38] sm:$0xff]   ;;  %6686 = vmatpush3.bf16.msra.mxu1 %v7524_v15  ;;  %v7527_v18 = vld [vmem:[%s11275_s21 + $0x30] sm:$0xff]   ;;  %v7529_v20 = vld [vmem:[%s11275_s21 + $0x28] sm:$0xff]   ;;  %s11284_s29 = sld [smem:[#allocation107_spill]] }
 0x211   : > { %6687 = vmatprep.subr.bf16.mxu1 %v11075_v2  ;;  %6666 = vmatpush3.bf16.msra.mxu0 %v7525_v16  ;;  %v7530_v21 = vld [vmem:[%s11274_s11 + $0x20] sm:$0xff]   ;;  %v7532_v23 = vld [vmem:[%s11274_s11 + $0x18] sm:$0xff]   ;;  %v7534_v25 = vld [vmem:[%s11274_s11 + $0x10] sm:$0xff]   ;;  %s11285_s19 = sld [smem:[#allocation101_spill]] }
 0x212   : > { %6667 = vmatprep.subr.bf16.mxu0 %v11075_v2  ;;  %v7531_v22 = vld [vmem:[%s11275_s21 + $0x20] sm:$0xff]   ;;  %v7533_v24 = vld [vmem:[%s11275_s21 + $0x18] sm:$0xff]   ;;  %v7535_v26 = vld [vmem:[%s11275_s21 + $0x10] sm:$0xff]   ;;  %s11279_s3 = scalar_lea.vmem %s11277_s7, %s9185_s2 }
 0x213   : > { %v7536_v27 = vld [vmem:[%s11274_s11 + $0x8] sm:$0xff]   ;;  %v7538_v29 = vld [vmem:[%s11274_s11] sm:$0xff]   ;;  %v7540_v34 = vld [vmem:[%s11276_s0 + $0x38] sm:$0xff]   ;;  %s11280_s20 = scalar_lea.vmem %s11278_s9, %s9185_s2  ;;  %s11286_s11 = sld [smem:[#allocation53_spill]] }
 0x214   : > { %6688 = vmatpush3.bf16.msra.mxu1 %v7526_v17  ;;  %v7537_v28 = vld [vmem:[%s11275_s21 + $0x8] sm:$0xff]   ;;  %v1844_v30 = vld [vmem:[#allocation2] sm:$0xff]  ;;  %v7541_v35 = vld [vmem:[%s11276_s0 + $0x30] sm:$0xff]   ;;  %s11282_s26 = scalar_lea.vmem %s11281_s27, %s9185_s2 }
 0x215   : > { %6689 = vmatprep.subr.bf16.mxu1 %v11075_v2  ;;  %6668 = vmatpush3.bf16.msra.mxu0 %v7527_v18  ;;  %v1845_v31 = vld [vmem:[#allocation2 + $0x8] sm:$0xff]  ;;  %v7539_v32 = vld [vmem:[%s11275_s21] sm:$0xff]   ;;  %v7544_v38 = vld [vmem:[%s11276_s0 + $0x18] sm:$0xff]  }
 0x216   : > { %6669 = vmatprep.subr.bf16.mxu0 %v11075_v2  ;;  %v1894_v33 = vpack.c.bf16 %v1845_v31, %v1844_v30  ;;  %v7542_v36 = vld [vmem:[%s11276_s0 + $0x28] sm:$0xff]   ;;  %v7543_v37 = vld [vmem:[%s11276_s0 + $0x20] sm:$0xff]   ;;  %v7545_v39 = vld [vmem:[%s11276_s0 + $0x10] sm:$0xff]  }
 0x217   : > { %v7546_v40 = vld [vmem:[%s11276_s0 + $0x8] sm:$0xff]   ;;  %v7547_v41 = vld [vmem:[%s11276_s0] sm:$0xff]   ;;  %s11288_s0 = sld [smem:[#allocation106_spill]] }
 0x218   : > { %6690 = vmatpush3.bf16.msra.mxu1 %v7528_v19  ;;  %v6208_v42 = vld [vmem:[%s11279_s3] ss:$0 sm:$0xff] }
 0x219   : > { %6691 = vmatprep.subr.bf16.mxu1 %v11075_v2  ;;  %6670 = vmatpush3.bf16.msra.mxu0 %v7529_v20  ;;  %v6199_v48 = vld [vmem:[%s11280_s20] ss:$0 sm:$0xff]  ;;  %s11287_s21 = scalar_lea.vmem %s11286_s11, %s9185_s2  ;;  %s11366_s20 = sld [smem:[#allocation85_spill]] }
 0x21a   : > { %6671 = vmatprep.subr.bf16.mxu0 %v11075_v2  ;;  %v9367_v5 = vld [vmem:[%s11282_s26] ss:$0 sm:$0xff] }
 0x21c   : > { %6692 = vmatpush3.bf16.msra.mxu1 %v7530_v21 }
 0x21d   : > { %6693 = vmatprep.subr.bf16.mxu1 %v11075_v2  ;;  %6672 = vmatpush3.bf16.msra.mxu0 %v7531_v22 }
 0x21e   : > { %6673 = vmatprep.subr.bf16.mxu0 %v11075_v2 }
 0x21f   : > { %p6281_p9 = scmp.ne.s32.totalorder %s11366_s20, 1 }
 0x220   : > { %6694 = vmatpush3.bf16.msra.mxu1 %v7532_v23 }
 0x221   : > { %6695 = vmatprep.subr.bf16.mxu1 %v11075_v2  ;;  %6674 = vmatpush3.bf16.msra.mxu0 %v7533_v24 }
 0x222   : > { %6675 = vmatprep.subr.bf16.mxu0 %v11075_v2 }
 0x224   : > { %6696 = vmatpush3.bf16.msra.mxu1 %v7534_v25 }
 0x225   : > { %6697 = vmatprep.subr.bf16.mxu1 %v11075_v2  ;;  %6676 = vmatpush3.bf16.msra.mxu0 %v7535_v26 }
 0x226   : > { %6677 = vmatprep.subr.bf16.mxu0 %v11075_v2 }
 0x228   : > { %6698 = vmatpush3.bf16.msra.mxu1 %v7536_v27 }
 0x229   : > { %6699 = vmatprep.subr.bf16.mxu1 %v11075_v2  ;;  %6678 = vmatpush3.bf16.msra.mxu0 %v7537_v28 }
 0x22a   : > { %6679 = vmatprep.subr.bf16.mxu0 %v11075_v2 }
 0x22c   : > { %6700 = vmatpush3.bf16.msra.mxu1 %v7538_v29 }
 0x22d   : > { %6680 = vmatpush3.bf16.msra.mxu0 %v7539_v32  ;;  %6725 = vmatprep.subr.bf16.mxu1 %v11075_v2 }
 0x22e   : > { %6705 = vmatprep.subr.bf16.mxu0 %v11075_v2 }
 0x22f   : > { %6702 = vmatmul.mubr.bf16.vlgmr.msra.gmra.mxu1 %v1894_v33 }
 0x230   : > { %6682 = vmatmul.mubr.bf16.vlgmr.msra.gmra.mxu0 %v1894_v33  ;;  %6727 = vmatprep.mubr.msk.bf16.mxu1 %vm8391_vm9, %v11075_v2 }
 0x231   : > { %6706 = vmatpush3.bf16.msra.mxu0 %v7540_v34  ;;  %6721 = vmatprep.mubr.msk.bf16.mxu0 %vm8391_vm9, %v11075_v2 }
 0x232   : > { %6707 = vmatprep.subr.bf16.mxu0 %v11075_v2 }
 0x235   : > { %6708 = vmatpush3.bf16.msra.mxu0 %v7541_v35 }
 0x236   : > { %6709 = vmatprep.subr.bf16.mxu0 %v11075_v2 }
 0x239   : > { %6710 = vmatpush3.bf16.msra.mxu0 %v7542_v36 }
 0x23a   : > { %6711 = vmatprep.subr.bf16.mxu0 %v11075_v2 }
 0x23d   : > { %6712 = vmatpush3.bf16.msra.mxu0 %v7543_v37 }
 0x23e   : > { %6713 = vmatprep.subr.bf16.mxu0 %v11075_v2 }
 0x241   : > { %6714 = vmatpush3.bf16.msra.mxu0 %v7544_v38 }
 0x242   : > { %6715 = vmatprep.subr.bf16.mxu0 %v11075_v2 }
 0x245   : > { %6716 = vmatpush3.bf16.msra.mxu0 %v7545_v39 }
 0x246   : > { %6717 = vmatprep.subr.bf16.mxu0 %v11075_v2 }
 0x249   : > { %6718 = vmatpush3.bf16.msra.mxu0 %v7546_v40 }
 0x24a   : > { %6719 = vmatprep.subr.bf16.mxu0 %v11075_v2 }
 0x24d   : > { %6720 = vmatpush3.bf16.msra.mxu0 %v7547_v41 }
 0x24e   : > { %6773 = vmatprep.subr.bf16.mxu0 %v11075_v2 }
 0x250   : > { %6722 = vmatmul.mubr.bf16.vlgmr.msra.gmra.mxu0 %v1894_v33 }
 0x251   : > { %6775 = vmatprep.mubr.msk.bf16.mxu0 %vm8391_vm9, %v11075_v2 }
 0x2ef   : > { %v2146_v43 = vpop.f32.mrf.mxu1 }
 0x2f0   : > { %v2147_v44 = vadd.f32 %v6208_v42, %v2146_v43  ;;  %v2051_v45 = vpop.f32.mrf.mxu0 }
 0x2f1   : > { %v6703_v46 = vpop.f32.mrf.mxu1  ;;  %v2052_v55 = vadd.f32 %v6199_v48, %v2051_v45 }
 0x2f2   : > { %v9321_v47 = vpack.c.bf16 %v2147_v44, %v2147_v44  ;;  %v6683_v49 = vpop.f32.mrf.mxu0 }
 0x2f3   : > { %v2149_v50 = vpop.f32.mrf.mxu1  ;;  %v9334_v59 = vpack.c.bf16 %v2052_v55, %v2052_v55 }
 0x2f4   : > { %v2150_v51 = vadd.f32 %v6208_v42, %v2149_v50  ;;  %v2254_v52 = vmul.bf16 %v9321_v47, %v9188_v4  ;;  %v2660_v53 = vmul.bf16 %v9321_v47, %v9207_v12  ;;  %v2054_v54 = vpop.f32.mrf.mxu0  ;;  %v2365_v63 = vmul.bf16 %v9321_v47, %v9198_v9 }
 0x2f5   : > { %v6704_v56 = vpop.f32.mrf.mxu1  ;;  %v2055_v61 = vadd.f32 %v6199_v48, %v2054_v54 }
 0x2f6   : > { %6726 = vmatpush3.bf16.xpose.msra.mxu1 %v2254_v52  ;;  %6774 = vmatpush3.bf16.xpose.msra.mxu0 %v2660_v53  ;;  %v6684_v57 = vpop.f32.mrf.mxu0  ;;  %v9332_v58 = vpack.c.bf16 %v2150_v51, %v2150_v51 }
 0x2f7   : > { %6731 = vmatprep.subr.bf16.mxu1 %v11075_v2  ;;  %6785 = vmatprep.subr.bf16.mxu0 %v11075_v2  ;;  %v9345_v62 = vpack.c.bf16 %v2055_v61, %v2055_v61 }
 0x2f8   : > { %v2255_v60 = vmul.bf16 %v9332_v58, %v9188_v4  ;;  %v2366_v1 = vmul.bf16 %v9332_v58, %v9198_v9 }
 0x2fd   : > { %6728 = vmatmul.mubr.bf16.vlgmr.msra.gmra.mxu1 %v9334_v59  ;;  %6776 = vmatmul.mubr.bf16.vlgmr.msra.gmra.mxu0 %v9334_v59 }
 0x2fe   : > { %6732 = vmatpush3.bf16.xpose.msra.mxu1 %v2255_v60  ;;  %6733 = vmatprep.mubr.msk.bf16.mxu1 %vm8391_vm9, %v11075_v2 }
 0x2ff   : > { %6737 = vmatprep.subr.bf16.mxu1 %v11075_v2  ;;  %6787 = vmatprep.mubr.msk.bf16.mxu0 %vm8391_vm9, %v11075_v2 }
 0x305   : > { %6734 = vmatmul.mubr.bf16.vlgmr.msra.gmra.mxu1 %v9345_v62 }
 0x306   : > { %6738 = vmatpush3.bf16.xpose.msra.mxu1 %v2365_v63  ;;  %6739 = vmatprep.mubr.msk.bf16.mxu1 %vm8391_vm9, %v11075_v2 }
 0x307   : > { %6743 = vmatprep.subr.bf16.mxu1 %v11075_v2 }
 0x30d   : > { %6740 = vmatmul.mubr.bf16.vlgmr.msra.gmra.mxu1 %v9334_v59 }
 0x30e   : > { %6744 = vmatpush3.bf16.xpose.msra.mxu1 %v2366_v1  ;;  %6745 = vmatprep.mubr.msk.bf16.mxu1 %vm8391_vm9, %v11075_v2 }
 0x30f   : > { %6749 = vmatprep.subr.bf16.mxu1 %v11075_v2 }
 0x310   : > { %v9362_v3 = vpop.f32.mrf.mxu0 }
 0x312   : > { %v6723_v6 = vpop.f32.mrf.mxu0 }
 0x314   : > { %v2244_v7 = vpop.f32.mrf.mxu0 }
 0x315   : > { %6746 = vmatmul.mubr.bf16.vlgmr.msra.gmra.mxu1 %v9345_v62  ;;  %v9370_v10 = vadd.f32 %v9367_v5, %v2244_v7 }
 0x316   : > { %6751 = vmatprep.mubr.msk.bf16.mxu1 %vm8391_vm9, %v11075_v2  ;;  %v6724_v13 = vpop.f32.mrf.mxu0 }
 0x3bd   : > { %v2290_v14 = vpop.f32.mrf.mxu1  ;;  %v2696_v15 = vpop.f32.mrf.mxu0 }
 0x3be   : > { %v2336_v16 = vmul.f32 0.17677669, %v2290_v14  ;;  %v2742_v60 = vmul.f32 0.17677669, %v2696_v15  ;;  %v2242_v14 = vadd.f32 %v9367_v5, %v9362_v3 }
 0x3bf   : > { %v6729_v17 = vpop.f32.mrf.mxu1  ;;  %v6777_v18 = vpop.f32.mrf.mxu0 }
 0x3c0   : > { %v2339_v19 = vsel %vm2338_vm10, %v2336_v16, -inf  ;;  %v2744_v6 = vsel %vm2338_vm10, %v2742_v60, -inf  ;;  %v2252_v15 = vpack.c.bf16 %v2242_v14, %v2242_v14 }
 0x3c1   : > { %2340 = vmax.xlane.f32.xlu1 %v2339_v19  ;;  %v2293_v20 = vpop.f32.mrf.mxu1  ;;  %v2699_v21 = vpop.f32.mrf.mxu0 }
 0x3c2   : > { %v2473_v17 = vmul.bf16 %v2252_v15, %v9198_v9  ;;  %v2768_v18 = vmul.bf16 %v2252_v15, %v9207_v12  ;;  %v2363_v20 = vmul.bf16 %v2252_v15, %v9188_v4  ;;  %v2972_v3 = vmul.bf16 %v2252_v15, %v9201_v11 }
 0x3c3   : > { %v6730_v22 = vpop.f32.mrf.mxu1  ;;  %v6778_v23 = vpop.f32.mrf.mxu0 }
 0x3c4   : > { %v2480_v21 = vsel %vm2478_vm11, %v2473_v17, 0  ;;  %v2774_v5 = vsel %vm2478_vm11, %v2768_v18, 0 }
 0x3c5   : > { %v2330_v24 = vpop.f32.mrf.mxu1  ;;  %6750 = vmatpush3.bf16.msra.mxu1 %v2480_v21  ;;  %6786 = vmatpush3.bf16.msra.mxu0 %v2774_v5 }
 0x3c6   : > { %v2337_v25 = vmul.f32 0.17677669, %v2330_v24  ;;  %v2572_v24 = vsel %vm2478_vm11, %v2363_v20, 0  ;;  %6755 = vmatprep.subr.bf16.mxu1 %v11075_v2  ;;  %6797 = vmatprep.subr.bf16.mxu0 %v11075_v2 }
 0x3c7   : > { %v6735_v26 = vpop.f32.mrf.mxu1 }
 0x3c8   : > { %v2342_v27 = vsel %vm2338_vm10, %v2337_v25, -inf }
 0x3c9   : > { %2343 = vmax.xlane.f32.xlu1 %v2342_v27  ;;  %v2333_v28 = vpop.f32.mrf.mxu1 }
 0x3ca   : > { %v2978_v28 = vsel %vm2478_vm11, %v2972_v3, 0 }
 0x3cb   : > { %v6736_v29 = vpop.f32.mrf.mxu1 }
 0x3cd   : > { %v2401_v30 = vpop.f32.mrf.mxu1 }
 0x3ce   : > { %v2447_v31 = vmul.f32 0.17677669, %v2401_v30 }
 0x3cf   : > { %v6741_v32 = vpop.f32.mrf.mxu1 }
 0x3d0   : > { %v2449_v33 = vsel %vm2338_vm10, %v2447_v31, -inf }
 0x3d1   : > { %2450 = vmax.xlane.f32.xlu0 %v2449_v33  ;;  %v2404_v34 = vpop.f32.mrf.mxu1 }
 0x3d3   : > { %v6742_v35 = vpop.f32.mrf.mxu1 }
 0x3d5   : > { %v2441_v36 = vpop.f32.mrf.mxu1 }
 0x3d6   : > { %v2448_v37 = vmul.f32 0.17677669, %v2441_v36 }
 0x3d7   : > { %v6747_v38 = vpop.f32.mrf.mxu1 }
 0x3d8   : > { %v2452_v39 = vsel %vm2338_vm10, %v2448_v37, -inf }
 0x3d9   : > { %2453 = vmax.xlane.f32.xlu0 %v2452_v39  ;;  %v2444_v40 = vpop.f32.mrf.mxu1 }
 0x3db   : > { %v6748_v41 = vpop.f32.mrf.mxu1 }
 0x44a   : > { %v2341_v42 = vpop.xlane.xlu1 %2340 }
 0x44b   : > { %v2345_v43 = vsub.f32 %v2336_v16, %v2341_v42  ;;  %v2253_v16 = vpack.c.bf16 %v9370_v10, %v9370_v10 }
 0x44d   : > { %v2347_v46 = vmul.f32 1.442695, %v2345_v43  ;;  %v2474_v19 = vmul.bf16 %v2253_v16, %v9198_v9  ;;  %v2364_v22 = vmul.bf16 %v2253_v16, %v9188_v4  ;;  %v2769_v23 = vmul.bf16 %v2253_v16, %v9207_v12 }
 0x44f   : > { %v2526_v10 = vsel %vm2478_vm11, %v2474_v19, 0  ;;  %v2618_v26 = vsel %vm2478_vm11, %v2364_v22, 0  ;;  %v2820_v27 = vsel %vm2478_vm11, %v2769_v23, 0 }
 0x452   : > { %v2344_v49 = vpop.xlane.xlu1 %2343 }
 0x453   : > { %v2346_v50 = vsub.f32 %v2337_v25, %v2344_v49  ;;  %v2973_v25 = vmul.bf16 %v2253_v16, %v9201_v11 }
 0x455   : > { %v2349_v53 = vmul.f32 1.442695, %v2346_v50  ;;  %v9409_v29 = vsel %vm2478_vm11, %v2973_v25, 0 }
 0x45a   : > { %v2451_v44 = vpop.xlane.xlu0 %2450 }
 0x45b   : > { %v2455_v45 = vsub.f32 %v2447_v31, %v2451_v44 }
 0x45d   : > { %v2457_v48 = vmul.f32 1.442695, %v2455_v45 }
 0x45f   : > { %7588 = vpow2.f32 %v2457_v48 }
 0x460   : > { %7590 = vpow2.f32 %v2347_v46 }
 0x462   : > { %v2454_v51 = vpop.xlane.xlu0 %2453 }
 0x463   : > { %v2456_v52 = vsub.f32 %v2448_v37, %v2454_v51 }
 0x465   : > { %v2459_v54 = vmul.f32 1.442695, %v2456_v52  ;;  %v2661_v52 = vmul.bf16 %v9332_v58, %v9207_v12 }
 0x467   : > { %7592 = vpow2.f32 %v2459_v54 }
 0x468   : > { %7594 = vpow2.f32 %v2349_v53 }
 0x46c   : > { %v7589_v55 = vpop.eup %7588 }
 0x46d   : > { %v2461_v56 = vsel %vm2338_vm10, %v7589_v55, 0.0  ;;  %v9377_v57 = vpop.eup %7590 }
 0x46e   : > { %2462 = vadd.xlane.f32.xlu0 %v2461_v56  ;;  %v2351_v61 = vsel %vm2338_vm10, %v9377_v57, 0.0 }
 0x472   : > { %2352 = vadd.xlane.f32.xlu0 %v2351_v61 }
 0x474   : > { %v7593_v63 = vpop.eup %7592 }
 0x475   : > { %v2464_v1 = vsel %vm2338_vm10, %v7593_v63, 0.0  ;;  %v9383_v7 = vpop.eup %7594 }
 0x476   : > { %2465 = vadd.xlane.f32.xlu1 %v2464_v1  ;;  %2745 = vmax.xlane.f32.xlu0 %v2744_v6  ;;  %v2354_v13 = vsel %vm2338_vm10, %v9383_v7, 0.0 }
 0x47a   : > { %2355 = vadd.xlane.f32.xlu1 %v2354_v13 }
 0x4f7   : > { %v2463_v30 = vpop.xlane.xlu0 %2462 }
 0x4f8   : > { %7596 = vrcp.f32 %v2463_v30 }
 0x4fb   : > { %v2353_v31 = vpop.xlane.xlu0 %2352 }
 0x4ff   : > { %v2466_v32 = vpop.xlane.xlu1 %2465  ;;  %v2746_v33 = vpop.xlane.xlu0 %2745 }
 0x500   : > { %7598 = vrcp.f32 %v2466_v32  ;;  %v2750_v34 = vsub.f32 %v2742_v60, %v2746_v33 }
 0x501   : > { %7600 = vrcp.f32 %v2353_v31 }
 0x502   : > { %v2752_v35 = vmul.f32 1.442695, %v2750_v34 }
 0x503   : > { %v2356_v39 = vpop.xlane.xlu1 %2355 }
 0x504   : > { %7602 = vpow2.f32 %v2752_v35 }
 0x505   : > { %v7597_v36 = vpop.eup %7596  ;;  %7604 = vrcp.f32 %v2356_v39 }
 0x506   : > { %v2468_v37 = vmul.f32 %v7597_v36, %v7589_v55 }
 0x508   : > { %v2471_v38 = vpack.c.bf16 %v2468_v37, %v2468_v37 }
 0x50a   : > { %6752 = vmatmul.mubr.msk.bf16.vlgmr.msra.gmra.mxu1 %vm2338_vm10, %v2471_v38 }
 0x50b   : > { %6756 = vmatpush3.bf16.msra.mxu1 %v2526_v10  ;;  %6757 = vmatprep.mubr.msk.bf16.mxu1 %vm8391_vm9, %v11075_v2 }
 0x50c   : > { %6761 = vmatprep.subr.bf16.mxu1 %v11075_v2 }
 0x50d   : > { %v7599_v40 = vpop.eup %7598 }
 0x50e   : > { %v2470_v41 = vmul.f32 %v7599_v40, %v7593_v63  ;;  %v7601_v42 = vpop.eup %7600 }
 0x50f   : > { %v2358_v46 = vmul.f32 %v7601_v42, %v9377_v57  ;;  %v2864_v57 = vmul.bf16 %v9321_v47, %v9201_v11 }
 0x510   : > { %v2472_v43 = vpack.c.bf16 %v2470_v41, %v2470_v41 }
 0x511   : > { %v7603_v44 = vpop.eup %7602  ;;  %v2361_v48 = vpack.c.bf16 %v2358_v46, %v2358_v46 }
 0x512   : > { %6758 = vmatmul.mubr.msk.bf16.vlgmr.msra.gmra.mxu1 %vm2338_vm10, %v2472_v43  ;;  %v2756_v45 = vsel %vm2338_vm10, %v7603_v44, 0.0  ;;  %v7605_v49 = vpop.eup %7604 }
 0x513   : > { %6762 = vmatpush3.bf16.msra.mxu1 %v2572_v24  ;;  %2757 = vadd.xlane.f32.xlu0 %v2756_v45  ;;  %v2360_v50 = vmul.f32 %v7605_v49, %v9383_v7 }
 0x514   : > { %6763 = vmatprep.mubr.msk.bf16.mxu1 %vm8391_vm9, %v11075_v2  ;;  %6767 = vmatprep.subr.bf16.mxu1 %v11075_v2 }
 0x515   : > { %v2362_v51 = vpack.c.bf16 %v2360_v50, %v2360_v50 }
 0x51a   : > { %6764 = vmatmul.mubr.msk.bf16.vlgmr.msra.gmra.mxu1 %vm2338_vm10, %v2361_v48 }
 0x51b   : > { %6768 = vmatpush3.bf16.msra.mxu1 %v2618_v26  ;;  %6769 = vmatprep.mubr.msk.bf16.mxu1 %vm8391_vm9, %v11075_v2 }
 0x51c   : > { %6779 = vmatprep.subr.bf16.mxu1 %v11075_v2 }
 0x522   : > { %6770 = vmatmul.mubr.msk.bf16.vlgmr.msra.gmra.mxu1 %vm2338_vm10, %v2362_v51 }
 0x523   : > { %6780 = vmatpush3.bf16.xpose.msra.mxu1 %v2661_v52  ;;  %6781 = vmatprep.mubr.msk.bf16.mxu1 %vm8391_vm9, %v11075_v2 }
 0x524   : > { %6791 = vmatprep.subr.bf16.mxu1 %v11075_v2 }
 0x52a   : > { %6782 = vmatmul.mubr.bf16.vlgmr.msra.gmra.mxu1 %v9345_v62 }
 0x52b   : > { %6792 = vmatpush3.bf16.msra.mxu1 %v2820_v27  ;;  %6793 = vmatprep.mubr.msk.bf16.mxu1 %vm8391_vm9, %v11075_v2 }
 0x52c   : > { %6803 = vmatprep.subr.bf16.mxu1 %v11075_v2 }
 0x59c   : > { %v2758_v53 = vpop.xlane.xlu0 %2757 }
 0x59d   : > { %7606 = vrcp.f32 %v2758_v53  ;;  %v2865_v53 = vmul.bf16 %v9332_v58, %v9201_v11 }
 0x5aa   : > { %v7607_v54 = vpop.eup %7606 }
 0x5ab   : > { %v2763_v55 = vmul.f32 %v7607_v54, %v7603_v44 }
 0x5ad   : > { %v2766_v56 = vpack.c.bf16 %v2763_v55, %v2763_v55 }
 0x5af   : > { %6788 = vmatmul.mubr.msk.bf16.vlgmr.msra.gmra.mxu0 %vm2338_vm10, %v2766_v56 }
 0x5b0   : > { %6798 = vmatpush3.bf16.xpose.msra.mxu0 %v2864_v57  ;;  %6799 = vmatprep.mubr.msk.bf16.mxu0 %vm8391_vm9, %v11075_v2 }
 0x5b1   : > { %6809 = vmatprep.subr.bf16.mxu0 %v11075_v2 }
 0x5b7   : > { %6800 = vmatmul.mubr.bf16.vlgmr.msra.gmra.mxu0 %v9334_v59 }
 0x5b8   : > { %6810 = vmatpush3.bf16.msra.mxu0 %v2978_v28  ;;  %6811 = vmatprep.mubr.msk.bf16.mxu0 %vm8391_vm9, %v11075_v2 }
 0x5b9   : > { %6821 = vmatprep.subr.bf16.mxu0 %v11075_v2 }
 0x5ca   : > { %v2516_v60 = vpop.f32.mrf.mxu1 }
 0x5cc   : > { %v6753_v61 = vpop.f32.mrf.mxu1 }
 0x5ce   : > { %v2519_v63 = vpop.f32.mrf.mxu1 }
 0x5d0   : > { %v6754_v47 = vpop.f32.mrf.mxu1 }
 0x5d2   : > { %v2562_v1 = vpop.f32.mrf.mxu1 }
 0x5d4   : > { %v6759_v6 = vpop.f32.mrf.mxu1 }
 0x5d6   : > { %v2565_v7 = vpop.f32.mrf.mxu1 }
 0x5d8   : > { %v6760_v13 = vpop.f32.mrf.mxu1 }
 0x5da   : > { %v2608_v14 = vpop.f32.mrf.mxu1 }
 0x5db   : > { %v2609_v15 = vadd.f32 %v2608_v14, %v2516_v60 }
 0x5dc   : > { %v6765_v16 = vpop.f32.mrf.mxu1 }
 0x5de   : > { %v2611_v17 = vpop.f32.mrf.mxu1 }
 0x5e0   : > { %v6766_v18 = vpop.f32.mrf.mxu1 }
 0x5e2   : > { %v2654_v59 = vpop.f32.mrf.mxu1 }
 0x5e3   : > { %v2655_v19 = vadd.f32 %v2654_v59, %v2562_v1 }
 0x5e4   : > { %v6771_v20 = vpop.f32.mrf.mxu1 }
 0x5e6   : > { %v2657_v21 = vpop.f32.mrf.mxu1 }
 0x5e8   : > { %v6772_v22 = vpop.f32.mrf.mxu1 }
 0x5ea   : > { %v2736_v23 = vpop.f32.mrf.mxu1 }
 0x5eb   : > { %v2743_v3 = vmul.f32 0.17677669, %v2736_v23  ;;  %v7548_v23 = vld [vmem:[%s11283_s14 + $0x38] sm:$0xff]  }
 0x5ec   : > { %v6783_v5 = vpop.f32.mrf.mxu1 }
 0x5ed   : > { %v2747_v10 = vsel %vm2338_vm10, %v2743_v3, -inf  ;;  %v7550_v5 = vld [vmem:[%s11283_s14 + $0x28] sm:$0xff]  }
 0x5ee   : > { %2748 = vmax.xlane.f32.xlu1 %v2747_v10  ;;  %v2739_v24 = vpop.f32.mrf.mxu1  ;;  %v7551_v10 = vld [vmem:[%s11283_s14 + $0x20] sm:$0xff]  }
 0x5ef   : > { %v7552_v24 = vld [vmem:[%s11283_s14 + $0x18] sm:$0xff]  }
 0x5f0   : > { %v6784_v25 = vpop.f32.mrf.mxu1 }
 0x5f1   : > { %v7553_v25 = vld [vmem:[%s11283_s14 + $0x10] sm:$0xff]  }
 0x66f   : > { %v2810_v26 = vpop.f32.mrf.mxu0 }
 0x670   : > { %v2862_v27 = vadd.f32 %v2810_v26, %v2609_v15  ;;  %v7554_v26 = vld [vmem:[%s11283_s14 + $0x8] sm:$0xff]  }
 0x671   : > { %v6789_v28 = vpop.f32.mrf.mxu0 }
 0x673   : > { %v2813_v30 = vpop.f32.mrf.mxu0 }
 0x675   : > { %v6790_v31 = vpop.f32.mrf.mxu0 }
 0x677   : > { %v2749_v32 = vpop.xlane.xlu1 %2748  ;;  %v2900_v33 = vpop.f32.mrf.mxu0 }
 0x678   : > { %v2751_v34 = vsub.f32 %v2743_v3, %v2749_v32  ;;  %v2946_v35 = vmul.f32 0.17677669, %v2900_v33  ;;  %v7549_v3 = vld [vmem:[%s11283_s14 + $0x30] sm:$0xff]   ;;  %v7555_v32 = vld [vmem:[%s11283_s14] sm:$0xff]  }
 0x679   : > { %v6801_v36 = vpop.f32.mrf.mxu0 }
 0x67a   : > { %v2754_v37 = vmul.f32 1.442695, %v2751_v34  ;;  %v2948_v38 = vsel %vm2338_vm10, %v2946_v35, -inf }
 0x67b   : > { %2949 = vmax.xlane.f32.xlu0 %v2948_v38  ;;  %v2903_v39 = vpop.f32.mrf.mxu0 }
 0x67c   : > { %7608 = vpow2.f32 %v2754_v37  ;;  %v7556_v39 = vld [vmem:[%s11284_s29 + $0x38] sm:$0xff]  }
 0x67d   : > { %v6802_v40 = vpop.f32.mrf.mxu0 }
 0x67e   : > { %v7557_v40 = vld [vmem:[%s11284_s29 + $0x30] sm:$0xff]  }
 0x689   : > { %v7609_v41 = vpop.eup %7608 }
 0x68a   : > { %v2759_v42 = vsel %vm2338_vm10, %v7609_v41, 0.0 }
 0x68b   : > { %2760 = vadd.xlane.f32.xlu1 %v2759_v42  ;;  %v1847_v42 = vld [vmem:[%s11285_s19 + $0x8] sm:$0xff] }
 0x704   : > { %v2950_v43 = vpop.xlane.xlu0 %2949 }
 0x705   : > { %v2954_v44 = vsub.f32 %v2946_v35, %v2950_v43  ;;  %v7558_v43 = vld [vmem:[%s11284_s29 + $0x28] sm:$0xff]  }
 0x707   : > { %v2956_v45 = vmul.f32 1.442695, %v2954_v44 }
 0x709   : > { %7610 = vpow2.f32 %v2956_v45  ;;  %v7559_v45 = vld [vmem:[%s11284_s29 + $0x20] sm:$0xff]  }
 0x714   : > { %v2761_v46 = vpop.xlane.xlu1 %2760 }
 0x715   : > { %7612 = vrcp.f32 %v2761_v46  ;;  %v7560_v46 = vld [vmem:[%s11284_s29 + $0x18] sm:$0xff]  }
 0x716   : > { %v7611_v48 = vpop.eup %7610 }
 0x717   : > { %v2960_v49 = vsel %vm2338_vm10, %v7611_v48, 0.0 }
 0x718   : > { %2961 = vadd.xlane.f32.xlu0 %v2960_v49  ;;  %v7562_v49 = vld [vmem:[%s11284_s29 + $0x8] sm:$0xff]  }
 0x722   : > { %v7613_v50 = vpop.eup %7612 }
 0x723   : > { %v2765_v51 = vmul.f32 %v7613_v50, %v7609_v41  ;;  %v1846_v41 = vld [vmem:[%s11285_s19] sm:$0xff] }
 0x724   : > { %v9489_v44 = vpack.c.bf16 %v1847_v42, %v1846_v41  ;;  %v7563_v50 = vld [vmem:[%s11284_s29] sm:$0xff]   ;;  %v1873_v41 = vld [vmem:[%s11285_s19 + $0xd8] sm:$0xff] }
 0x725   : > { %v2767_v52 = vpack.c.bf16 %v2765_v51, %v2765_v51  ;;  %v1848_v51 = vld [vmem:[%s11285_s19 + $0x10] sm:$0xff]  ;;  %v1874_v42 = vld [vmem:[%s11285_s19 + $0xe0] sm:$0xff] }
 0x727   : > { %6794 = vmatmul.mubr.msk.bf16.vlgmr.msra.gmra.mxu1 %vm2338_vm10, %v2767_v52  ;;  %v1849_v52 = vld [vmem:[%s11285_s19 + $0x18] sm:$0xff] }
 0x728   : > { %6804 = vmatpush3.bf16.xpose.msra.mxu1 %v2865_v53  ;;  %6805 = vmatprep.mubr.msk.bf16.mxu1 %vm8391_vm9, %v11075_v2  ;;  %v1850_v53 = vld [vmem:[%s11285_s19 + $0x20] sm:$0xff] }
 0x729   : > { %6815 = vmatprep.subr.bf16.mxu1 %v11075_v2 }
 0x72f   : > { %6806 = vmatmul.mubr.bf16.vlgmr.msra.gmra.mxu1 %v9345_v62 }
 0x730   : > { %6816 = vmatpush3.bf16.msra.mxu1 %v9409_v29  ;;  %6817 = vmatprep.mubr.msk.bf16.mxu1 %vm8391_vm9, %v11075_v2 }
 0x731   : > { %6841 = vmatprep.subr.bf16.mxu1 %v11075_v2 }
 0x7a1   : > { %v2962_v54 = vpop.xlane.xlu0 %2961 }
 0x7a2   : > { %7614 = vrcp.f32 %v2962_v54  ;;  %v1851_v54 = vld [vmem:[%s11285_s19 + $0x28] sm:$0xff] }
 0x7af   : > { %v7615_v58 = vpop.eup %7614 }
 0x7b0   : > { %v2967_v55 = vmul.f32 %v7615_v58, %v7611_v48  ;;  %v7561_v48 = vld [vmem:[%s11284_s29 + $0x10] sm:$0xff]   ;;  %v9501_v58 = vpack.c.bf16 %v1849_v52, %v1848_v51 }
 0x7b2   : > { %v2970_v56 = vpack.c.bf16 %v2967_v55, %v2967_v55  ;;  %v9503_v55 = vpack.c.bf16 %v1851_v54, %v1850_v53 }
 0x7b4   : > { %6812 = vmatmul.mubr.msk.bf16.vlgmr.msra.gmra.mxu0 %vm2338_vm10, %v2970_v56  ;;  %v1852_v56 = vld [vmem:[%s11285_s19 + $0x30] sm:$0xff] }
 0x7b5   : > { %6837 = vmatprep.mubr.msk.bf16.mxu0 %vm8391_vm9, %v11075_v2  ;;  %6822 = vmatpush3.bf16.msra.mxu0 %v7548_v23 }
 0x7b6   : > { %6823 = vmatprep.subr.bf16.mxu0 %v11075_v2 }
 0x7b9   : > { %6824 = vmatpush3.bf16.msra.mxu0 %v7549_v3 }
 0x7ba   : > { %6825 = vmatprep.subr.bf16.mxu0 %v11075_v2 }
 0x7bd   : > { %6826 = vmatpush3.bf16.msra.mxu0 %v7550_v5  ;;  %v7657_v5 = vld [vmem:[#allocation2 + $0x8] sm:$0xff] }
 0x7be   : > { %6827 = vmatprep.subr.bf16.mxu0 %v11075_v2 }
 0x7c1   : > { %6828 = vmatpush3.bf16.msra.mxu0 %v7551_v10 }
 0x7c2   : > { %6829 = vmatprep.subr.bf16.mxu0 %v11075_v2 }
 0x7c5   : > { %6830 = vmatpush3.bf16.msra.mxu0 %v7552_v24  ;;  %v1862_v24 = vld [vmem:[%s11285_s19 + $0x80] sm:$0xff] }
 0x7c6   : > { %6831 = vmatprep.subr.bf16.mxu0 %v11075_v2 }
 0x7c9   : > { %6832 = vmatpush3.bf16.msra.mxu0 %v7553_v25  ;;  %v1863_v25 = vld [vmem:[%s11285_s19 + $0x88] sm:$0xff] }
 0x7ca   : > { %6833 = vmatprep.subr.bf16.mxu0 %v11075_v2 }
 0x7cd   : > { %6834 = vmatpush3.bf16.msra.mxu0 %v7554_v26  ;;  %v9538_v26 = vpack.c.bf16 %v1863_v25, %v1862_v24  ;;  %v7570_v25 = vld [vmem:[%s11288_s0 + $0x8] sm:$0xff]  }
 0x7ce   : > { %6835 = vmatprep.subr.bf16.mxu0 %v11075_v2 }
 0x7d1   : > { %6836 = vmatpush3.bf16.msra.mxu0 %v7555_v32  ;;  %v1867_v32 = vld [vmem:[%s11285_s19 + $0xa8] sm:$0xff] }
 0x7d2   : > { %6861 = vmatprep.subr.bf16.mxu0 %v7556_v39 }
 0x7e7   : > { %v2856_v57 = vpop.f32.mrf.mxu1 }
 0x7e8   : > { %v2863_v60 = vadd.f32 %v2856_v57, %v2655_v19  ;;  %v1853_v57 = vld [vmem:[%s11285_s19 + $0x38] sm:$0xff] }
 0x7e9   : > { %v6795_v62 = vpop.f32.mrf.mxu1 }
 0x7ea   : > { %v1855_v62 = vld [vmem:[%s11285_s19 + $0x48] sm:$0xff] }
 0x7eb   : > { %v2859_v61 = vpop.f32.mrf.mxu1 }
 0x7ec   : > { %v9512_v61 = vpack.c.bf16 %v1853_v57, %v1852_v56 }
 0x7ed   : > { %v6796_v29 = vpop.f32.mrf.mxu1 }
 0x7ef   : > { %v2940_v63 = vpop.f32.mrf.mxu1 }
 0x7f0   : > { %v2947_v47 = vmul.f32 0.17677669, %v2940_v63  ;;  %v1856_v63 = vld [vmem:[%s11285_s19 + $0x50] sm:$0xff] }
 0x7f1   : > { %v6807_v1 = vpop.f32.mrf.mxu1 }
 0x7f2   : > { %v2951_v6 = vsel %vm2338_vm10, %v2947_v47, -inf  ;;  %v1858_v1 = vld [vmem:[%s11285_s19 + $0x60] sm:$0xff] }
 0x7f3   : > { %2952 = vmax.xlane.f32.xlu1 %v2951_v6  ;;  %v2943_v7 = vpop.f32.mrf.mxu1  ;;  %v1859_v6 = vld [vmem:[%s11285_s19 + $0x68] sm:$0xff] }
 0x7f5   : > { %v6808_v13 = vpop.f32.mrf.mxu1 }
 0x7f6   : > { %v9524_v13 = vpack.c.bf16 %v1859_v6, %v1858_v1  ;;  %v7566_v1 = vld [vmem:[%s11288_s0 + $0x28] sm:$0xff]   ;;  %v7567_v6 = vld [vmem:[%s11288_s0 + $0x20] sm:$0xff]  }
 0x874   : > { %v3014_v14 = vpop.f32.mrf.mxu0 }
 0x875   : > { %v3066_v15 = vadd.f32 %v3014_v14, %v2862_v27  ;;  %v1860_v14 = vld [vmem:[%s11285_s19 + $0x70] sm:$0xff] }
 0x876   : > { %v6813_v16 = vpop.f32.mrf.mxu0 }
 0x878   : > { %v3017_v17 = vpop.f32.mrf.mxu0 }
 0x879   : > { %v6234_v17 = vld [vmem:[%s11287_s21] ss:$0 sm:$0xff] }
 0x87a   : > { %v6814_v18 = vpop.f32.mrf.mxu0 }
 0x87c   : > { %v2953_v59 = vpop.xlane.xlu1 %2952 }
 0x87d   : > { %v2955_v19 = vsub.f32 %v2947_v47, %v2953_v59  ;;  %v1857_v47 = vld [vmem:[%s11285_s19 + $0x58] sm:$0xff] }
 0x87e   : > { %v9522_v7 = vpack.c.bf16 %v1857_v47, %v1856_v63  ;;  %v7565_v47 = vld [vmem:[%s11288_s0 + $0x30] sm:$0xff]  }
 0x87f   : > { %v2958_v20 = vmul.f32 1.442695, %v2955_v19 }
 0x881   : > { %7616 = vpow2.f32 %v2958_v20  ;;  %v7656_v20 = vld [vmem:[#allocation2] sm:$0xff] }
 0x88e   : > { %v7617_v21 = vpop.eup %7616 }
 0x88f   : > { %v2963_v22 = vsel %vm2338_vm10, %v7617_v21, 0.0 }
 0x890   : > { %2964 = vadd.xlane.f32.xlu1 %v2963_v22 }
 0x919   : > { %v2965_v27 = vpop.xlane.xlu1 %2964 }
 0x91a   : > { %7618 = vrcp.f32 %v2965_v27  ;;  %v1864_v27 = vld [vmem:[%s11285_s19 + $0x90] sm:$0xff] }
 0x927   : > { %v7619_v28 = vpop.eup %7618 }
 0x928   : > { %v2969_v30 = vmul.f32 %v7619_v28, %v7617_v21  ;;  %v1865_v28 = vld [vmem:[%s11285_s19 + $0x98] sm:$0xff] }
 0x92a   : > { %v2971_v31 = vpack.c.bf16 %v2969_v30, %v2969_v30  ;;  %v9542_v30 = vpack.c.bf16 %v1865_v28, %v1864_v27  ;;  %v7571_v28 = vld [vmem:[%s11288_s0] sm:$0xff]  }
 0x92c   : > { %6818 = vmatmul.mubr.msk.bf16.vlgmr.msra.gmra.mxu1 %vm2338_vm10, %v2971_v31  ;;  %v1866_v31 = vld [vmem:[%s11285_s19 + $0xa0] sm:$0xff] }
 0x92d   : > { %6857 = vmatprep.mubr.msk.bf16.mxu1 %vm8391_vm9, %v11075_v2 }
 0x9ec   : > { %v3060_v33 = vpop.f32.mrf.mxu1 }
 0x9ed   : > { %v3067_v34 = vadd.f32 %v3060_v33, %v2863_v60  ;;  %v1854_v60 = vld [vmem:[%s11285_s19 + $0x40] sm:$0xff]  ;;  %v9548_v33 = vpack.c.bf16 %v1867_v32, %v1866_v31 }
 0x9ee   : > { %v6819_v35 = vpop.f32.mrf.mxu1  ;;  %v9514_v29 = vpack.c.bf16 %v1855_v62, %v1854_v60 }
 0x9ef   : > { %v3068_v36 = vpack.c.bf16 %v3067_v34, %v3066_v15  ;;  %v1861_v15 = vld [vmem:[%s11285_s19 + $0x78] sm:$0xff]  ;;  %v1868_v34 = vld [vmem:[%s11285_s19 + $0xb0] sm:$0xff] }
 0x9f0   : > { %v3063_v37 = vpop.f32.mrf.mxu1  ;;  %v9530_v16 = vpack.c.bf16 %v1861_v15, %v1860_v14  ;;  %v1869_v35 = vld [vmem:[%s11285_s19 + $0xb8] sm:$0xff]  ;;  %v9596_v15 = vld [vmem:[%s1769_s30] ss:$0 sm:$0xff]  ;;  %s11290_s30 = sld [smem:[#allocation108_spill]] }
 0x9f1   : > { %6838 = vmatmul.mubr.bf16.vlgmr.msra.gmra.mxu0 %v3068_v36  ;;  %v9552_v36 = vpack.c.bf16 %v1869_v35, %v1868_v34  ;;  %v1870_v37 = vld [vmem:[%s11285_s19 + $0xc0] sm:$0xff] }
 0x9f2   : > { %v6820_v38 = vpop.f32.mrf.mxu1  ;;  %6862 = vmatpush3.bf16.msra.mxu0 %v7556_v39  ;;  %6877 = vmatprep.mubr.bf16.mxu0 %v9489_v44  ;;  %v1872_v39 = vld [vmem:[%s11285_s19 + $0xd0] sm:$0xff] }
 0x9f3   : > { %6863 = vmatprep.subr.bf16.mxu0 %v7557_v40  ;;  %v1871_v38 = vld [vmem:[%s11285_s19 + $0xc8] sm:$0xff] }
 0x9f6   : > { %6864 = vmatpush3.bf16.msra.mxu0 %v7557_v40  ;;  %v9559_v40 = vpack.c.bf16 %v1871_v38, %v1870_v37  ;;  %v9627_v34 = vld [vmem:[%s11290_s30 + $0x38] sm:$0xff]  }
 0x9f7   : > { %6865 = vmatprep.subr.bf16.mxu0 %v7558_v43 }
 0x9fa   : > { %6866 = vmatpush3.bf16.msra.mxu0 %v7558_v43  ;;  %v1875_v43 = vld [vmem:[%s11285_s19 + $0xe8] sm:$0xff] }
 0x9fb   : > { %6867 = vmatprep.subr.bf16.mxu0 %v7559_v45 }
 0x9fe   : > { %6868 = vmatpush3.bf16.msra.mxu0 %v7559_v45  ;;  %v7564_v45 = vld [vmem:[%s11288_s0 + $0x38] sm:$0xff]  }
 0x9ff   : > { %6869 = vmatprep.subr.bf16.mxu0 %v7560_v46  ;;  %6842 = vmatpush3.bf16.msra.mxu1 %v7564_v45 }
 0xa00   : > { %6843 = vmatprep.subr.bf16.mxu1 %v11075_v2 }
 0xa02   : > { %6870 = vmatpush3.bf16.msra.mxu0 %v7560_v46  ;;  %v9566_v46 = vpack.c.bf16 %v1873_v41, %v1872_v39 }
 0xa03   : > { %6871 = vmatprep.subr.bf16.mxu0 %v7561_v48  ;;  %6844 = vmatpush3.bf16.msra.mxu1 %v7565_v47 }
 0xa04   : > { %6845 = vmatprep.subr.bf16.mxu1 %v11075_v2 }
 0xa06   : > { %6872 = vmatpush3.bf16.msra.mxu0 %v7561_v48  ;;  %v9568_v48 = vpack.c.bf16 %v1875_v43, %v1874_v42 }
 0xa07   : > { %6873 = vmatprep.subr.bf16.mxu0 %v7562_v49  ;;  %6846 = vmatpush3.bf16.msra.mxu1 %v7566_v1 }
 0xa08   : > { %6847 = vmatprep.subr.bf16.mxu1 %v11075_v2 }
 0xa0a   : > { %6874 = vmatpush3.bf16.msra.mxu0 %v7562_v49  ;;  %v1876_v49 = vld [vmem:[%s11285_s19 + $0xf0] sm:$0xff] }
 0xa0b   : > { %6875 = vmatprep.subr.bf16.mxu0 %v7563_v50  ;;  %6848 = vmatpush3.bf16.msra.mxu1 %v7567_v6 }
 0xa0c   : > { %6849 = vmatprep.subr.bf16.mxu1 %v11075_v2 }
 0xa0e   : > { %6876 = vmatpush3.bf16.msra.mxu0 %v7563_v50  ;;  %v1877_v50 = vld [vmem:[%s11285_s19 + $0xf8] sm:$0xff] }
 0xa0f   : > { %6957 = vmatprep.subr.bf16.mxu0 %v11075_v2  ;;  %v9575_v51 = vpack.c.bf16 %v1877_v50, %v1876_v49 }
 0xa11   : > { %6878 = vmatmul.mubr.bf16.vlgmr.msra.gmra.mxu0 %v9501_v58 }
 0xa12   : > { %6881 = vmatprep.mubr.bf16.mxu0 %v9503_v55 }
 0xa19   : > { %6882 = vmatmul.mubr.bf16.gmra.mxu0 %v9512_v61 }
 0xa1a   : > { %6885 = vmatprep.mubr.bf16.mxu0 %v9514_v29 }
 0xa21   : > { %6886 = vmatmul.mubr.bf16.gmra.mxu0 %v9522_v7 }
 0xa22   : > { %6889 = vmatprep.mubr.bf16.mxu0 %v9524_v13 }
 0xa29   : > { %6890 = vmatmul.mubr.bf16.gmra.mxu0 %v9530_v16 }
 0xa2a   : > { %6893 = vmatprep.mubr.bf16.mxu0 %v9538_v26 }
 0xa31   : > { %6894 = vmatmul.mubr.bf16.gmra.mxu0 %v9542_v30 }
 0xa32   : > { %6897 = vmatprep.mubr.bf16.mxu0 %v9548_v33 }
 0xa39   : > { %6898 = vmatmul.mubr.bf16.gmra.mxu0 %v9552_v36 }
 0xa3a   : > { %6901 = vmatprep.mubr.bf16.mxu0 %v9559_v40 }
 0xa41   : > { %6902 = vmatmul.mubr.bf16.gmra.mxu0 %v9566_v46 }
 0xa42   : > { %6905 = vmatprep.mubr.bf16.mxu0 %v9568_v48 }
 0xa49   : > { %6906 = vmatmul.mubr.bf16.gmra.mxu0 %v9575_v51 }
 0xa4a   : > { %6973 = vmatprep.mubr.msk.bf16.mxu0 %vm8391_vm9, %v11075_v2 }
 0xab1   : > { %v3157_v18 = vpop.f32.mrf.mxu0 }
 0xab2   : > { %v3158_v59 = vadd.f32 %v6234_v17, %v3157_v18 }
 0xab3   : > { %v6839_v19 = vpop.f32.mrf.mxu0 }
 0xab4   : > { %v3164_v21 = vadd.f32 %v7656_v20, %v3158_v59  ;;  %v7568_v59 = vld [vmem:[%s11288_s0 + $0x18] sm:$0xff]  }
 0xab5   : > { %v3160_v22 = vpop.f32.mrf.mxu0  ;;  %6850 = vmatpush3.bf16.msra.mxu1 %v7568_v59 }
 0xab6   : > { %v3161_v23 = vadd.f32 %v6234_v17, %v3160_v22  ;;  %3168 = vadd.xlane.f32.xlu0 %v3164_v21  ;;  %6851 = vmatprep.subr.bf16.mxu1 %v11075_v2 }
 0xab7   : > { %v6840_v3 = vpop.f32.mrf.mxu0 }
 0xab8   : > { %v3165_v10 = vadd.f32 %v7657_v5, %v3161_v23  ;;  %v7569_v5 = vld [vmem:[%s11288_s0 + $0x10] sm:$0xff]  }
 0xab9   : > { %6852 = vmatpush3.bf16.msra.mxu1 %v7569_v5 }
 0xaba   : > { %3170 = vadd.xlane.f32.xlu1 %v3165_v10  ;;  %6853 = vmatprep.subr.bf16.mxu1 %v11075_v2 }
 0xabd   : > { %6854 = vmatpush3.bf16.msra.mxu1 %v7570_v25 }
 0xabe   : > { %6855 = vmatprep.subr.bf16.mxu1 %v11075_v2 }
 0xac1   : > { %6856 = vmatpush3.bf16.msra.mxu1 %v7571_v28 }
 0xac2   : > { %6909 = vmatprep.subr.bf16.mxu1 %v9627_v34 }
 0xad1   : > { %v6879_v14 = vpop.f32.mrf.mxu0 }
 0xad2   : > { %v9599_v18 = vadd.f32 %v6879_v14, %v9596_v15 }
 0xad3   : > { %v3459_v17 = vpop.f32.mrf.mxu0 }
 0xad4   : > { %v9604_v20 = vadd.f32 %v9596_v15, %v3459_v17 }
 0xad5   : > { %v6880_v19 = vpop.f32.mrf.mxu0 }
 0xad7   : > { %v3462_v22 = vpop.f32.mrf.mxu0 }
 0xad8   : > { %v9614_v3 = vadd.f32 %v9596_v15, %v3462_v22 }
 0xad9   : > { %v6883_v24 = vpop.f32.mrf.mxu0 }
 0xadb   : > { %v3475_v27 = vpop.f32.mrf.mxu0 }
 0xadd   : > { %v6884_v31 = vpop.f32.mrf.mxu0 }
 0xadf   : > { %v3478_v32 = vpop.f32.mrf.mxu0 }
 0xae1   : > { %v6887_v35 = vpop.f32.mrf.mxu0 }
 0xae2   : > { %v9663_v59 = vadd.f32 %v6887_v35, %v9596_v15 }
 0xae3   : > { %v3491_v37 = vpop.f32.mrf.mxu0 }
 0xae4   : > { %11298 = vst [vmem:[#allocation119_spill] sm:$0xff] %v9663_v59 }
 0xae5   : > { %v6888_v38 = vpop.f32.mrf.mxu0 }
 0xae7   : > { %v3494_v39 = vpop.f32.mrf.mxu0 }
 0xae9   : > { %v6891_v41 = vpop.f32.mrf.mxu0 }
 0xaea   : > { %v9631_v43 = vadd.f32 %v6891_v41, %v9596_v15 }
 0xaeb   : > { %v3507_v42 = vpop.f32.mrf.mxu0 }
 0xaec   : > { %11291 = vst [vmem:[#allocation112_spill] sm:$0xff] %v9631_v43 }
 0xaed   : > { %v6892_v45 = vpop.f32.mrf.mxu0 }
 0xaee   : > { %v9634_v49 = vadd.f32 %v6892_v45, %v9596_v15 }
 0xaef   : > { %v3510_v50 = vpop.f32.mrf.mxu0 }
 0xaf0   : > { %11292 = vst [vmem:[#allocation113_spill] sm:$0xff] %v9634_v49 }
 0xb3f   : > { %v3169_v52 = vpop.xlane.xlu0 %3168 }
 0xb40   : > { %v3173_v53 = vmul.f32 0.0078125, %v3169_v52  ;;  %v9637_v52 = vadd.f32 %v9596_v15, %v3507_v42  ;;  %v9690_v42 = vadd.f32 %v9596_v15, %v3494_v39 }
 0xb42   : > { %v9580_v54 = vsub.f32 %v3164_v21, %v3173_v53  ;;  %v9607_v21 = vadd.f32 %v6880_v19, %v9596_v15  ;;  %11293 = vst [vmem:[#allocation114_spill] sm:$0xff] %v9637_v52  ;;  %v9641_v53 = vpack.c.bf16 %v9634_v49, %v9631_v43  ;;  %v9666_v19 = vadd.f32 %v6888_v38, %v9596_v15 }
 0xb43   : > { %v3171_v56 = vpop.xlane.xlu1 %3170  ;;  %v9687_v38 = vadd.f32 %v9596_v15, %v3491_v37  ;;  %11302 = vst [vmem:[#allocation123_spill] sm:$0xff] %v9690_v42 }
 0xb44   : > { %v3174_v57 = vmul.f32 0.0078125, %v3171_v56  ;;  %v3177_v60 = vmul.f32 %v9580_v54, %v9580_v54  ;;  %v9611_v23 = vpack.c.bf16 %v9607_v21, %v9599_v18  ;;  %v9644_v56 = vadd.f32 %v9596_v15, %v3510_v50  ;;  %11299 = vst [vmem:[#allocation120_spill] sm:$0xff] %v9666_v19 }
 0xb45   : > { %v9683_v35 = vpack.c.bf16 %v9666_v19, %v9663_v59  ;;  %11301 = vst [vmem:[#allocation122_spill] sm:$0xff] %v9687_v38  ;;  %v9696_v50 = vpack.c.bf16 %v9690_v42, %v9687_v38 }
 0xb46   : > { %v9584_v62 = vsub.f32 %v3165_v10, %v3174_v57  ;;  %3179 = vadd.xlane.f32.xlu0 %v3177_v60  ;;  %v9620_v10 = vpack.c.bf16 %v9614_v3, %v9604_v20  ;;  %11294 = vst [vmem:[#allocation115_spill] sm:$0xff] %v9644_v56  ;;  %v6895_v57 = vpop.f32.mrf.mxu0  ;;  %v3842_v60 = vmul.bf16 %v9641_v53, %v9188_v4 }
 0xb47   : > { %v9653_v1 = vadd.f32 %v6895_v57, %v9596_v15  ;;  %v3840_v45 = vmul.bf16 %v9683_v35, %v9188_v4  ;;  %v9700_v57 = vadd.f32 %v6883_v24, %v9596_v15  ;;  %v3839_v37 = vmul.bf16 %v9696_v50, %v9188_v4 }
 0xb48   : > { %v3178_v63 = vmul.f32 %v9584_v62, %v9584_v62  ;;  %v3523_v47 = vpop.f32.mrf.mxu0  ;;  %6958 = vmatpush3.bf16.xpose.msra.mxu0 %v3842_v60  ;;  %v9703_v60 = vadd.f32 %v6884_v31, %v9596_v15 }
 0xb49   : > { %11295 = vst [vmem:[#allocation116_spill] sm:$0xff] %v9653_v1  ;;  %6959 = vmatprep.subr.bf16.mxu0 %v11075_v2  ;;  %v9657_v14 = vadd.f32 %v9596_v15, %v3523_v47  ;;  %11303 = vst [vmem:[#allocation124_spill] sm:$0xff] %v9700_v57  ;;  %v9713_v47 = vadd.f32 %v9596_v15, %v3475_v27  ;;  %v3836_v27 = vmul.bf16 %v9611_v23, %v9188_v4 }
 0xb4a   : > { %3181 = vadd.xlane.f32.xlu1 %v3178_v63  ;;  %v9650_v63 = vpack.c.bf16 %v9644_v56, %v9637_v52  ;;  %v6896_v6 = vpop.f32.mrf.mxu0  ;;  %11304 = vst [vmem:[#allocation125_spill] sm:$0xff] %v9703_v60  ;;  %v9709_v39 = vpack.c.bf16 %v9703_v60, %v9700_v57 }
 0xb4b   : > { %11296 = vst [vmem:[#allocation117_spill] sm:$0xff] %v9657_v14  ;;  %v9660_v17 = vadd.f32 %v6896_v6, %v9596_v15  ;;  %v9716_v6 = vadd.f32 %v9596_v15, %v3478_v32  ;;  %v3835_v32 = vmul.bf16 %v9620_v10, %v9188_v4 }
 0xb4c   : > { %v3526_v22 = vpop.f32.mrf.mxu0  ;;  %v3841_v5 = vmul.bf16 %v9650_v63, %v9188_v4  ;;  %v3838_v24 = vmul.bf16 %v9709_v39, %v9188_v4 }
 0xb4d   : > { %11297 = vst [vmem:[#allocation118_spill] sm:$0xff] %v9660_v17  ;;  %v9672_v25 = vpack.c.bf16 %v9660_v17, %v9653_v1  ;;  %v9675_v28 = vadd.f32 %v9596_v15, %v3526_v22  ;;  %v9722_v31 = vpack.c.bf16 %v9716_v6, %v9713_v47 }
 0xb4f   : > { %11300 = vst [vmem:[#allocation121_spill] sm:$0xff] %v9675_v28  ;;  %v9679_v41 = vpack.c.bf16 %v9675_v28, %v9657_v14  ;;  %v3837_v22 = vmul.bf16 %v9722_v31, %v9188_v4 }
 0xb50   : > { %6960 = vmatpush3.bf16.xpose.msra.mxu0 %v3841_v5 }
 0xb51   : > { %6961 = vmatprep.subr.bf16.mxu0 %v11075_v2 }
 0xb58   : > { %6962 = vmatpush3.bf16.xpose.msra.mxu0 %v3840_v45 }
 0xb59   : > { %6963 = vmatprep.subr.bf16.mxu0 %v11075_v2 }
 0xb60   : > { %6964 = vmatpush3.bf16.xpose.msra.mxu0 %v3839_v37 }
 0xb61   : > { %6965 = vmatprep.subr.bf16.mxu0 %v11075_v2 }
 0xb68   : > { %6966 = vmatpush3.bf16.xpose.msra.mxu0 %v3838_v24 }
 0xb69   : > { %6967 = vmatprep.subr.bf16.mxu0 %v11075_v2 }
 0xb70   : > { %6968 = vmatpush3.bf16.xpose.msra.mxu0 %v3837_v22 }
 0xb71   : > { %6969 = vmatprep.subr.bf16.mxu0 %v11075_v2 }
 0xb78   : > { %6970 = vmatpush3.bf16.xpose.msra.mxu0 %v3836_v27  ;;  %v9734_v27 = vpop.f32.mrf.mxu0 }
 0xb79   : > { %6971 = vmatprep.subr.bf16.mxu0 %v11075_v2 }
 0xb7a   : > { %v9736_v17 = vpop.f32.mrf.mxu0 }
 0xb7c   : > { %v9738_v1 = vpop.f32.mrf.mxu0 }
 0xb80   : > { %6972 = vmatpush3.bf16.xpose.msra.mxu0 %v3835_v32 }
 0xb81   : > { %6997 = vmatprep.subr.bf16.mxu0 %v11075_v2 }
 0xbcf   : > { %v3180_v5 = vpop.xlane.xlu0 %3179 }
 0xbd0   : > { %v3183_v45 = vmul.f32 0.0078125, %v3180_v5  ;;  %v6243_v5 = vld [vmem:[%s1785_s25] ss:$0 sm:$0xff] }
 0xbd2   : > { %v3185_v37 = vadd.f32 1e-05, %v3183_v45  ;;  %v9744_v45 = vpop.f32.mrf.mxu0 }
 0xbd3   : > { %v3182_v24 = vpop.xlane.xlu1 %3181 }
 0xbd4   : > { %7620 = vrsqrt.f32 %v3185_v37  ;;  %v3184_v22 = vmul.f32 0.0078125, %v3182_v24  ;;  %v6903_v14 = vpop.f32.mrf.mxu0 }
 0xbd6   : > { %v3186_v0 = vadd.f32 1e-05, %v3184_v22  ;;  %v3555_v56 = vpop.f32.mrf.mxu0 }
 0xbd8   : > { %7622 = vrsqrt.f32 %v3186_v0  ;;  %v6244_v0 = vld [vmem:[%s1788_s24] ss:$0 sm:$0xff] }
 0xbe1   : > { %v7621_v32 = vpop.eup %7620 }
 0xbe2   : > { %v3189_v2 = vmul.f32 %v7621_v32, %v9580_v54  ;;  %v7573_v32 = vld [vmem:[%s11290_s30 + $0x30] sm:$0xff]  }
 0xbe4   : > { %v3197_v24 = vmul.f32 %v6243_v5, %v3189_v2  ;;  %v7574_v2 = vld [vmem:[%s11290_s30 + $0x28] sm:$0xff]  }
 0xbe5   : > { %v7623_v28 = vpop.eup %7622 }
 0xbe6   : > { %v3190_v37 = vmul.f32 %v7623_v28, %v9584_v62  ;;  %v9750_v49 = vadd.f32 %v6244_v0, %v3197_v24  ;;  %v6904_v62 = vpop.f32.mrf.mxu0  ;;  %v7575_v28 = vld [vmem:[%s11290_s30 + $0x20] sm:$0xff]  }
 0xbe8   : > { %v3198_v22 = vmul.f32 %v6243_v5, %v3190_v37  ;;  %11307 = vst [vmem:[#allocation126_spill] sm:$0xff] %v9750_v49  ;;  %v3558_v5 = vpop.f32.mrf.mxu0  ;;  %v7576_v37 = vld [vmem:[%s11290_s30 + $0x18] sm:$0xff]  }
 0xbea   : > { %v9752_v43 = vadd.f32 %v6244_v0, %v3198_v22  ;;  %v6907_v24 = vpop.f32.mrf.mxu0  ;;  %v7577_v0 = vld [vmem:[%s11290_s30 + $0x10] sm:$0xff]  }
 0xbec   : > { %11308 = vst [vmem:[#allocation127_spill] sm:$0xff] %v9752_v43  ;;  %v3207_v54 = vpack.c.bf16 %v9752_v43, %v9750_v49  ;;  %v3571_v22 = vpop.f32.mrf.mxu0  ;;  %v3972_v49 = vmul.bf16 %v9611_v23, %v9198_v9 }
 0xbee   : > { %6858 = vmatmul.mubr.bf16.vlgmr.msra.gmra.mxu1 %v3207_v54  ;;  %v9765_v54 = vadd.f32 %v6907_v24, %v9596_v15 }
 0xbef   : > { %6910 = vmatpush3.bf16.msra.mxu1 %v9627_v34  ;;  %6925 = vmatprep.mubr.bf16.mxu1 %v9489_v44  ;;  %v7578_v44 = vld [vmem:[%s11290_s30 + $0x8] sm:$0xff]   ;;  %v6908_v34 = vpop.f32.mrf.mxu0 }
 0xbf0   : > { %6911 = vmatprep.subr.bf16.mxu1 %v7573_v32  ;;  %11309 = vst [vmem:[#allocation128_spill] sm:$0xff] %v9765_v54 }
 0xbf1   : > { %v3574_v43 = vpop.f32.mrf.mxu0 }
 0xbf3   : > { %6912 = vmatpush3.bf16.msra.mxu1 %v7573_v32  ;;  %v9768_v32 = vadd.f32 %v6908_v34, %v9596_v15  ;;  %v11313_v34 = vmov 0.0  }
 0xbf4   : > { %6913 = vmatprep.subr.bf16.mxu1 %v7574_v2 }
 0xbf5   : > { %11310 = vst [vmem:[#allocation129_spill] sm:$0xff] %v9768_v32 }
 0xbf7   : > { %6914 = vmatpush3.bf16.msra.mxu1 %v7574_v2  ;;  %v7579_v2 = vld [vmem:[%s11290_s30] sm:$0xff]  }
 0xbf8   : > { %6915 = vmatprep.subr.bf16.mxu1 %v7575_v28 }
 0xbfb   : > { %6916 = vmatpush3.bf16.msra.mxu1 %v7575_v28  ;;  %v9773_v28 = vpack.c.bf16 %v9768_v32, %v9765_v54 }
 0xbfc   : > { %6917 = vmatprep.subr.bf16.mxu1 %v7576_v37 }
 0xbfd   : > { %v3850_v24 = vmul.bf16 %v9773_v28, %v9188_v4 }
 0xbff   : > { %6918 = vmatpush3.bf16.msra.mxu1 %v7576_v37  ;;  %v9776_v37 = vadd.f32 %v9596_v15, %v3571_v22  ;;  %v9792_v22 = vadd.f32 %v6903_v14, %v9596_v15  ;;  %v9810_v14 = vadd.f32 %v9596_v15, %v3558_v5 }
 0xc00   : > { %6919 = vmatprep.subr.bf16.mxu1 %v7577_v0 }
 0xc01   : > { %11311 = vst [vmem:[#allocation130_spill] sm:$0xff] %v9776_v37  ;;  %11314 = vst [vmem:[#allocation132_spill] sm:$0xff] %v9792_v22 }
 0xc02   : > { %11317 = vst [vmem:[#allocation135_spill] sm:$0xff] %v9810_v14 }
 0xc03   : > { %6920 = vmatpush3.bf16.msra.mxu1 %v7577_v0  ;;  %v9781_v0 = vadd.f32 %v9596_v15, %v3574_v43 }
 0xc04   : > { %6921 = vmatprep.subr.bf16.mxu1 %v7578_v44 }
 0xc05   : > { %11312 = vst [vmem:[#allocation131_spill] sm:$0xff] %v9781_v0 }
 0xc07   : > { %6922 = vmatpush3.bf16.msra.mxu1 %v7578_v44  ;;  %v9787_v44 = vpack.c.bf16 %v9781_v0, %v9776_v37  ;;  %v9946_v0 = vld [vmem:[%s1772_s10] ss:$0 sm:$0xff]  ;;  %s11364_s10 = sld [smem:[#allocation109_spill]] }
 0xc08   : > { %6923 = vmatprep.subr.bf16.mxu1 %v7579_v2 }
 0xc09   : > { %v3849_v43 = vmul.bf16 %v9787_v44, %v9188_v4 }
 0xc0b   : > { %6924 = vmatpush3.bf16.msra.mxu1 %v7579_v2  ;;  %v9795_v2 = vadd.f32 %v6904_v62, %v9596_v15 }
 0xc0c   : > { %6977 = vmatprep.subr.bf16.mxu1 %v11313_v34 }
 0xc0d   : > { %11315 = vst [vmem:[#allocation133_spill] sm:$0xff] %v9795_v2 }
 0xc0e   : > { %6926 = vmatmul.mubr.bf16.vlgmr.msra.gmra.mxu1 %v9501_v58  ;;  %v9802_v58 = vpack.c.bf16 %v9795_v2, %v9792_v22 }
 0xc0f   : > { %6978 = vmatpush3.bf16.xpose.msra.mxu1 %v3850_v24  ;;  %6929 = vmatprep.mubr.bf16.mxu1 %v9503_v55  ;;  %v9807_v55 = vadd.f32 %v9596_v15, %v3555_v56  ;;  %v9827_v56 = vadd.f32 %v9738_v1, %v9596_v15  ;;  %v9844_v1 = vadd.f32 %v9596_v15, %v9744_v45 }
 0xc10   : > { %6979 = vmatprep.subr.bf16.mxu1 %v11313_v34  ;;  %v3848_v62 = vmul.bf16 %v9802_v58, %v9188_v4 }
 0xc11   : > { %11316 = vst [vmem:[#allocation134_spill] sm:$0xff] %v9807_v55  ;;  %11319 = vst [vmem:[#allocation137_spill] sm:$0xff] %v9827_v56 }
 0xc12   : > { %11321 = vst [vmem:[#allocation139_spill] sm:$0xff] %v9844_v1 }
 0xc16   : > { %6930 = vmatmul.mubr.bf16.gmra.mxu1 %v9512_v61  ;;  %v9817_v61 = vpack.c.bf16 %v9810_v14, %v9807_v55 }
 0xc17   : > { %6980 = vmatpush3.bf16.xpose.msra.mxu1 %v3849_v43  ;;  %6933 = vmatprep.mubr.bf16.mxu1 %v9514_v29  ;;  %v9823_v29 = vadd.f32 %v9734_v27, %v9596_v15 }
 0xc18   : > { %6981 = vmatprep.subr.bf16.mxu1 %v11313_v34 }
 0xc19   : > { %11318 = vst [vmem:[#allocation136_spill] sm:$0xff] %v9823_v29  ;;  %v9834_v5 = vpack.c.bf16 %v9827_v56, %v9823_v29 }
 0xc1e   : > { %6934 = vmatmul.mubr.bf16.gmra.mxu1 %v9522_v7  ;;  %v3847_v7 = vmul.bf16 %v9817_v61, %v9188_v4 }
 0xc1f   : > { %6982 = vmatpush3.bf16.xpose.msra.mxu1 %v3848_v62  ;;  %6937 = vmatprep.mubr.bf16.mxu1 %v9524_v13  ;;  %v9840_v13 = vadd.f32 %v9596_v15, %v9736_v17  ;;  %v3986_v62 = vmul.bf16 %v9773_v28, %v9198_v9 }
 0xc20   : > { %6983 = vmatprep.subr.bf16.mxu1 %v11313_v34 }
 0xc21   : > { %11320 = vst [vmem:[#allocation138_spill] sm:$0xff] %v9840_v13  ;;  %v9851_v27 = vpack.c.bf16 %v9844_v1, %v9840_v13 }
 0xc26   : > { %6938 = vmatmul.mubr.bf16.gmra.mxu1 %v9530_v16  ;;  %v3846_v16 = vmul.bf16 %v9834_v5, %v9188_v4 }
 0xc27   : > { %6984 = vmatpush3.bf16.xpose.msra.mxu1 %v3847_v7  ;;  %6941 = vmatprep.mubr.bf16.mxu1 %v9538_v26  ;;  %v3845_v26 = vmul.bf16 %v9851_v27, %v9188_v4  ;;  %v3977_v7 = vmul.bf16 %v9650_v63, %v9198_v9 }
 0xc28   : > { %6985 = vmatprep.subr.bf16.mxu1 %v11313_v34 }
 0xc2e   : > { %6942 = vmatmul.mubr.bf16.gmra.mxu1 %v9542_v30  ;;  %v3844_v30 = vmul.bf16 %v9672_v25, %v9188_v4 }
 0xc2f   : > { %6986 = vmatpush3.bf16.xpose.msra.mxu1 %v3846_v16  ;;  %6945 = vmatprep.mubr.bf16.mxu1 %v9548_v33  ;;  %v3843_v33 = vmul.bf16 %v9679_v41, %v9188_v4  ;;  %v3985_v16 = vmul.bf16 %v9787_v44, %v9198_v9 }
 0xc30   : > { %6987 = vmatprep.subr.bf16.mxu1 %v11313_v34 }
 0xc36   : > { %6946 = vmatmul.mubr.bf16.gmra.mxu1 %v9552_v36  ;;  %v6245_v36 = vld [vmem:[%s1766_s5] ss:$0 sm:$0xff] }
 0xc37   : > { %6988 = vmatpush3.bf16.xpose.msra.mxu1 %v3845_v26  ;;  %6949 = vmatprep.mubr.bf16.mxu1 %v9559_v40  ;;  %v3976_v26 = vmul.bf16 %v9683_v35, %v9198_v9 }
 0xc38   : > { %6989 = vmatprep.subr.bf16.mxu1 %v11313_v34 }
 0xc3e   : > { %6950 = vmatmul.mubr.bf16.gmra.mxu1 %v9566_v46 }
 0xc3f   : > { %6990 = vmatpush3.bf16.xpose.msra.mxu1 %v3844_v30  ;;  %6953 = vmatprep.mubr.bf16.mxu1 %v9568_v48  ;;  %v3984_v30 = vmul.bf16 %v9802_v58, %v9198_v9 }
 0xc40   : > { %6991 = vmatprep.subr.bf16.mxu1 %v11313_v34 }
 0xc46   : > { %6954 = vmatmul.mubr.bf16.gmra.mxu1 %v9575_v51  ;;  %v3978_v51 = vmul.bf16 %v9641_v53, %v9198_v9 }
 0xc47   : > { %6992 = vmatpush3.bf16.xpose.msra.mxu1 %v3843_v33  ;;  %6993 = vmatprep.mubr.msk.bf16.mxu1 %vm8391_vm9, %v11313_v34  ;;  %v3975_v33 = vmul.bf16 %v9696_v50, %v9198_v9 }
 0xc48   : > { %7017 = vmatprep.subr.bf16.mxu1 %v11313_v34 }
 0xcae   : > { %v3364_v40 = vpop.f32.mrf.mxu1 }
 0xcaf   : > { %v9874_v46 = vadd.f32 %v6245_v36, %v3364_v40 }
 0xcb0   : > { %v6859_v15 = vpop.f32.mrf.mxu1 }
 0xcb1   : > { %v9878_v48 = vpack.c.bf16 %v9874_v46, %v9874_v46 }
 0xcb2   : > { %v3367_v17 = vpop.f32.mrf.mxu1 }
 0xcb3   : > { %v9882_v45 = vadd.f32 %v6245_v36, %v3367_v17  ;;  %6974 = vmatmul.mubr.bf16.vlgmr.msra.gmra.mxu0 %v9878_v48  ;;  %v3983_v36 = vmul.bf16 %v9817_v61, %v9198_v9  ;;  %v3974_v17 = vmul.bf16 %v9709_v39, %v9198_v9 }
 0xcb4   : > { %6998 = vmatpush3.bf16.xpose.msra.mxu0 %v3978_v51  ;;  %v6860_v24 = vpop.f32.mrf.mxu1  ;;  %7013 = vmatprep.mubr.msk.bf16.mxu0 %vm8391_vm9, %v11313_v34 }
 0xcb5   : > { %v9889_v43 = vpack.c.bf16 %v9882_v45, %v9882_v45  ;;  %6999 = vmatprep.subr.bf16.mxu0 %v11313_v34 }
 0xcb7   : > { %6994 = vmatmul.mubr.bf16.vlgmr.msra.gmra.mxu1 %v9889_v43 }
 0xcb8   : > { %7018 = vmatpush3.bf16.xpose.msra.mxu1 %v3986_v62  ;;  %7033 = vmatprep.mubr.msk.bf16.mxu1 %vm8391_vm9, %v11313_v34  ;;  %v3982_v62 = vmul.bf16 %v9834_v5, %v9198_v9 }
 0xcb9   : > { %7019 = vmatprep.subr.bf16.mxu1 %v11313_v34 }
 0xcbc   : > { %7000 = vmatpush3.bf16.xpose.msra.mxu0 %v3977_v7 }
 0xcbd   : > { %7001 = vmatprep.subr.bf16.mxu0 %v11313_v34 }
 0xcc0   : > { %7020 = vmatpush3.bf16.xpose.msra.mxu1 %v3985_v16 }
 0xcc1   : > { %7021 = vmatprep.subr.bf16.mxu1 %v11313_v34 }
 0xcc4   : > { %7002 = vmatpush3.bf16.xpose.msra.mxu0 %v3976_v26  ;;  %v3973_v26 = vmul.bf16 %v9722_v31, %v9198_v9 }
 0xcc5   : > { %7003 = vmatprep.subr.bf16.mxu0 %v11313_v34 }
 0xcc8   : > { %7022 = vmatpush3.bf16.xpose.msra.mxu1 %v3984_v30 }
 0xcc9   : > { %7023 = vmatprep.subr.bf16.mxu1 %v11313_v34 }
 0xccc   : > { %7004 = vmatpush3.bf16.xpose.msra.mxu0 %v3975_v33 }
 0xccd   : > { %7005 = vmatprep.subr.bf16.mxu0 %v11313_v34 }
 0xcce   : > { %v9915_v40 = vpop.f32.mrf.mxu1 }
 0xccf   : > { %v10039_v59 = vadd.f32 %v9915_v40, %v9946_v0 }
 0xcd0   : > { %7024 = vmatpush3.bf16.xpose.msra.mxu1 %v3983_v36  ;;  %v9917_v15 = vpop.f32.mrf.mxu1  ;;  %v3981_v36 = vmul.bf16 %v9851_v27, %v9198_v9 }
 0xcd1   : > { %7025 = vmatprep.subr.bf16.mxu1 %v11313_v34  ;;  %11336 = vst [vmem:[#allocation152_spill] sm:$0xff] %v10039_v59  ;;  %v10054_v40 = vadd.f32 %v9946_v0, %v9917_v15 }
 0xcd2   : > { %v9922_v51 = vpop.f32.mrf.mxu1 }
 0xcd3   : > { %11338 = vst [vmem:[#allocation154_spill] sm:$0xff] %v10054_v40 }
 0xcd4   : > { %7006 = vmatpush3.bf16.xpose.msra.mxu0 %v3974_v17  ;;  %v9924_v24 = vpop.f32.mrf.mxu1 }
 0xcd5   : > { %7007 = vmatprep.subr.bf16.mxu0 %v11313_v34 }
 0xcd6   : > { %v6931_v7 = vpop.f32.mrf.mxu1 }
 0xcd8   : > { %7026 = vmatpush3.bf16.xpose.msra.mxu1 %v3982_v62  ;;  %v9929_v16 = vpop.f32.mrf.mxu1 }
 0xcd9   : > { %7027 = vmatprep.subr.bf16.mxu1 %v11313_v34 }
 0xcda   : > { %v6932_v30 = vpop.f32.mrf.mxu1 }
 0xcdc   : > { %7008 = vmatpush3.bf16.xpose.msra.mxu0 %v3973_v26  ;;  %v3693_v33 = vpop.f32.mrf.mxu1  ;;  %v3980_v26 = vmul.bf16 %v9672_v25, %v9198_v9 }
 0xcdd   : > { %7009 = vmatprep.subr.bf16.mxu0 %v11313_v34 }
 0xcde   : > { %v6935_v17 = vpop.f32.mrf.mxu1 }
 0xce0   : > { %7028 = vmatpush3.bf16.xpose.msra.mxu1 %v3981_v36  ;;  %v3706_v62 = vpop.f32.mrf.mxu1 }
 0xce1   : > { %7029 = vmatprep.subr.bf16.mxu1 %v11313_v34 }
 0xce2   : > { %v6936_v32 = vpop.f32.mrf.mxu1 }
 0xce4   : > { %7010 = vmatpush3.bf16.xpose.msra.mxu0 %v3972_v49  ;;  %v3709_v54 = vpop.f32.mrf.mxu1  ;;  %v3971_v49 = vmul.bf16 %v9620_v10, %v9198_v9 }
 0xce5   : > { %7011 = vmatprep.subr.bf16.mxu0 %v11313_v34 }
 0xce6   : > { %v6939_v37 = vpop.f32.mrf.mxu1 }
 0xce7   : > { %v9950_v2 = vadd.f32 %v6939_v37, %v9946_v0  ;;  %v3979_v37 = vmul.bf16 %v9679_v41, %v9198_v9 }
 0xce8   : > { %7030 = vmatpush3.bf16.xpose.msra.mxu1 %v3980_v26  ;;  %v3722_v36 = vpop.f32.mrf.mxu1 }
 0xce9   : > { %7031 = vmatprep.subr.bf16.mxu1 %v11313_v34  ;;  %11324 = vst [vmem:[#allocation140_spill] sm:$0xff] %v9950_v2  ;;  %v9958_v55 = vadd.f32 %v9946_v0, %v3722_v36  ;;  %v9976_v36 = vadd.f32 %v6936_v32, %v9946_v0 }
 0xcea   : > { %v6940_v22 = vpop.f32.mrf.mxu1 }
 0xceb   : > { %v9955_v14 = vadd.f32 %v6940_v22, %v9946_v0  ;;  %11326 = vst [vmem:[#allocation142_spill] sm:$0xff] %v9958_v55  ;;  %v9973_v22 = vadd.f32 %v6935_v17, %v9946_v0  ;;  %11329 = vst [vmem:[#allocation145_spill] sm:$0xff] %v9976_v36  ;;  %v9991_v17 = vadd.f32 %v9946_v0, %v3706_v62 }
 0xcec   : > { %7012 = vmatpush3.bf16.xpose.msra.mxu0 %v3971_v49  ;;  %v3725_v56 = vpop.f32.mrf.mxu1 }
 0xced   : > { %11325 = vst [vmem:[#allocation141_spill] sm:$0xff] %v9955_v14  ;;  %v9962_v26 = vpack.c.bf16 %v9955_v14, %v9950_v2  ;;  %v9965_v29 = vadd.f32 %v9946_v0, %v3725_v56  ;;  %7037 = vmatprep.subr.bf16.mxu0 %v11313_v34  ;;  %11328 = vst [vmem:[#allocation144_spill] sm:$0xff] %v9973_v22  ;;  %v9995_v32 = vpack.c.bf16 %v9976_v36, %v9973_v22 }
 0xcee   : > { %v9970_v1 = vpop.f32.mrf.mxu1  ;;  %11330 = vst [vmem:[#allocation146_spill] sm:$0xff] %v9991_v17  ;;  %v10009_v36 = vadd.f32 %v6931_v7, %v9946_v0  ;;  %v10025_v7 = vadd.f32 %v9946_v0, %v9929_v16  ;;  %v10043_v16 = vadd.f32 %v9922_v51, %v9946_v0 }
 0xcef   : > { %11327 = vst [vmem:[#allocation143_spill] sm:$0xff] %v9965_v29  ;;  %v9980_v49 = vpack.c.bf16 %v9965_v29, %v9958_v55  ;;  %v4098_v14 = vmul.bf16 %v9962_v26, %v9198_v9  ;;  %v4096_v13 = vmul.bf16 %v9995_v32, %v9198_v9 }
 0xcf0   : > { %7032 = vmatpush3.bf16.xpose.msra.mxu1 %v3979_v37  ;;  %v9982_v56 = vpop.f32.mrf.mxu1  ;;  %v9998_v37 = vadd.f32 %v9946_v0, %v3709_v54  ;;  %11332 = vst [vmem:[#allocation148_spill] sm:$0xff] %v10009_v36  ;;  %v10012_v54 = vadd.f32 %v6932_v30, %v9946_v0  ;;  %11334 = vst [vmem:[#allocation150_spill] sm:$0xff] %v10025_v7  ;;  %v10058_v51 = vpack.c.bf16 %v10043_v16, %v10039_v59 }
 0xcf1   : > { %7057 = vmatprep.subr.bf16.mxu1 %v11313_v34  ;;  %v4097_v55 = vmul.bf16 %v9980_v49, %v9198_v9  ;;  %11337 = vst [vmem:[#allocation153_spill] sm:$0xff] %v10043_v16 }
 0xcf2   : > { %v9987_v2 = vpop.f32.mrf.mxu1  ;;  %11331 = vst [vmem:[#allocation147_spill] sm:$0xff] %v9998_v37  ;;  %11333 = vst [vmem:[#allocation149_spill] sm:$0xff] %v10012_v54  ;;  %v10029_v30 = vpack.c.bf16 %v10012_v54, %v10009_v36  ;;  %v4092_v16 = vmul.bf16 %v10058_v51, %v9198_v9 }
 0xcf3   : > { %7014 = vmatmul.mubr.bf16.vlgmr.msra.gmra.mxu0 %v9878_v48 }
 0xcf4   : > { %7038 = vmatpush3.bf16.msra.mxu0 %v4098_v14  ;;  %v10000_v29 = vpop.f32.mrf.mxu1  ;;  %7053 = vmatprep.mubr.msk.bf16.mxu0 %vm8391_vm9, %v11313_v34  ;;  %v10016_v14 = vpack.c.bf16 %v9998_v37, %v9991_v17  ;;  %v4094_v54 = vmul.bf16 %v10029_v30, %v9198_v9 }
 0xcf5   : > { %7039 = vmatprep.subr.bf16.mxu0 %v11313_v34 }
 0xcf6   : > { %v6947_v62 = vpop.f32.mrf.mxu1  ;;  %v4095_v17 = vmul.bf16 %v10016_v14, %v9198_v9 }
 0xcf7   : > { %7034 = vmatmul.mubr.bf16.vlgmr.msra.gmra.mxu1 %v9889_v43 }
 0xcf8   : > { %7040 = vmatpush3.bf16.msra.mxu0 %v4097_v55  ;;  %v3754_v22 = vpop.f32.mrf.mxu1  ;;  %7073 = vmatprep.mubr.msk.bf16.mxu1 %vm8391_vm9, %v11313_v34  ;;  %v10032_v55 = vadd.f32 %v9946_v0, %v3693_v33 }
 0xcf9   : > { %7041 = vmatprep.subr.bf16.mxu0 %v11313_v34 }
 0xcfa   : > { %v6948_v52 = vpop.f32.mrf.mxu1  ;;  %11335 = vst [vmem:[#allocation151_spill] sm:$0xff] %v10032_v55  ;;  %v10047_v33 = vpack.c.bf16 %v10032_v55, %v10025_v7  ;;  %v10062_v55 = vadd.f32 %v9946_v0, %v9924_v24 }
 0xcfc   : > { %7042 = vmatpush3.bf16.msra.mxu0 %v4096_v13  ;;  %v3757_v37 = vpop.f32.mrf.mxu1  ;;  %11339 = vst [vmem:[#allocation155_spill] sm:$0xff] %v10062_v55  ;;  %v4093_v7 = vmul.bf16 %v10047_v33, %v9198_v9  ;;  %v10069_v15 = vpack.c.bf16 %v10062_v55, %v10054_v40 }
 0xcfd   : > { %7043 = vmatprep.subr.bf16.mxu0 %v11313_v34 }
 0xcfe   : > { %v6951_v19 = vpop.f32.mrf.mxu1 }
 0xcff   : > { %v10086_v40 = vadd.f32 %v6951_v19, %v9946_v0 }
 0xd00   : > { %7044 = vmatpush3.bf16.msra.mxu0 %v4095_v17  ;;  %v3770_v13 = vpop.f32.mrf.mxu1 }
 0xd01   : > { %7045 = vmatprep.subr.bf16.mxu0 %v11313_v34  ;;  %11343 = vst [vmem:[#allocation159_spill] sm:$0xff] %v10086_v40 }
 0xd02   : > { %v6952_v36 = vpop.f32.mrf.mxu1 }
 0xd04   : > { %7046 = vmatpush3.bf16.msra.mxu0 %v4094_v54  ;;  %v3773_v17 = vpop.f32.mrf.mxu1 }
 0xd05   : > { %7047 = vmatprep.subr.bf16.mxu0 %v11313_v34 }
 0xd06   : > { %v6955_v42 = vpop.f32.mrf.mxu1 }
 0xd07   : > { %v10074_v24 = vadd.f32 %v6955_v42, %v9946_v0  ;;  %v10089_v42 = vadd.f32 %v6952_v36, %v9946_v0 }
 0xd08   : > { %7048 = vmatpush3.bf16.msra.mxu0 %v4093_v7  ;;  %v3786_v38 = vpop.f32.mrf.mxu1  ;;  %v4091_v7 = vmul.bf16 %v10069_v15, %v9198_v9 }
 0xd09   : > { %11340 = vst [vmem:[#allocation156_spill] sm:$0xff] %v10074_v24  ;;  %7049 = vmatprep.subr.bf16.mxu0 %v11313_v34  ;;  %v10078_v59 = vadd.f32 %v9946_v0, %v3786_v38  ;;  %11344 = vst [vmem:[#allocation160_spill] sm:$0xff] %v10089_v42  ;;  %v10110_v36 = vpack.c.bf16 %v10089_v42, %v10086_v40 }
 0xd0a   : > { %v6956_v54 = vpop.f32.mrf.mxu1 }
 0xd0b   : > { %11341 = vst [vmem:[#allocation157_spill] sm:$0xff] %v10078_v59  ;;  %v10081_v60 = vadd.f32 %v6956_v54, %v9946_v0  ;;  %v10106_v54 = vadd.f32 %v9946_v0, %v3770_v13  ;;  %v10123_v13 = vadd.f32 %v6948_v52, %v9946_v0  ;;  %v10140_v52 = vadd.f32 %v9946_v0, %v3757_v37 }
 0xd0c   : > { %7050 = vmatpush3.bf16.msra.mxu0 %v4092_v16  ;;  %v3789_v55 = vpop.f32.mrf.mxu1 }
 0xd0d   : > { %11342 = vst [vmem:[#allocation158_spill] sm:$0xff] %v10081_v60  ;;  %v10093_v57 = vpack.c.bf16 %v10081_v60, %v10074_v24  ;;  %7051 = vmatprep.subr.bf16.mxu0 %v11313_v34  ;;  %v10097_v38 = vadd.f32 %v9946_v0, %v3789_v55  ;;  %11346 = vst [vmem:[#allocation162_spill] sm:$0xff] %v10106_v54  ;;  %v10113_v60 = vadd.f32 %v9946_v0, %v3773_v17 }
 0xd0e   : > { %v10120_v24 = vadd.f32 %v6947_v62, %v9946_v0  ;;  %11349 = vst [vmem:[#allocation165_spill] sm:$0xff] %v10123_v13  ;;  %v4104_v17 = vmul.bf16 %v10110_v36, %v9198_v9  ;;  %11351 = vst [vmem:[#allocation167_spill] sm:$0xff] %v10140_v52 }
 0xd0f   : > { %11345 = vst [vmem:[#allocation161_spill] sm:$0xff] %v10097_v38  ;;  %v10101_v16 = vpack.c.bf16 %v10097_v38, %v10078_v59  ;;  %v4106_v19 = vmul.bf16 %v10093_v57, %v9198_v9  ;;  %11347 = vst [vmem:[#allocation163_spill] sm:$0xff] %v10113_v60 }
 0xd10   : > { %7052 = vmatpush3.bf16.msra.mxu0 %v4091_v7  ;;  %11348 = vst [vmem:[#allocation164_spill] sm:$0xff] %v10120_v24  ;;  %v10127_v7 = vpack.c.bf16 %v10113_v60, %v10106_v54  ;;  %v10137_v62 = vpack.c.bf16 %v10123_v13, %v10120_v24 }
 0xd11   : > { %7058 = vmatpush3.bf16.msra.mxu1 %v4106_v19  ;;  %v4105_v55 = vmul.bf16 %v10101_v16, %v9198_v9  ;;  %7077 = vmatprep.subr.bf16.mxu0 %v11313_v34  ;;  %v10133_v19 = vadd.f32 %v9946_v0, %v3754_v22  ;;  %v10151_v22 = vadd.f32 %v9987_v2, %v9946_v0 }
 0xd12   : > { %7059 = vmatprep.subr.bf16.mxu1 %v11313_v34  ;;  %v4103_v38 = vmul.bf16 %v10127_v7, %v9198_v9  ;;  %v4102_v37 = vmul.bf16 %v10137_v62, %v9198_v9  ;;  %v10170_v2 = vadd.f32 %v9946_v0, %v10000_v29 }
 0xd13   : > { %11350 = vst [vmem:[#allocation166_spill] sm:$0xff] %v10133_v19  ;;  %11353 = vst [vmem:[#allocation169_spill] sm:$0xff] %v10151_v22  ;;  %v10155_v59 = vpack.c.bf16 %v10140_v52, %v10133_v19 }
 0xd14   : > { %11355 = vst [vmem:[#allocation171_spill] sm:$0xff] %v10170_v2 }
 0xd15   : > { %7060 = vmatpush3.bf16.msra.mxu1 %v4105_v55  ;;  %v10147_v55 = vadd.f32 %v9970_v1, %v9946_v0 }
 0xd16   : > { %7061 = vmatprep.subr.bf16.mxu1 %v11313_v34 }
 0xd17   : > { %11352 = vst [vmem:[#allocation168_spill] sm:$0xff] %v10147_v55  ;;  %v10166_v1 = vpack.c.bf16 %v10151_v22, %v10147_v55 }
 0xd19   : > { %7062 = vmatpush3.bf16.msra.mxu1 %v4104_v17  ;;  %v10162_v17 = vadd.f32 %v9946_v0, %v9982_v56  ;;  %v4100_v56 = vmul.bf16 %v10166_v1, %v9198_v9 }
 0xd1a   : > { %7063 = vmatprep.subr.bf16.mxu1 %v11313_v34 }
 0xd1b   : > { %11354 = vst [vmem:[#allocation170_spill] sm:$0xff] %v10162_v17  ;;  %v10177_v42 = vpack.c.bf16 %v10170_v2, %v10162_v17 }
 0xd1d   : > { %7064 = vmatpush3.bf16.msra.mxu1 %v4103_v38  ;;  %v4101_v38 = vmul.bf16 %v10155_v59, %v9198_v9  ;;  %v4099_v0 = vmul.bf16 %v10177_v42, %v9198_v9 }
 0xd1e   : > { %7065 = vmatprep.subr.bf16.mxu1 %v11313_v34 }
 0xd21   : > { %7066 = vmatpush3.bf16.msra.mxu1 %v4102_v37 }
 0xd22   : > { %7067 = vmatprep.subr.bf16.mxu1 %v11313_v34 }
 0xd25   : > { %7068 = vmatpush3.bf16.msra.mxu1 %v4101_v38 }
 0xd26   : > { %7069 = vmatprep.subr.bf16.mxu1 %v11313_v34 }
 0xd29   : > { %7070 = vmatpush3.bf16.msra.mxu1 %v4100_v56 }
 0xd2a   : > { %7071 = vmatprep.subr.bf16.mxu1 %v11313_v34 }
 0xd2d   : > { %7072 = vmatpush3.bf16.msra.mxu1 %v4099_v0 }
 0xd2e   : > { %7097 = vmatprep.subr.bf16.mxu1 %v11313_v34 }
 0xd73   : > { %v3885_v29 = vpop.f32.mrf.mxu0 }
 0xd74   : > { %v3931_v56 = vmul.f32 0.17677669, %v3885_v29 }
 0xd75   : > { %v6975_v37 = vpop.f32.mrf.mxu0 }
 0xd77   : > { %v3888_v40 = vpop.f32.mrf.mxu0  ;;  %v3925_v60 = vpop.f32.mrf.mxu1 }
 0xd78   : > { %v10191_v40 = vadd.f32 %v3931_v56, %v9192_v8 }
 0xd79   : > { %v6976_v54 = vpop.f32.mrf.mxu0  ;;  %v6995_v38 = vpop.f32.mrf.mxu1 }
 0xd7a   : > { %11357 = vst [vmem:[#allocation173_spill] sm:$0xff] %v10191_v40  ;;  %v3932_v54 = vmul.f32 0.17677669, %v3925_v60 }
 0xd7b   : > { %v3928_v13 = vpop.f32.mrf.mxu1 }
 0xd7d   : > { %v6996_v24 = vpop.f32.mrf.mxu1 }
 0xdb3   : > { %v4021_v52 = vpop.f32.mrf.mxu0 }
 0xdb4   : > { %v4067_v19 = vmul.f32 0.17677669, %v4021_v52  ;;  %v10199_v52 = vadd.f32 %v3932_v54, %v9192_v8 }
 0xdb5   : > { %v7015_v22 = vpop.f32.mrf.mxu0 }
 0xdb6   : > { %v10187_v55 = vadd.f32 %v4067_v19, %v9192_v8  ;;  %11359 = vst [vmem:[#allocation175_spill] sm:$0xff] %v10199_v52 }
 0xdb7   : > { %v4024_v9 = vpop.f32.mrf.mxu0  ;;  %v4061_v2 = vpop.f32.mrf.mxu1 }
 0xdb8   : > { %11356 = vst [vmem:[#allocation172_spill] sm:$0xff] %v10187_v55  ;;  %v4068_v0 = vmul.f32 0.17677669, %v4061_v2  ;;  %4071 = vmax.xlane.f32.xlu0 %v10187_v55 }
 0xdb9   : > { %v7016_v17 = vpop.f32.mrf.mxu0  ;;  %v7035_v37 = vpop.f32.mrf.mxu1 }
 0xdba   : > { %v10194_v24 = vadd.f32 %v4068_v0, %v9192_v8 }
 0xdbb   : > { %v4064_v13 = vpop.f32.mrf.mxu1 }
 0xdbc   : > { %11358 = vst [vmem:[#allocation174_spill] sm:$0xff] %v10194_v24  ;;  %4073 = vmax.xlane.f32.xlu1 %v10194_v24  ;;  %3935 = vmax.xlane.f32.xlu0 %v10191_v40 }
 0xdbd   : > { %v7036_v19 = vpop.f32.mrf.mxu1 }
 0xdc0   : > { %3937 = vmax.xlane.f32.xlu1 %v10199_v52 }
 0xe41   : > { %v4072_v22 = vpop.xlane.xlu0 %4071 }
 0xe42   : > { %v4075_v17 = vsub.f32 %v10187_v55, %v4072_v22 }
 0xe44   : > { %v4077_v2 = vmul.f32 1.442695, %v4075_v17 }
 0xe45   : > { %v4074_v29 = vpop.xlane.xlu1 %4073  ;;  %v3936_v60 = vpop.xlane.xlu0 %3935 }
 0xe46   : > { %7624 = vpow2.f32 %v4077_v2  ;;  %v4076_v38 = vsub.f32 %v10194_v24, %v4074_v29  ;;  %v3939_v56 = vsub.f32 %v10191_v40, %v3936_v60 }
 0xe48   : > { %v4079_v9 = vmul.f32 1.442695, %v4076_v38  ;;  %v3941_v0 = vmul.f32 1.442695, %v3939_v56 }
 0xe49   : > { %v3938_v37 = vpop.xlane.xlu1 %3937 }
 0xe4a   : > { %7626 = vpow2.f32 %v4079_v9  ;;  %v3940_v54 = vsub.f32 %v10199_v52, %v3938_v37  ;;  %v3962_v37 = vmul.bf16 %v9962_v26, %v9188_v4 }
 0xe4b   : > { %7628 = vpow2.f32 %v3941_v0 }
 0xe4c   : > { %v3943_v13 = vmul.f32 1.442695, %v3940_v54 }
 0xe4e   : > { %7630 = vpow2.f32 %v3943_v13 }
 0xe53   : > { %v7625_v19 = vpop.eup %7624 }
 0xe54   : > { %4081 = vadd.xlane.f32.xlu0 %v7625_v19 }
 0xe57   : > { %v7627_v22 = vpop.eup %7626 }
 0xe58   : > { %v10206_v17 = vpop.eup %7628  ;;  %4083 = vadd.xlane.f32.xlu1 %v7627_v22 }
 0xe59   : > { %3945 = vadd.xlane.f32.xlu0 %v10206_v17 }
 0xe5b   : > { %v10209_v2 = vpop.eup %7630 }
 0xe5c   : > { %3947 = vadd.xlane.f32.xlu1 %v10209_v2 }
 0xedd   : > { %v4082_v29 = vpop.xlane.xlu0 %4081 }
 0xede   : > { %7632 = vrcp.f32 %v4082_v29  ;;  %v3970_v29 = vmul.bf16 %v10093_v57, %v9188_v4 }
 0xee1   : > { %v4084_v60 = vpop.xlane.xlu1 %4083 }
 0xee2   : > { %7634 = vrcp.f32 %v4084_v60  ;;  %v3960_v60 = vmul.bf16 %v9995_v32, %v9188_v4 }
 0xeeb   : > { %v7633_v38 = vpop.eup %7632 }
 0xeec   : > { %v10212_v56 = vmul.f32 %v7633_v38, %v7625_v19  ;;  %v3961_v19 = vmul.bf16 %v9980_v49, %v9188_v4  ;;  %v3969_v38 = vmul.bf16 %v10101_v16, %v9188_v4 }
 0xeee   : > { %11360 = vst [vmem:[#allocation176_spill] sm:$0xff] %v10212_v56  ;;  %v4089_v9 = vpack.c.bf16 %v10212_v56, %v10212_v56 }
 0xeef   : > { %v7635_v0 = vpop.eup %7634 }
 0xef0   : > { %7054 = vmatmul.mubr.bf16.vlgmr.msra.gmra.mxu0 %v4089_v9  ;;  %v10218_v54 = vmul.f32 %v7635_v0, %v7627_v22  ;;  %v3946_v22 = vpop.xlane.xlu0 %3945  ;;  %v3948_v9 = vpop.xlane.xlu1 %3947  ;;  %v3959_v0 = vmul.bf16 %v10016_v14, %v9188_v4 }
 0xef1   : > { %7078 = vmatpush3.bf16.msra.mxu0 %v3962_v37  ;;  %7093 = vmatprep.mubr.msk.bf16.mxu0 %vm8391_vm9, %v11313_v34  ;;  %7636 = vrcp.f32 %v3946_v22  ;;  %v3968_v37 = vmul.bf16 %v10110_v36, %v9188_v4  ;;  %v3966_v22 = vmul.bf16 %v10137_v62, %v9188_v4 }
 0xef2   : > { %11361 = vst [vmem:[#allocation177_spill] sm:$0xff] %v10218_v54  ;;  %7079 = vmatprep.subr.bf16.mxu0 %v11313_v34  ;;  %v4090_v13 = vpack.c.bf16 %v10218_v54, %v10218_v54  ;;  %7638 = vrcp.f32 %v3948_v9  ;;  %v3965_v9 = vmul.bf16 %v10155_v59, %v9188_v4 }
 0xef4   : > { %7074 = vmatmul.mubr.bf16.vlgmr.msra.gmra.mxu1 %v4090_v13  ;;  %v3958_v13 = vmul.bf16 %v10029_v30, %v9188_v4 }
 0xef5   : > { %7080 = vmatpush3.bf16.msra.mxu0 %v3961_v19  ;;  %7098 = vmatpush3.bf16.msra.mxu1 %v3970_v29  ;;  %v3967_v19 = vmul.bf16 %v10127_v7, %v9188_v4  ;;  %v3957_v29 = vmul.bf16 %v10047_v33, %v9188_v4 }
 0xef6   : > { %7081 = vmatprep.subr.bf16.mxu0 %v11313_v34  ;;  %7099 = vmatprep.subr.bf16.mxu1 %v11313_v34 }
 0xef7   : > { %7113 = vmatprep.mubr.msk.bf16.mxu1 %vm8391_vm9, %v11313_v34 }
 0xef9   : > { %7082 = vmatpush3.bf16.msra.mxu0 %v3960_v60  ;;  %7100 = vmatpush3.bf16.msra.mxu1 %v3969_v38  ;;  %v3956_v38 = vmul.bf16 %v10058_v51, %v9188_v4 }
 0xefa   : > { %7083 = vmatprep.subr.bf16.mxu0 %v11313_v34  ;;  %7101 = vmatprep.subr.bf16.mxu1 %v11313_v34 }
 0xefd   : > { %7084 = vmatpush3.bf16.msra.mxu0 %v3959_v0  ;;  %7102 = vmatpush3.bf16.msra.mxu1 %v3968_v37 }
 0xefe   : > { %7085 = vmatprep.subr.bf16.mxu0 %v11313_v34  ;;  %7103 = vmatprep.subr.bf16.mxu1 %v11313_v34  ;;  %v7637_v60 = vpop.eup %7636 }
 0xeff   : > { %v10264_v0 = vmul.f32 %v7637_v60, %v10206_v17  ;;  %v7639_v37 = vpop.eup %7638  ;;  %v3963_v17 = vmul.bf16 %v10177_v42, %v9188_v4  ;;  %v4274_v60 = vmul.bf16 %v9641_v53, %v9207_v12 }
 0xf01   : > { %7086 = vmatpush3.bf16.msra.mxu0 %v3958_v13  ;;  %7104 = vmatpush3.bf16.msra.mxu1 %v3967_v19  ;;  %11362 = vst [vmem:[#allocation178_spill] sm:$0xff] %v10264_v0  ;;  %v3955_v13 = vmul.bf16 %v10069_v15, %v9188_v4  ;;  %v3964_v19 = vmul.bf16 %v10166_v1, %v9188_v4 }
 0xf02   : > { %7087 = vmatprep.subr.bf16.mxu0 %v11313_v34  ;;  %7105 = vmatprep.subr.bf16.mxu1 %v11313_v34  ;;  %v4273_v4 = vmul.bf16 %v9650_v63, %v9207_v12 }
 0xf05   : > { %7088 = vmatpush3.bf16.msra.mxu0 %v3957_v29  ;;  %7106 = vmatpush3.bf16.msra.mxu1 %v3966_v22  ;;  %v3953_v29 = vpack.c.bf16 %v10264_v0, %v10264_v0  ;;  %v10275_v22 = vmul.f32 %v7639_v37, %v10209_v2  ;;  %v4282_v2 = vmul.bf16 %v9773_v28, %v9207_v12 }
 0xf06   : > { %7089 = vmatprep.subr.bf16.mxu0 %v11313_v34  ;;  %7107 = vmatprep.subr.bf16.mxu1 %v11313_v34  ;;  %v4272_v37 = vmul.bf16 %v9683_v35, %v9207_v12 }
 0xf07   : > { %11363 = vst [vmem:[#allocation179_spill] sm:$0xff] %v10275_v22 }
 0xf09   : > { %7090 = vmatpush3.bf16.msra.mxu0 %v3956_v38  ;;  %7108 = vmatpush3.bf16.msra.mxu1 %v3965_v9  ;;  %v3954_v38 = vpack.c.bf16 %v10275_v22, %v10275_v22  ;;  %v4281_v9 = vmul.bf16 %v9787_v44, %v9207_v12 }
 0xf0a   : > { %7091 = vmatprep.subr.bf16.mxu0 %v11313_v34  ;;  %7109 = vmatprep.subr.bf16.mxu1 %v11313_v34 }
 0xf0d   : > { %7092 = vmatpush3.bf16.msra.mxu0 %v3955_v13  ;;  %7110 = vmatpush3.bf16.msra.mxu1 %v3964_v19  ;;  %v4280_v13 = vmul.bf16 %v9802_v58, %v9207_v12  ;;  %v4271_v19 = vmul.bf16 %v9696_v50, %v9207_v12 }
 0xf0e   : > { %7111 = vmatprep.subr.bf16.mxu1 %v11313_v34  ;;  %7117 = vmatprep.subr.bf16.mxu0 %v11313_v34 }
 0xf10   : > { %7094 = vmatmul.mubr.bf16.vlgmr.msra.gmra.mxu0 %v3953_v29  ;;  %v4279_v29 = vmul.bf16 %v9817_v61, %v9207_v12 }
 0xf11   : > { %7112 = vmatpush3.bf16.msra.mxu1 %v3963_v17  ;;  %7118 = vmatpush3.bf16.xpose.msra.mxu0 %v4274_v60  ;;  %v4270_v17 = vmul.bf16 %v9709_v39, %v9207_v12  ;;  %v4278_v60 = vmul.bf16 %v9834_v5, %v9207_v12 }
 0xf12   : > { %7137 = vmatprep.subr.bf16.mxu1 %v11313_v34  ;;  %7119 = vmatprep.subr.bf16.mxu0 %v11313_v34 }
 0xf13   : > { %7133 = vmatprep.mubr.msk.bf16.mxu0 %vm8391_vm9, %v11313_v34 }
 0xf14   : > { %7114 = vmatmul.mubr.bf16.vlgmr.msra.gmra.mxu1 %v3954_v38  ;;  %v4269_v38 = vmul.bf16 %v9722_v31, %v9207_v12 }
 0xf15   : > { %7138 = vmatpush3.bf16.xpose.msra.mxu1 %v4282_v2  ;;  %7153 = vmatprep.mubr.msk.bf16.mxu1 %vm8391_vm9, %v11313_v34  ;;  %v4277_v2 = vmul.bf16 %v9851_v27, %v9207_v12 }
 0xf16   : > { %7139 = vmatprep.subr.bf16.mxu1 %v11313_v34 }
 0xf19   : > { %7120 = vmatpush3.bf16.xpose.msra.mxu0 %v4273_v4  ;;  %v4268_v4 = vmul.bf16 %v9611_v23, %v9207_v12 }
 0xf1a   : > { %7121 = vmatprep.subr.bf16.mxu0 %v11313_v34 }
 0xf1d   : > { %7140 = vmatpush3.bf16.xpose.msra.mxu1 %v4281_v9  ;;  %v4276_v9 = vmul.bf16 %v9672_v25, %v9207_v12 }
 0xf1e   : > { %7141 = vmatprep.subr.bf16.mxu1 %v11313_v34 }
 0xf21   : > { %7122 = vmatpush3.bf16.xpose.msra.mxu0 %v4272_v37  ;;  %v4267_v37 = vmul.bf16 %v9620_v10, %v9207_v12 }
 0xf22   : > { %7123 = vmatprep.subr.bf16.mxu0 %v11313_v34 }
 0xf25   : > { %7142 = vmatpush3.bf16.xpose.msra.mxu1 %v4280_v13  ;;  %v4275_v13 = vmul.bf16 %v9679_v41, %v9207_v12 }
 0xf26   : > { %7143 = vmatprep.subr.bf16.mxu1 %v11313_v34 }
 0xf29   : > { %7124 = vmatpush3.bf16.xpose.msra.mxu0 %v4271_v19  ;;  %v4394_v19 = vmul.bf16 %v9962_v26, %v9207_v12 }
 0xf2a   : > { %7125 = vmatprep.subr.bf16.mxu0 %v11313_v34 }
 0xf2d   : > { %7144 = vmatpush3.bf16.xpose.msra.mxu1 %v4279_v29  ;;  %v4393_v29 = vmul.bf16 %v9980_v49, %v9207_v12 }
 0xf2e   : > { %7145 = vmatprep.subr.bf16.mxu1 %v11313_v34 }
 0xf31   : > { %7126 = vmatpush3.bf16.xpose.msra.mxu0 %v4270_v17  ;;  %v4402_v17 = vmul.bf16 %v10093_v57, %v9207_v12 }
 0xf32   : > { %7127 = vmatprep.subr.bf16.mxu0 %v11313_v34 }
 0xf35   : > { %7146 = vmatpush3.bf16.xpose.msra.mxu1 %v4278_v60  ;;  %v4392_v60 = vmul.bf16 %v9995_v32, %v9207_v12 }
 0xf36   : > { %7147 = vmatprep.subr.bf16.mxu1 %v11313_v34 }
 0xf39   : > { %7128 = vmatpush3.bf16.xpose.msra.mxu0 %v4269_v38  ;;  %v4401_v38 = vmul.bf16 %v10101_v16, %v9207_v12 }
 0xf3a   : > { %7129 = vmatprep.subr.bf16.mxu0 %v11313_v34 }
 0xf3d   : > { %7148 = vmatpush3.bf16.xpose.msra.mxu1 %v4277_v2  ;;  %v4391_v2 = vmul.bf16 %v10016_v14, %v9207_v12 }
 0xf3e   : > { %7149 = vmatprep.subr.bf16.mxu1 %v11313_v34 }
 0xf41   : > { %7130 = vmatpush3.bf16.xpose.msra.mxu0 %v4268_v4  ;;  %v4400_v4 = vmul.bf16 %v10110_v36, %v9207_v12 }
 0xf42   : > { %7131 = vmatprep.subr.bf16.mxu0 %v11313_v34 }
 0xf45   : > { %7150 = vmatpush3.bf16.xpose.msra.mxu1 %v4276_v9  ;;  %v4390_v9 = vmul.bf16 %v10029_v30, %v9207_v12 }
 0xf46   : > { %7151 = vmatprep.subr.bf16.mxu1 %v11313_v34 }
 0xf49   : > { %7132 = vmatpush3.bf16.xpose.msra.mxu0 %v4267_v37  ;;  %v4399_v37 = vmul.bf16 %v10127_v7, %v9207_v12 }
 0xf4a   : > { %7157 = vmatprep.subr.bf16.mxu0 %v11313_v34 }
 0xf4d   : > { %7152 = vmatpush3.bf16.xpose.msra.mxu1 %v4275_v13  ;;  %v4389_v13 = vmul.bf16 %v10047_v33, %v9207_v12 }
 0xf4e   : > { %7177 = vmatprep.subr.bf16.mxu1 %v11313_v34 }
 0xf50   : > { %7134 = vmatmul.mubr.bf16.vlgmr.msra.gmra.mxu0 %v9878_v48 }
 0xf51   : > { %7158 = vmatpush3.bf16.msra.mxu0 %v4394_v19  ;;  %7173 = vmatprep.mubr.msk.bf16.mxu0 %vm8391_vm9, %v11313_v34  ;;  %v4398_v19 = vmul.bf16 %v10137_v62, %v9207_v12 }
 0xf52   : > { %7159 = vmatprep.subr.bf16.mxu0 %v11313_v34 }
 0xf54   : > { %7154 = vmatmul.mubr.bf16.vlgmr.msra.gmra.mxu1 %v9889_v43 }
 0xf55   : > { %7160 = vmatpush3.bf16.msra.mxu0 %v4393_v29  ;;  %7178 = vmatpush3.bf16.msra.mxu1 %v4402_v17  ;;  %v4388_v29 = vmul.bf16 %v10058_v51, %v9207_v12  ;;  %v4397_v17 = vmul.bf16 %v10155_v59, %v9207_v12 }
 0xf56   : > { %7161 = vmatprep.subr.bf16.mxu0 %v11313_v34  ;;  %7179 = vmatprep.subr.bf16.mxu1 %v11313_v34 }
 0xf57   : > { %7193 = vmatprep.mubr.msk.bf16.mxu1 %vm8391_vm9, %v11313_v34 }
 0xf59   : > { %7162 = vmatpush3.bf16.msra.mxu0 %v4392_v60  ;;  %7180 = vmatpush3.bf16.msra.mxu1 %v4401_v38  ;;  %v4387_v60 = vmul.bf16 %v10069_v15, %v9207_v12  ;;  %v4396_v38 = vmul.bf16 %v10166_v1, %v9207_v12 }
 0xf5a   : > { %7163 = vmatprep.subr.bf16.mxu0 %v11313_v34  ;;  %7181 = vmatprep.subr.bf16.mxu1 %v11313_v34 }
 0xf5d   : > { %7164 = vmatpush3.bf16.msra.mxu0 %v4391_v2  ;;  %7182 = vmatpush3.bf16.msra.mxu1 %v4400_v4  ;;  %v4395_v2 = vmul.bf16 %v10177_v42, %v9207_v12 }
 0xf5e   : > { %7165 = vmatprep.subr.bf16.mxu0 %v11313_v34  ;;  %7183 = vmatprep.subr.bf16.mxu1 %v11313_v34 }
 0xf61   : > { %7166 = vmatpush3.bf16.msra.mxu0 %v4390_v9  ;;  %7184 = vmatpush3.bf16.msra.mxu1 %v4399_v37 }
 0xf62   : > { %7167 = vmatprep.subr.bf16.mxu0 %v11313_v34  ;;  %7185 = vmatprep.subr.bf16.mxu1 %v11313_v34 }
 0xf65   : > { %7168 = vmatpush3.bf16.msra.mxu0 %v4389_v13  ;;  %7186 = vmatpush3.bf16.msra.mxu1 %v4398_v19 }
 0xf66   : > { %7169 = vmatprep.subr.bf16.mxu0 %v11313_v34  ;;  %7187 = vmatprep.subr.bf16.mxu1 %v11313_v34 }
 0xf69   : > { %7170 = vmatpush3.bf16.msra.mxu0 %v4388_v29  ;;  %7188 = vmatpush3.bf16.msra.mxu1 %v4397_v17 }
 0xf6a   : > { %7171 = vmatprep.subr.bf16.mxu0 %v11313_v34  ;;  %7189 = vmatprep.subr.bf16.mxu1 %v11313_v34 }
 0xf6d   : > { %7172 = vmatpush3.bf16.msra.mxu0 %v4387_v60  ;;  %7190 = vmatpush3.bf16.msra.mxu1 %v4396_v38 }
 0xf6e   : > { %7191 = vmatprep.subr.bf16.mxu1 %v11313_v34  ;;  %7197 = vmatprep.subr.bf16.mxu0 %v11313_v34 }
 0xf71   : > { %7192 = vmatpush3.bf16.msra.mxu1 %v4395_v2 }
 0xf72   : > { %7217 = vmatprep.subr.bf16.mxu1 %v11313_v34 }
 0xfb0   : > { %v4141_v4 = vpop.f32.mrf.mxu0 }
 0xfb2   : > { %v7055_v9 = vpop.f32.mrf.mxu0 }
 0xfb4   : > { %v4144_v37 = vpop.f32.mrf.mxu0  ;;  %v4181_v13 = vpop.f32.mrf.mxu1 }
 0xfb6   : > { %v7056_v19 = vpop.f32.mrf.mxu0  ;;  %v7075_v29 = vpop.f32.mrf.mxu1 }
 0xfb8   : > { %v4184_v17 = vpop.f32.mrf.mxu1 }
 0xfba   : > { %v7076_v24 = vpop.f32.mrf.mxu1 }
 0xfd0   : > { %v4221_v60 = vpop.f32.mrf.mxu0 }
 0xfd1   : > { %v10388_v38 = vadd.f32 %v4221_v60, %v4141_v4 }
 0xfd2   : > { %v7095_v52 = vpop.f32.mrf.mxu0 }
 0xfd4   : > { %v4224_v55 = vpop.f32.mrf.mxu0  ;;  %v4261_v40 = vpop.f32.mrf.mxu1 }
 0xfd5   : > { %v10390_v54 = vadd.f32 %v4261_v40, %v4181_v13 }
 0xfd6   : > { %v7096_v12 = vpop.f32.mrf.mxu0  ;;  %v7115_v2 = vpop.f32.mrf.mxu1 }
 0xfd8   : > { %v4264_v22 = vpop.f32.mrf.mxu1 }
 0xfda   : > { %v7116_v56 = vpop.f32.mrf.mxu1 }
0x1010   : > { %v4317_v0 = vpop.f32.mrf.mxu0 }
0x1011   : > { %v4363_v9 = vmul.f32 0.17677669, %v4317_v0 }
0x1012   : > { %v7135_v37 = vpop.f32.mrf.mxu0 }
0x1013   : > { %v10393_v19 = vadd.f32 %v4363_v9, %v9192_v8 }
0x1014   : > { %v4320_v29 = vpop.f32.mrf.mxu0  ;;  %v4357_v24 = vpop.f32.mrf.mxu1 }
0x1015   : > { %v4364_v17 = vmul.f32 0.17677669, %v4357_v24  ;;  %4367 = vmax.xlane.f32.xlu0 %v10393_v19 }
0x1016   : > { %v7136_v52 = vpop.f32.mrf.mxu0  ;;  %v7155_v55 = vpop.f32.mrf.mxu1 }
0x1017   : > { %v10397_v40 = vadd.f32 %v4364_v17, %v9192_v8 }
0x1018   : > { %v4360_v4 = vpop.f32.mrf.mxu1 }
0x1019   : > { %4369 = vmax.xlane.f32.xlu1 %v10397_v40 }
0x101a   : > { %v7156_v56 = vpop.f32.mrf.mxu1 }
0x101b   : > { %v4492_v56 = vmul.bf16 %v9641_v53, %v9201_v11  ;;  %v4491_v53 = vmul.bf16 %v9650_v63, %v9201_v11  ;;  %v4489_v63 = vmul.bf16 %v9696_v50, %v9201_v11  ;;  %v4487_v50 = vmul.bf16 %v9722_v31, %v9201_v11 }
0x101c   : > { %v4485_v31 = vmul.bf16 %v9620_v10, %v9201_v11  ;;  %v4611_v10 = vmul.bf16 %v9980_v49, %v9201_v11  ;;  %v4617_v49 = vmul.bf16 %v10127_v7, %v9201_v11 }
0x109e   : > { %v4368_v22 = vpop.xlane.xlu0 %4367 }
0x109f   : > { %v4371_v0 = vsub.f32 %v10393_v19, %v4368_v22 }
0x10a1   : > { %v4373_v13 = vmul.f32 1.442695, %v4371_v0 }
0x10a2   : > { %v4370_v60 = vpop.xlane.xlu1 %4369 }
0x10a3   : > { %7640 = vpow2.f32 %v4373_v13  ;;  %v4372_v12 = vsub.f32 %v10397_v40, %v4370_v60  ;;  %v4500_v13 = vmul.bf16 %v9773_v28, %v9201_v11  ;;  %v4499_v60 = vmul.bf16 %v9787_v44, %v9201_v11 }
0x10a4   : > { %v4490_v28 = vmul.bf16 %v9683_v35, %v9201_v11  ;;  %v4497_v44 = vmul.bf16 %v9817_v61, %v9201_v11  ;;  %v4488_v35 = vmul.bf16 %v9709_v39, %v9201_v11  ;;  %v4495_v61 = vmul.bf16 %v9851_v27, %v9201_v11 }
0x10a5   : > { %v4375_v2 = vmul.f32 1.442695, %v4372_v12  ;;  %v4498_v12 = vmul.bf16 %v9802_v58, %v9201_v11  ;;  %v4496_v58 = vmul.bf16 %v9834_v5, %v9201_v11  ;;  %v4486_v39 = vmul.bf16 %v9611_v23, %v9201_v11 }
0x10a6   : > { %v4494_v5 = vmul.bf16 %v9672_v25, %v9201_v11  ;;  %v4493_v27 = vmul.bf16 %v9679_v41, %v9201_v11  ;;  %v4612_v23 = vmul.bf16 %v9962_v26, %v9201_v11  ;;  %v4620_v25 = vmul.bf16 %v10093_v57, %v9201_v11 }
0x10a7   : > { %7642 = vpow2.f32 %v4375_v2  ;;  %v4610_v41 = vmul.bf16 %v9995_v32, %v9201_v11  ;;  %v4609_v57 = vmul.bf16 %v10016_v14, %v9201_v11  ;;  %v4608_v26 = vmul.bf16 %v10029_v30, %v9201_v11 }
0x10a8   : > { %v4607_v32 = vmul.bf16 %v10047_v33, %v9201_v11  ;;  %v4616_v14 = vmul.bf16 %v10137_v62, %v9201_v11  ;;  %v4606_v30 = vmul.bf16 %v10058_v51, %v9201_v11  ;;  %v4605_v33 = vmul.bf16 %v10069_v15, %v9201_v11 }
0x10b0   : > { %v7641_v9 = vpop.eup %7640 }
0x10b1   : > { %4377 = vadd.xlane.f32.xlu0 %v7641_v9 }
0x10b4   : > { %v7643_v37 = vpop.eup %7642 }
0x10b5   : > { %4379 = vadd.xlane.f32.xlu1 %v7643_v37 }
0x113a   : > { %v4378_v29 = vpop.xlane.xlu0 %4377 }
0x113b   : > { %7644 = vrcp.f32 %v4378_v29 }
0x113e   : > { %v4380_v24 = vpop.xlane.xlu1 %4379 }
0x113f   : > { %7646 = vrcp.f32 %v4380_v24 }
0x1148   : > { %v7645_v17 = vpop.eup %7644 }
0x1149   : > { %v10402_v52 = vmul.f32 %v7645_v17, %v7641_v9 }
0x114b   : > { %v4385_v55 = vpack.c.bf16 %v10402_v52, %v10402_v52 }
0x114c   : > { %v7647_v4 = vpop.eup %7646 }
0x114d   : > { %7174 = vmatmul.mubr.bf16.vlgmr.msra.gmra.mxu0 %v4385_v55  ;;  %v10408_v22 = vmul.f32 %v7647_v4, %v7643_v37 }
0x114e   : > { %7198 = vmatpush3.bf16.xpose.msra.mxu0 %v4492_v56  ;;  %7213 = vmatprep.mubr.msk.bf16.mxu0 %vm8391_vm9, %v11313_v34 }
0x114f   : > { %v4386_v0 = vpack.c.bf16 %v10408_v22, %v10408_v22  ;;  %7199 = vmatprep.subr.bf16.mxu0 %v11313_v34 }
0x1151   : > { %7194 = vmatmul.mubr.bf16.vlgmr.msra.gmra.mxu1 %v4386_v0 }
0x1152   : > { %7218 = vmatpush3.bf16.xpose.msra.mxu1 %v4500_v13  ;;  %7233 = vmatprep.mubr.msk.bf16.mxu1 %vm8391_vm9, %v11313_v34 }
0x1153   : > { %7219 = vmatprep.subr.bf16.mxu1 %v11313_v34 }
0x1156   : > { %7200 = vmatpush3.bf16.xpose.msra.mxu0 %v4491_v53 }
0x1157   : > { %7201 = vmatprep.subr.bf16.mxu0 %v11313_v34 }
0x115a   : > { %7220 = vmatpush3.bf16.xpose.msra.mxu1 %v4499_v60 }
0x115b   : > { %7221 = vmatprep.subr.bf16.mxu1 %v11313_v34 }
0x115e   : > { %7202 = vmatpush3.bf16.xpose.msra.mxu0 %v4490_v28 }
0x115f   : > { %7203 = vmatprep.subr.bf16.mxu0 %v11313_v34 }
0x1162   : > { %7222 = vmatpush3.bf16.xpose.msra.mxu1 %v4498_v12 }
0x1163   : > { %7223 = vmatprep.subr.bf16.mxu1 %v11313_v34 }
0x1166   : > { %7204 = vmatpush3.bf16.xpose.msra.mxu0 %v4489_v63 }
0x1167   : > { %7205 = vmatprep.subr.bf16.mxu0 %v11313_v34 }
0x116a   : > { %7224 = vmatpush3.bf16.xpose.msra.mxu1 %v4497_v44 }
0x116b   : > { %7225 = vmatprep.subr.bf16.mxu1 %v11313_v34 }
0x116e   : > { %7206 = vmatpush3.bf16.xpose.msra.mxu0 %v4488_v35 }
0x116f   : > { %7207 = vmatprep.subr.bf16.mxu0 %v11313_v34 }
0x1172   : > { %7226 = vmatpush3.bf16.xpose.msra.mxu1 %v4496_v58 }
0x1173   : > { %7227 = vmatprep.subr.bf16.mxu1 %v11313_v34 }
0x1176   : > { %7208 = vmatpush3.bf16.xpose.msra.mxu0 %v4487_v50 }
0x1177   : > { %7209 = vmatprep.subr.bf16.mxu0 %v11313_v34 }
0x117a   : > { %7228 = vmatpush3.bf16.xpose.msra.mxu1 %v4495_v61 }
0x117b   : > { %7229 = vmatprep.subr.bf16.mxu1 %v11313_v34 }
0x117e   : > { %7210 = vmatpush3.bf16.xpose.msra.mxu0 %v4486_v39 }
0x117f   : > { %7211 = vmatprep.subr.bf16.mxu0 %v11313_v34 }
0x1182   : > { %7230 = vmatpush3.bf16.xpose.msra.mxu1 %v4494_v5 }
0x1183   : > { %7231 = vmatprep.subr.bf16.mxu1 %v11313_v34 }
0x1186   : > { %7212 = vmatpush3.bf16.xpose.msra.mxu0 %v4485_v31 }
0x1187   : > { %7237 = vmatprep.subr.bf16.mxu0 %v11313_v34 }
0x118a   : > { %7232 = vmatpush3.bf16.xpose.msra.mxu1 %v4493_v27  ;;  %v7580_v27 = vld [vmem:[%s11364_s10 + $0x38] sm:$0xff]  }
0x118b   : > { %7257 = vmatprep.subr.bf16.mxu1 %v11313_v34 }
0x118d   : > { %7214 = vmatmul.mubr.bf16.vlgmr.msra.gmra.mxu0 %v9878_v48  ;;  %v4619_v48 = vmul.bf16 %v10101_v16, %v9201_v11  ;;  %v4615_v16 = vmul.bf16 %v10155_v59, %v9201_v11  ;;  %v4613_v59 = vmul.bf16 %v10177_v42, %v9201_v11 }
0x118e   : > { %7238 = vmatpush3.bf16.msra.mxu0 %v4612_v23  ;;  %7253 = vmatprep.mubr.msk.bf16.mxu0 %vm8391_vm9, %v11313_v34 }
0x118f   : > { %7239 = vmatprep.subr.bf16.mxu0 %v11313_v34 }
0x1191   : > { %7234 = vmatmul.mubr.bf16.vlgmr.msra.gmra.mxu1 %v9889_v43  ;;  %v4618_v43 = vmul.bf16 %v10110_v36, %v9201_v11  ;;  %v4614_v36 = vmul.bf16 %v10166_v1, %v9201_v11 }
0x1192   : > { %7240 = vmatpush3.bf16.msra.mxu0 %v4611_v10  ;;  %7258 = vmatpush3.bf16.msra.mxu1 %v4620_v25 }
0x1193   : > { %7241 = vmatprep.subr.bf16.mxu0 %v11313_v34  ;;  %7259 = vmatprep.subr.bf16.mxu1 %v11313_v34 }
0x1194   : > { %7273 = vmatprep.mubr.msk.bf16.mxu1 %vm8391_vm9, %v11313_v34 }
0x1196   : > { %7242 = vmatpush3.bf16.msra.mxu0 %v4610_v41  ;;  %7260 = vmatpush3.bf16.msra.mxu1 %v4619_v48  ;;  %v7581_v41 = vld [vmem:[%s11364_s10 + $0x30] sm:$0xff]  }
0x1197   : > { %7243 = vmatprep.subr.bf16.mxu0 %v11313_v34  ;;  %7261 = vmatprep.subr.bf16.mxu1 %v11313_v34 }
0x119a   : > { %7244 = vmatpush3.bf16.msra.mxu0 %v4609_v57  ;;  %7262 = vmatpush3.bf16.msra.mxu1 %v4618_v43  ;;  %v7582_v57 = vld [vmem:[%s11364_s10 + $0x28] sm:$0xff]   ;;  %v7583_v43 = vld [vmem:[%s11364_s10 + $0x20] sm:$0xff]  }
0x119b   : > { %7245 = vmatprep.subr.bf16.mxu0 %v11313_v34  ;;  %7263 = vmatprep.subr.bf16.mxu1 %v11313_v34 }
0x119e   : > { %7246 = vmatpush3.bf16.msra.mxu0 %v4608_v26  ;;  %7264 = vmatpush3.bf16.msra.mxu1 %v4617_v49  ;;  %v7584_v26 = vld [vmem:[%s11364_s10 + $0x18] sm:$0xff]   ;;  %v7585_v49 = vld [vmem:[%s11364_s10 + $0x10] sm:$0xff]  }
0x119f   : > { %7247 = vmatprep.subr.bf16.mxu0 %v11313_v34  ;;  %7265 = vmatprep.subr.bf16.mxu1 %v11313_v34 }
0x11a2   : > { %7248 = vmatpush3.bf16.msra.mxu0 %v4607_v32  ;;  %7266 = vmatpush3.bf16.msra.mxu1 %v4616_v14  ;;  %v7586_v32 = vld [vmem:[%s11364_s10 + $0x8] sm:$0xff]   ;;  %v7587_v14 = vld [vmem:[%s11364_s10] sm:$0xff]  }
0x11a3   : > { %7249 = vmatprep.subr.bf16.mxu0 %v11313_v34  ;;  %7267 = vmatprep.subr.bf16.mxu1 %v11313_v34 }
0x11a6   : > { %7250 = vmatpush3.bf16.msra.mxu0 %v4606_v30  ;;  %7268 = vmatpush3.bf16.msra.mxu1 %v4615_v16 }
0x11a7   : > { %7251 = vmatprep.subr.bf16.mxu0 %v11313_v34  ;;  %7269 = vmatprep.subr.bf16.mxu1 %v11313_v34 }
0x11aa   : > { %7252 = vmatpush3.bf16.msra.mxu0 %v4605_v33  ;;  %7270 = vmatpush3.bf16.msra.mxu1 %v4614_v36 }
0x11ab   : > { %7271 = vmatprep.subr.bf16.mxu1 %v11313_v34  ;;  %7277 = vmatprep.subr.bf16.mxu0 %v11313_v34 }
0x11ae   : > { %7272 = vmatpush3.bf16.msra.mxu1 %v4613_v59 }
0x120d   : > { %v4437_v51 = vpop.f32.mrf.mxu0 }
0x120e   : > { %v10516_v7 = vadd.f32 %v4437_v51, %v10388_v38 }
0x120f   : > { %v7175_v62 = vpop.f32.mrf.mxu0 }
0x1211   : > { %v4440_v2 = vpop.f32.mrf.mxu0  ;;  %v4477_v15 = vpop.f32.mrf.mxu1 }
0x1212   : > { %v10519_v9 = vadd.f32 %v4477_v15, %v10390_v54 }
0x1213   : > { %v7176_v1 = vpop.f32.mrf.mxu0  ;;  %v7195_v37 = vpop.f32.mrf.mxu1 }
0x1215   : > { %v4480_v29 = vpop.f32.mrf.mxu1 }
0x1216   : > { %v6272_v29 = vld [vmem:[%s1775_s23] ss:$0 sm:$0xff] }
0x1217   : > { %v7196_v24 = vpop.f32.mrf.mxu1 }
0x124d   : > { %v4535_v17 = vpop.f32.mrf.mxu0 }
0x124e   : > { %v4581_v55 = vmul.f32 0.17677669, %v4535_v17 }
0x124f   : > { %v7215_v4 = vpop.f32.mrf.mxu0 }
0x1250   : > { %v10522_v11 = vadd.f32 %v4581_v55, %v9192_v8 }
0x1251   : > { %v4538_v42 = vpop.f32.mrf.mxu0  ;;  %v4575_v56 = vpop.f32.mrf.mxu1 }
0x1252   : > { %v4582_v38 = vmul.f32 0.17677669, %v4575_v56  ;;  %4585 = vmax.xlane.f32.xlu0 %v10522_v11 }
0x1253   : > { %v7216_v0 = vpop.f32.mrf.mxu0  ;;  %v7235_v13 = vpop.f32.mrf.mxu1 }
0x1254   : > { %v10526_v54 = vadd.f32 %v4582_v38, %v9192_v8 }
0x1255   : > { %v4578_v53 = vpop.f32.mrf.mxu1 }
0x1256   : > { %4587 = vmax.xlane.f32.xlu1 %v10526_v54 }
0x1257   : > { %v7236_v60 = vpop.f32.mrf.mxu1 }
0x12db   : > { %v4586_v28 = vpop.xlane.xlu0 %4585 }
0x12dc   : > { %v4589_v12 = vsub.f32 %v10522_v11, %v4586_v28 }
0x12de   : > { %v4591_v63 = vmul.f32 1.442695, %v4589_v12 }
0x12df   : > { %v4588_v44 = vpop.xlane.xlu1 %4587 }
0x12e0   : > { %7648 = vpow2.f32 %v4591_v63  ;;  %v4590_v35 = vsub.f32 %v10526_v54, %v4588_v44 }
0x12e2   : > { %v4593_v58 = vmul.f32 1.442695, %v4590_v35 }
0x12e4   : > { %7650 = vpow2.f32 %v4593_v58 }
0x12ed   : > { %v7649_v50 = vpop.eup %7648 }
0x12ee   : > { %4595 = vadd.xlane.f32.xlu0 %v7649_v50 }
0x12f1   : > { %v7651_v8 = vpop.eup %7650 }
0x12f2   : > { %4597 = vadd.xlane.f32.xlu1 %v7651_v8 }
0x1377   : > { %v4596_v61 = vpop.xlane.xlu0 %4595 }
0x1378   : > { %7652 = vrcp.f32 %v4596_v61 }
0x137b   : > { %v4598_v39 = vpop.xlane.xlu1 %4597 }
0x137c   : > { %7654 = vrcp.f32 %v4598_v39 }
0x1385   : > { %v7653_v5 = vpop.eup %7652 }
0x1386   : > { %v10531_v31 = vmul.f32 %v7653_v5, %v7649_v50 }
0x1388   : > { %v4603_v23 = vpack.c.bf16 %v10531_v31, %v10531_v31 }
0x1389   : > { %v7655_v10 = vpop.eup %7654 }
0x138a   : > { %7254 = vmatmul.mubr.bf16.vlgmr.msra.gmra.mxu0 %v4603_v23  ;;  %v10536_v25 = vmul.f32 %v7655_v10, %v7651_v8 }
0x138b   : > { %7278 = vmatpush3.bf16.msra.mxu0 %v7580_v27  ;;  %7293 = vmatprep.mubr.msk.bf16.mxu0 %vm8391_vm9, %v11313_v34 }
0x138c   : > { %v4604_v48 = vpack.c.bf16 %v10536_v25, %v10536_v25  ;;  %7279 = vmatprep.subr.bf16.mxu0 %v11313_v34 }
0x138e   : > { %7274 = vmatmul.mubr.bf16.vlgmr.msra.gmra.mxu1 %v4604_v48 }
0x138f   : > { %7280 = vmatpush3.bf16.msra.mxu0 %v7581_v41 }
0x1390   : > { %7281 = vmatprep.subr.bf16.mxu0 %v11313_v34 }
0x1393   : > { %7282 = vmatpush3.bf16.msra.mxu0 %v7582_v57 }
0x1394   : > { %7283 = vmatprep.subr.bf16.mxu0 %v11313_v34 }
0x1397   : > { %7284 = vmatpush3.bf16.msra.mxu0 %v7583_v43 }
0x1398   : > { %7285 = vmatprep.subr.bf16.mxu0 %v11313_v34 }
0x139b   : > { %7286 = vmatpush3.bf16.msra.mxu0 %v7584_v26 }
0x139c   : > { %7287 = vmatprep.subr.bf16.mxu0 %v11313_v34 }
0x139f   : > { %7288 = vmatpush3.bf16.msra.mxu0 %v7585_v49 }
0x13a0   : > { %7289 = vmatprep.subr.bf16.mxu0 %v11313_v34 }
0x13a3   : > { %7290 = vmatpush3.bf16.msra.mxu0 %v7586_v32 }
0x13a4   : > { %7291 = vmatprep.subr.bf16.mxu0 %v11313_v34 }
0x13a7   : > { %7292 = vmatpush3.bf16.msra.mxu0 %v7587_v14 }
0x144a   : > { %v4655_v30 = vpop.f32.mrf.mxu0 }
0x144b   : > { %v4701_v59 = vadd.f32 %v4655_v30, %v10516_v7 }
0x144c   : > { %v7255_v16 = vpop.f32.mrf.mxu0 }
0x144e   : > { %v4658_v33 = vpop.f32.mrf.mxu0  ;;  %v4695_v36 = vpop.f32.mrf.mxu1 }
0x144f   : > { %v4702_v51 = vadd.f32 %v4695_v36, %v10519_v9 }
0x1450   : > { %v7256_v62 = vpop.f32.mrf.mxu0  ;;  %v7275_v2 = vpop.f32.mrf.mxu1 }
0x1451   : > { %v4703_v15 = vpack.c.bf16 %v4702_v51, %v4701_v59 }
0x1452   : > { %v4698_v1 = vpop.f32.mrf.mxu1 }
0x1453   : > { %7294 = vmatmul.mubr.bf16.vlgmr.msra.gmra.mxu0 %v4703_v15 }
0x1454   : > { %v7276_v37 = vpop.f32.mrf.mxu1 }
0x1513   : > { %v4792_v24 = vpop.f32.mrf.mxu0 }
0x1514   : > { %v10561_v34 = vadd.f32 %v6272_v29, %v4792_v24 }
0x1515   : > { %v7295_v17 = vpop.f32.mrf.mxu0  ;;  %4802 = sbr.rel (%p6281_p9) target bundleno = 5444 (0x1544), region = 196 }
0x1517   : > { %v4795_v55 = vpop.f32.mrf.mxu0 }
0x1518   : > { %v10563_v4 = vadd.f32 %v6272_v29, %v4795_v55 }
0x1519   : > { %v7296_v42 = vpop.f32.mrf.mxu0 }
0x151a   : > { %4803 = vst [vmem:[%s9239_s16] sm:$0xff] %v9874_v46  ;;  %4804 = vst [vmem:[%s9239_s16 + $0x8] sm:$0xff] %v9882_v45  ;;  %v11367_v46 = vld [vmem:[#allocation124_spill] sm:$0xff]  ;;  %v11368_v45 = vld [vmem:[#allocation125_spill] sm:$0xff] }
0x151b   : > { %4805 = vst [vmem:[%s9242_s17] sm:$0xff] %v9604_v20  ;;  %4806 = vst [vmem:[%s9242_s17 + $0x8] sm:$0xff] %v9614_v3  ;;  %v11369_v20 = vld [vmem:[#allocation122_spill] sm:$0xff]  ;;  %v11370_v3 = vld [vmem:[#allocation123_spill] sm:$0xff] }
0x151c   : > { %4807 = vst [vmem:[%s9242_s17 + $0x10] sm:$0xff] %v9599_v18  ;;  %4808 = vst [vmem:[%s9242_s17 + $0x18] sm:$0xff] %v9607_v21  ;;  %v11371_v18 = vld [vmem:[#allocation119_spill] sm:$0xff]  ;;  %v11372_v21 = vld [vmem:[#allocation120_spill] sm:$0xff] }
0x151d   : > { %4809 = vst [vmem:[%s9242_s17 + $0x20] sm:$0xff] %v9713_v47  ;;  %4810 = vst [vmem:[%s9242_s17 + $0x28] sm:$0xff] %v9716_v6  ;;  %v11373_v47 = vld [vmem:[#allocation114_spill] sm:$0xff]  ;;  %v11374_v6 = vld [vmem:[#allocation115_spill] sm:$0xff] }
0x151e   : > { %4811 = vst [vmem:[%s9242_s17 + $0x30] sm:$0xff] %v11367_v46  ;;  %4812 = vst [vmem:[%s9242_s17 + $0x38] sm:$0xff] %v11368_v45  ;;  %v11375_v7 = vld [vmem:[#allocation112_spill] sm:$0xff]  ;;  %v11376_v9 = vld [vmem:[#allocation113_spill] sm:$0xff] }
0x151f   : > { %4813 = vst [vmem:[%s9242_s17 + $0x40] sm:$0xff] %v11369_v20  ;;  %4814 = vst [vmem:[%s9242_s17 + $0x48] sm:$0xff] %v11370_v3  ;;  %v11377_v56 = vld [vmem:[#allocation117_spill] sm:$0xff]  ;;  %v11379_v0 = vld [vmem:[#allocation116_spill] sm:$0xff] }
0x1520   : > { %4815 = vst [vmem:[%s9242_s17 + $0x50] sm:$0xff] %v11371_v18  ;;  %4816 = vst [vmem:[%s9242_s17 + $0x58] sm:$0xff] %v11372_v21  ;;  %v11378_v38 = vld [vmem:[#allocation121_spill] sm:$0xff]  ;;  %v11380_v13 = vld [vmem:[#allocation118_spill] sm:$0xff] }
0x1521   : > { %4817 = vst [vmem:[%s9242_s17 + $0x60] sm:$0xff] %v11373_v47  ;;  %4818 = vst [vmem:[%s9242_s17 + $0x68] sm:$0xff] %v11374_v6  ;;  %v11381_v53 = vld [vmem:[#allocation138_spill] sm:$0xff]  ;;  %v11382_v60 = vld [vmem:[#allocation139_spill] sm:$0xff] }
0x1522   : > { %4819 = vst [vmem:[%s9242_s17 + $0x70] sm:$0xff] %v11375_v7  ;;  %4820 = vst [vmem:[%s9242_s17 + $0x78] sm:$0xff] %v11376_v9  ;;  %v11383_v28 = vld [vmem:[#allocation136_spill] sm:$0xff]  ;;  %v11384_v12 = vld [vmem:[#allocation137_spill] sm:$0xff] }
0x1523   : > { %4821 = vst [vmem:[%s9242_s17 + $0x80] sm:$0xff] %v11377_v56  ;;  %4822 = vst [vmem:[%s9242_s17 + $0x88] sm:$0xff] %v11378_v38  ;;  %v11385_v63 = vld [vmem:[#allocation134_spill] sm:$0xff]  ;;  %v11386_v44 = vld [vmem:[#allocation135_spill] sm:$0xff] }
0x1524   : > { %4823 = vst [vmem:[%s9242_s17 + $0x90] sm:$0xff] %v11379_v0  ;;  %4824 = vst [vmem:[%s9242_s17 + $0x98] sm:$0xff] %v11380_v13  ;;  %v11387_v35 = vld [vmem:[#allocation132_spill] sm:$0xff]  ;;  %v11388_v58 = vld [vmem:[#allocation133_spill] sm:$0xff] }
0x1525   : > { %4825 = vst [vmem:[%s9242_s17 + $0xa0] sm:$0xff] %v11381_v53  ;;  %4826 = vst [vmem:[%s9242_s17 + $0xa8] sm:$0xff] %v11382_v60  ;;  %v11389_v50 = vld [vmem:[#allocation130_spill] sm:$0xff]  ;;  %v11390_v8 = vld [vmem:[#allocation131_spill] sm:$0xff] }
0x1526   : > { %4827 = vst [vmem:[%s9242_s17 + $0xb0] sm:$0xff] %v11383_v28  ;;  %4828 = vst [vmem:[%s9242_s17 + $0xb8] sm:$0xff] %v11384_v12  ;;  %v11391_v61 = vld [vmem:[#allocation128_spill] sm:$0xff]  ;;  %v11392_v39 = vld [vmem:[#allocation129_spill] sm:$0xff] }
0x1527   : > { %4829 = vst [vmem:[%s9242_s17 + $0xc0] sm:$0xff] %v11385_v63  ;;  %4830 = vst [vmem:[%s9242_s17 + $0xc8] sm:$0xff] %v11386_v44  ;;  %v11393_v5 = vld [vmem:[#allocation154_spill] sm:$0xff]  ;;  %v11394_v27 = vld [vmem:[#allocation155_spill] sm:$0xff] }
0x1528   : > { %4831 = vst [vmem:[%s9242_s17 + $0xd0] sm:$0xff] %v11387_v35  ;;  %4832 = vst [vmem:[%s9242_s17 + $0xd8] sm:$0xff] %v11388_v58  ;;  %v11395_v23 = vld [vmem:[#allocation152_spill] sm:$0xff]  ;;  %v11396_v10 = vld [vmem:[#allocation153_spill] sm:$0xff] }
0x1529   : > { %4833 = vst [vmem:[%s9242_s17 + $0xe0] sm:$0xff] %v11389_v50  ;;  %4834 = vst [vmem:[%s9242_s17 + $0xe8] sm:$0xff] %v11390_v8  ;;  %v11397_v41 = vld [vmem:[#allocation150_spill] sm:$0xff]  ;;  %v11398_v48 = vld [vmem:[#allocation151_spill] sm:$0xff] }
0x152a   : > { %4835 = vst [vmem:[%s9242_s17 + $0xf0] sm:$0xff] %v11391_v61  ;;  %4836 = vst [vmem:[%s9242_s17 + $0xf8] sm:$0xff] %v11392_v39  ;;  %v11399_v57 = vld [vmem:[#allocation148_spill] sm:$0xff]  ;;  %v11400_v43 = vld [vmem:[#allocation149_spill] sm:$0xff] }
0x152b   : > { %4837 = vst [vmem:[%s9245_s6] sm:$0xff] %v11393_v5  ;;  %4838 = vst [vmem:[%s9245_s6 + $0x8] sm:$0xff] %v11394_v27  ;;  %v11401_v26 = vld [vmem:[#allocation146_spill] sm:$0xff]  ;;  %v11402_v49 = vld [vmem:[#allocation147_spill] sm:$0xff] }
0x152c   : > { %4839 = vst [vmem:[%s9245_s6 + $0x10] sm:$0xff] %v11395_v23  ;;  %4840 = vst [vmem:[%s9245_s6 + $0x18] sm:$0xff] %v11396_v10  ;;  %v11403_v32 = vld [vmem:[#allocation144_spill] sm:$0xff]  ;;  %v11404_v14 = vld [vmem:[#allocation145_spill] sm:$0xff] }
0x152d   : > { %4841 = vst [vmem:[%s9245_s6 + $0x20] sm:$0xff] %v11397_v41  ;;  %4842 = vst [vmem:[%s9245_s6 + $0x28] sm:$0xff] %v11398_v48  ;;  %v11405_v30 = vld [vmem:[#allocation142_spill] sm:$0xff]  ;;  %v11406_v16 = vld [vmem:[#allocation143_spill] sm:$0xff] }
0x152e   : > { %4843 = vst [vmem:[%s9245_s6 + $0x30] sm:$0xff] %v11399_v57  ;;  %4844 = vst [vmem:[%s9245_s6 + $0x38] sm:$0xff] %v11400_v43  ;;  %v11407_v33 = vld [vmem:[#allocation140_spill] sm:$0xff]  ;;  %v11408_v36 = vld [vmem:[#allocation141_spill] sm:$0xff] }
0x152f   : > { %4845 = vst [vmem:[%s9245_s6 + $0x40] sm:$0xff] %v11401_v26  ;;  %4846 = vst [vmem:[%s9245_s6 + $0x48] sm:$0xff] %v11402_v49  ;;  %v11409_v59 = vld [vmem:[#allocation170_spill] sm:$0xff]  ;;  %v11410_v51 = vld [vmem:[#allocation171_spill] sm:$0xff] }
0x1530   : > { %4847 = vst [vmem:[%s9245_s6 + $0x50] sm:$0xff] %v11403_v32  ;;  %4848 = vst [vmem:[%s9245_s6 + $0x58] sm:$0xff] %v11404_v14  ;;  %v11411_v62 = vld [vmem:[#allocation168_spill] sm:$0xff]  ;;  %v11412_v2 = vld [vmem:[#allocation169_spill] sm:$0xff] }
0x1531   : > { %4849 = vst [vmem:[%s9245_s6 + $0x60] sm:$0xff] %v11405_v30  ;;  %4850 = vst [vmem:[%s9245_s6 + $0x68] sm:$0xff] %v11406_v16  ;;  %v11413_v15 = vld [vmem:[#allocation166_spill] sm:$0xff]  ;;  %v11414_v1 = vld [vmem:[#allocation167_spill] sm:$0xff] }
0x1532   : > { %4851 = vst [vmem:[%s9245_s6 + $0x70] sm:$0xff] %v11407_v33  ;;  %4852 = vst [vmem:[%s9245_s6 + $0x78] sm:$0xff] %v11408_v36  ;;  %v11415_v37 = vld [vmem:[#allocation164_spill] sm:$0xff]  ;;  %v11416_v29 = vld [vmem:[#allocation165_spill] sm:$0xff] }
0x1533   : > { %4853 = vst [vmem:[%s9245_s6 + $0x80] sm:$0xff] %v11409_v59  ;;  %4854 = vst [vmem:[%s9245_s6 + $0x88] sm:$0xff] %v11410_v51  ;;  %v11417_v24 = vld [vmem:[#allocation162_spill] sm:$0xff]  ;;  %v11418_v17 = vld [vmem:[#allocation163_spill] sm:$0xff] }
0x1534   : > { %4855 = vst [vmem:[%s9245_s6 + $0x90] sm:$0xff] %v11411_v62  ;;  %4856 = vst [vmem:[%s9245_s6 + $0x98] sm:$0xff] %v11412_v2  ;;  %v11419_v55 = vld [vmem:[#allocation159_spill] sm:$0xff]  ;;  %v11420_v42 = vld [vmem:[#allocation160_spill] sm:$0xff] }
0x1535   : > { %4857 = vst [vmem:[%s9245_s6 + $0xa0] sm:$0xff] %v11413_v15  ;;  %4858 = vst [vmem:[%s9245_s6 + $0xa8] sm:$0xff] %v11414_v1  ;;  %v11421_v46 = vld [vmem:[#allocation157_spill] sm:$0xff]  ;;  %v11423_v20 = vld [vmem:[#allocation156_spill] sm:$0xff] }
0x1536   : > { %4859 = vst [vmem:[%s9245_s6 + $0xb0] sm:$0xff] %v11415_v37  ;;  %4860 = vst [vmem:[%s9245_s6 + $0xb8] sm:$0xff] %v11416_v29  ;;  %v11422_v45 = vld [vmem:[#allocation161_spill] sm:$0xff]  ;;  %v11424_v3 = vld [vmem:[#allocation158_spill] sm:$0xff] }
0x1537   : > { %4861 = vst [vmem:[%s9245_s6 + $0xc0] sm:$0xff] %v11417_v24  ;;  %4862 = vst [vmem:[%s9245_s6 + $0xc8] sm:$0xff] %v11418_v17  ;;  %v11425_v18 = vld [vmem:[#allocation178_spill] sm:$0xff]  ;;  %v11426_v21 = vld [vmem:[#allocation176_spill] sm:$0xff] }
0x1538   : > { %4863 = vst [vmem:[%s9245_s6 + $0xd0] sm:$0xff] %v11419_v55  ;;  %4864 = vst [vmem:[%s9245_s6 + $0xd8] sm:$0xff] %v11420_v42  ;;  %v4869_v47 = vadd.f32 %v11426_v21, %v11425_v18  ;;  %v11427_v6 = vld [vmem:[#allocation179_spill] sm:$0xff]  ;;  %v11428_v7 = vld [vmem:[#allocation177_spill] sm:$0xff] }
0x1539   : > { %4865 = vst [vmem:[%s9245_s6 + $0xe0] sm:$0xff] %v11421_v46  ;;  %4866 = vst [vmem:[%s9245_s6 + $0xe8] sm:$0xff] %v11422_v45  ;;  %v4870_v9 = vadd.f32 %v11428_v7, %v11427_v6  ;;  %v11429_v56 = vld [vmem:[#allocation173_spill] sm:$0xff]  ;;  %v11430_v38 = vld [vmem:[#allocation172_spill] sm:$0xff] }
0x153a   : > { %4867 = vst [vmem:[%s9245_s6 + $0xf0] sm:$0xff] %v11423_v20  ;;  %4868 = vst [vmem:[%s9245_s6 + $0xf8] sm:$0xff] %v11424_v3  ;;  %v4871_v0 = vadd.f32 %v11430_v38, %v11429_v56  ;;  %v11431_v13 = vld [vmem:[#allocation175_spill] sm:$0xff]  ;;  %v11432_v53 = vld [vmem:[#allocation174_spill] sm:$0xff]  ;;  %v4873_v28 = vadd.f32 %v4869_v47, %v10402_v52 }
0x153b   : > { %v4872_v60 = vadd.f32 %v11432_v53, %v11431_v13  ;;  %v4874_v12 = vadd.f32 %v4870_v9, %v10408_v22 }
0x153c   : > { %v4875_v63 = vadd.f32 %v4871_v0, %v10393_v19  ;;  %v4877_v35 = vadd.f32 %v4873_v28, %v10531_v31 }
0x153d   : > { %v4876_v44 = vadd.f32 %v4872_v60, %v10397_v40  ;;  %v4878_v58 = vadd.f32 %v4874_v12, %v10536_v25 }
0x153e   : > { %v4879_v50 = vadd.f32 %v4875_v63, %v10522_v11  ;;  %v4881_v61 = vmul.f32 0.25, %v4877_v35 }
0x153f   : > { %v4880_v8 = vadd.f32 %v4876_v44, %v10526_v54  ;;  %v4882_v39 = vmul.f32 0.25, %v4878_v58 }
0x1540   : > { %v4885_v5 = vmul.f32 0.25, %v4879_v50  ;;  %4883 = vst [vmem:[%s9248_s12] sm:$0xff] %v4881_v61 }
0x1541   : > { %v4886_v27 = vmul.f32 0.25, %v4880_v8  ;;  %4884 = vst [vmem:[%s9248_s12 + $0x8] sm:$0xff] %v4882_v39 }
0x1542   : > { %4887 = vst [vmem:[%s9251_s13] sm:$0xff] %v4885_v5 }
0x1543   : > { %4888 = vst [vmem:[%s9251_s13 + $0x8] sm:$0xff] %v4886_v27 }
0x1544 PF: > { %v11433_v19 = vld [vmem:[#allocation126_spill] sm:$0xff]  ;;  %s11434_s23 = sld [smem:[#allocation110_spill]]  ;;  %v11435_v52 = vld [vmem:[#allocation127_spill] sm:$0xff]  ;;  %v8392_v36 = vmov 0   ;;  %v11439_v5 = vlaneseq }
0x1545   : > { %v4889_v40 = vadd.f32 %v10561_v34, %v11433_v19  ;;  %v4890_v22 = vadd.f32 %v10563_v4, %v11435_v52  ;;  %s11436_s27 = sld [smem:[#allocation111_spill]]  ;;  %5072 = vmatprep.mubr.bf16.mxu1 %v8392_v36  ;;  %v6282_v38 = vld [vmem:[%s1791_s4] ss:$0 sm:$0xff] }
0x1546   : > { %v6283_v60 = vld [vmem:[%s1794_s28] ss:$0 sm:$0xff]  ;;  %v4951_v27 = vshrl.u32 %v11439_v5, 7  ;;  %s11445_s2 = sld [smem:[#allocation73_spill]] (!%p6281_p9) }
0x1547   : > { %4893 = vadd.xlane.f32.xlu0 %v4889_v40  ;;  %v4948_v52 = vld [vmem:[%s9221_s18] sm:$0x3] }
0x1548   : > { %v4956_v19 = vsub.s32 1, %v4951_v27 }
0x154a   : > { %v7658_v11 = vld [vmem:[%s11434_s23 + $0x74] ss:$8 sps:$4 sm:$0xff]   ;;  %v7660_v54 = vld [vmem:[%s11434_s23 + $0x70] ss:$8 sps:$4 sm:$0xff]   ;;  %v7661_v57 = vld [vmem:[%s11434_s23 + $0x64] ss:$8 sps:$4 sm:$0xff]  }
0x154b   : > { %4895 = vadd.xlane.f32.xlu0 %v4890_v22  ;;  %5040 = vmatprep.subr.bf16.mxu1 %v7658_v11  ;;  %v7663_v43 = vld [vmem:[%s11434_s23 + $0x60] ss:$8 sps:$4 sm:$0xff]   ;;  %v7664_v26 = vld [vmem:[%s11434_s23 + $0x54] ss:$8 sps:$4 sm:$0xff]   ;;  %v7666_v49 = vld [vmem:[%s11434_s23 + $0x50] ss:$8 sps:$4 sm:$0xff]   ;;  %v4957_v11 = vrot.slane %v4948_v52, %v4956_v19 }
0x154c   : > { %5041 = vmatpush1.bf16.msra.mxu1 %v7660_v54  ;;  %v7667_v32 = vld [vmem:[%s11434_s23 + $0x44] ss:$8 sps:$4 sm:$0xff]   ;;  %v7669_v14 = vld [vmem:[%s11434_s23 + $0x40] ss:$8 sps:$4 sm:$0xff]   ;;  %v7670_v30 = vld [vmem:[%s11434_s23 + $0x34] ss:$8 sps:$4 sm:$0xff]  }
0x154d   : > { %5042 = vmatprep.subr.bf16.mxu1 %v7661_v57  ;;  %v7672_v16 = vld [vmem:[%s11434_s23 + $0x30] ss:$8 sps:$4 sm:$0xff]   ;;  %v7673_v33 = vld [vmem:[%s11434_s23 + $0x24] ss:$8 sps:$4 sm:$0xff]   ;;  %v7675_v59 = vld [vmem:[%s11434_s23 + $0x20] ss:$8 sps:$4 sm:$0xff]  }
0x154e   : > { %v7676_v51 = vld [vmem:[%s11434_s23 + $0x14] ss:$8 sps:$4 sm:$0xff]   ;;  %v7678_v62 = vld [vmem:[%s11434_s23 + $0x10] ss:$8 sps:$4 sm:$0xff]   ;;  %v7679_v2 = vld [vmem:[%s11434_s23 + $0x4] ss:$8 sps:$4 sm:$0xff]  }
0x154f   : > { %v7681_v15 = vld [vmem:[%s11434_s23] ss:$8 sps:$4 sm:$0xff]   ;;  %v7682_v1 = vld [vmem:[%s11436_s27 + $0x78] sm:$0xff]   ;;  %v7684_v29 = vld [vmem:[%s11436_s27 + $0x70] sm:$0xff]  }
0x1550   : > { %5043 = vmatpush1.bf16.msra.mxu1 %v7663_v43  ;;  %v7683_v37 = vld [vmem:[%s11436_s27 + $0x38] sm:$0xff]   ;;  %6643 = vmatprep.subr.bf16.mxu0 %v7682_v1  ;;  %v7685_v24 = vld [vmem:[%s11436_s27 + $0x30] sm:$0xff]   ;;  %v7686_v17 = vld [vmem:[%s11436_s27 + $0x68] sm:$0xff]  }
0x1551   : > { %5044 = vmatprep.subr.bf16.mxu1 %v7664_v26  ;;  %6644 = vmatpush3.bf16.msra.mxu0 %v7683_v37  ;;  %v7687_v55 = vld [vmem:[%s11436_s27 + $0x28] sm:$0xff]   ;;  %v7688_v42 = vld [vmem:[%s11436_s27 + $0x60] sm:$0xff]   ;;  %v7690_v45 = vld [vmem:[%s11436_s27 + $0x58] sm:$0xff]  }
0x1552   : > { %6645 = vmatprep.subr.bf16.mxu0 %v7684_v29  ;;  %v7689_v46 = vld [vmem:[%s11436_s27 + $0x20] sm:$0xff]   ;;  %v7691_v20 = vld [vmem:[%s11436_s27 + $0x18] sm:$0xff]   ;;  %v7692_v35 = vld [vmem:[%s11436_s27 + $0x50] sm:$0xff]  }
0x1553   : > { %v7693_v58 = vld [vmem:[%s11436_s27 + $0x10] sm:$0xff]   ;;  %v7694_v50 = vld [vmem:[%s11436_s27 + $0x48] sm:$0xff]   ;;  %v7696_v61 = vld [vmem:[%s11436_s27 + $0x40] sm:$0xff]  }
0x1554   : > { %5045 = vmatpush1.bf16.msra.mxu1 %v7666_v49  ;;  %v7695_v8 = vld [vmem:[%s11436_s27 + $0x8] sm:$0xff]   ;;  %v7697_v39 = vld [vmem:[%s11436_s27] sm:$0xff]  }
0x1555   : > { %5046 = vmatprep.subr.bf16.mxu1 %v7667_v32  ;;  %6646 = vmatpush3.bf16.msra.mxu0 %v7685_v24 }
0x1556   : > { %6647 = vmatprep.subr.bf16.mxu0 %v7686_v17 }
0x1558   : > { %5047 = vmatpush1.bf16.msra.mxu1 %v7669_v14 }
0x1559   : > { %5048 = vmatprep.subr.bf16.mxu1 %v7670_v30  ;;  %6648 = vmatpush3.bf16.msra.mxu0 %v7687_v55  ;;  %v6300_v30 = vld [vmem:[%s1782_s22] ss:$0 sm:$0xff] }
0x155a   : > { %6649 = vmatprep.subr.bf16.mxu0 %v7688_v42 }
0x155c   : > { %5049 = vmatpush1.bf16.msra.mxu1 %v7672_v16 }
0x155d   : > { %5050 = vmatprep.subr.bf16.mxu1 %v7673_v33  ;;  %6650 = vmatpush3.bf16.msra.mxu0 %v7689_v46 }
0x155e   : > { %6651 = vmatprep.subr.bf16.mxu0 %v7690_v45 }
0x1560   : > { %5051 = vmatpush1.bf16.msra.mxu1 %v7675_v59 }
0x1561   : > { %5052 = vmatprep.subr.bf16.mxu1 %v7676_v51  ;;  %6652 = vmatpush3.bf16.msra.mxu0 %v7691_v20 }
0x1562   : > { %6653 = vmatprep.subr.bf16.mxu0 %v7692_v35 }
0x1564   : > { %5053 = vmatpush1.bf16.msra.mxu1 %v7678_v62 }
0x1565   : > { %5054 = vmatprep.subr.bf16.mxu1 %v7679_v2  ;;  %6654 = vmatpush3.bf16.msra.mxu0 %v7693_v58 }
0x1566   : > { %6655 = vmatprep.subr.bf16.mxu0 %v7694_v50 }
0x1568   : > { %5055 = vmatpush1.bf16.msra.mxu1 %v7681_v15 }
0x1569   : > { %6656 = vmatpush3.bf16.msra.mxu0 %v7695_v8 }
0x156a   : > { %6657 = vmatprep.subr.bf16.mxu0 %v7696_v61 }
0x156d   : > { %6658 = vmatpush3.bf16.msra.mxu0 %v7697_v39 }
0x15d0   : > { %v4894_v31 = vpop.xlane.xlu0 %4893 }
0x15d1   : > { %v4897_v25 = vmul.f32 0.0078125, %v4894_v31 }
0x15d3   : > { %v10726_v23 = vsub.f32 %v4889_v40, %v4897_v25  ;;  %v4952_v40 = vsub.s32 0, %v4951_v27 }
0x15d4   : > { %v4896_v10 = vpop.xlane.xlu0 %4895 }
0x15d5   : > { %v4898_v34 = vmul.f32 0.0078125, %v4896_v10  ;;  %v4901_v4 = vmul.f32 %v10726_v23, %v10726_v23  ;;  %v4953_v54 = vrot.slane %v4948_v52, %v4952_v40 }
0x15d7   : > { %v10730_v41 = vsub.f32 %v4890_v22, %v4898_v34  ;;  %4903 = vadd.xlane.f32.xlu1 %v4901_v4 }
0x15d9   : > { %v4902_v48 = vmul.f32 %v10730_v41, %v10730_v41 }
0x15db   : > { %4905 = vadd.xlane.f32.xlu1 %v4902_v48 }
0x1660   : > { %v4904_v3 = vpop.xlane.xlu1 %4903 }
0x1661   : > { %v4907_v18 = vmul.f32 0.0078125, %v4904_v3 }
0x1663   : > { %v4909_v21 = vadd.f32 1e-05, %v4907_v18 }
0x1664   : > { %v4906_v47 = vpop.xlane.xlu1 %4905 }
0x1665   : > { %7698 = vrsqrt.f32 %v4909_v21  ;;  %v4908_v6 = vmul.f32 0.0078125, %v4906_v47 }
0x1667   : > { %v4910_v7 = vadd.f32 1e-05, %v4908_v6 }
0x1669   : > { %7700 = vrsqrt.f32 %v4910_v7 }
0x1672   : > { %v7699_v9 = vpop.eup %7698 }
0x1673   : > { %v4913_v56 = vmul.f32 %v7699_v9, %v10726_v23  ;;  %v6317_v9 = vld [vmem:[%s1797_s1] ss:$0 sm:$0xff]  ;;  %s11444_s1 = sld [smem:[#allocation72_spill]] (!%p6281_p9) }
0x1675   : > { %v4921_v53 = vmul.f32 %v6282_v38, %v4913_v56 }
0x1676   : > { %v7701_v0 = vpop.eup %7700 }
0x1677   : > { %v4914_v13 = vmul.f32 %v7701_v0, %v10730_v41  ;;  %v4929_v12 = vadd.f32 %v6283_v60, %v4921_v53 }
0x1679   : > { %v4922_v28 = vmul.f32 %v6282_v38, %v4914_v13  ;;  %v6318_v38 = vld [vmem:[%s1800_s8] ss:$0 sm:$0xff] }
0x167b   : > { %v4930_v63 = vadd.f32 %v6283_v60, %v4922_v28 }
0x167d   : > { %v4931_v44 = vpack.c.bf16 %v4930_v63, %v4929_v12 }
0x167f   : > { %5073 = vmatmul.mubr.bf16.vlgmr.msra.gmra.mxu1 %v4931_v44 }
0x173f   : > { %v5074_v22 = vpop.f32.mrf.mxu1 }
0x1740   : > { %v5075_v34 = vadd.f32 %v5074_v22, %v4953_v54 }
0x1741   : > { %v5076_v31 = vpop.f32.mrf.mxu1 }
0x1742   : > { %v5077_v23 = vadd.f32 %v5076_v31, %v4957_v11  ;;  %v5083_v26 = vmax.f32 %v5075_v34, 0.0 }
0x1743   : > { %v5078_v25 = vpop.f32.mrf.mxu1 }
0x1744   : > { %v5079_v10 = vadd.f32 %v5078_v25, %v4953_v54  ;;  %v5084_v57 = vmax.f32 %v5077_v23, 0.0 }
0x1745   : > { %v5080_v4 = vpop.f32.mrf.mxu1 }
0x1746   : > { %v5081_v41 = vadd.f32 %v5080_v4, %v4957_v11  ;;  %v5085_v48 = vmax.f32 %v5079_v10, 0.0 }
0x1748   : > { %v5086_v43 = vmax.f32 %v5081_v41, 0.0  ;;  %v5087_v32 = vpack.c.bf16 %v5085_v48, %v5083_v26 }
0x174a   : > { %v5088_v49 = vpack.c.bf16 %v5086_v43, %v5084_v57 }
0x174c   : > { %5256 = vmatprep.mubr.bf16.mxu0 %v5088_v49 }
0x174d   : > { %5257 = vmatmul.mubr.bf16.vlgmr.msra.gmra.mxu0 %v5087_v32 }
0x180d   : > { %v6659_v14 = vpop.f32.mrf.mxu0 }
0x180f   : > { %v6660_v16 = vpop.f32.mrf.mxu0 }
0x1810   : > { %v6661_v33 = vadd.f32 %v6660_v16, %v6659_v14 }
0x1811   : > { %v6662_v36 = vpop.f32.mrf.mxu0 }
0x1812   : > { %v5259_v59 = vadd.f32 %v6661_v33, %v6300_v30 }
0x1813   : > { %v6663_v51 = vpop.f32.mrf.mxu0 }
0x1814   : > { %v6664_v62 = vadd.f32 %v6663_v51, %v6662_v36  ;;  %v5265_v2 = vadd.f32 %v5259_v59, %v4929_v12 }
0x1816   : > { %v5262_v15 = vadd.f32 %v6664_v62, %v6300_v30  ;;  %5269 = vadd.xlane.f32.xlu0 %v5265_v2 }
0x1818   : > { %v5266_v1 = vadd.f32 %v5262_v15, %v4930_v63 }
0x181a   : > { %5271 = vadd.xlane.f32.xlu1 %v5266_v1 }
0x189f   : > { %v5270_v37 = vpop.xlane.xlu0 %5269 }
0x18a0   : > { %v5273_v29 = vmul.f32 0.0078125, %v5270_v37 }
0x18a2   : > { %v5275_v24 = vsub.f32 %v5265_v2, %v5273_v29 }
0x18a3   : > { %v5272_v17 = vpop.xlane.xlu1 %5271 }
0x18a4   : > { %v5274_v55 = vmul.f32 0.0078125, %v5272_v17  ;;  %v5277_v42 = vmul.f32 %v5275_v24, %v5275_v24 }
0x18a6   : > { %v5276_v46 = vsub.f32 %v5266_v1, %v5274_v55  ;;  %5279 = vadd.xlane.f32.xlu0 %v5277_v42 }
0x18a8   : > { %v5278_v45 = vmul.f32 %v5276_v46, %v5276_v46 }
0x18aa   : > { %5281 = vadd.xlane.f32.xlu1 %v5278_v45 }
0x192f   : > { %v5280_v20 = vpop.xlane.xlu0 %5279 }
0x1930   : > { %v5283_v3 = vmul.f32 0.0078125, %v5280_v20 }
0x1932   : > { %v5285_v18 = vadd.f32 1e-05, %v5283_v3 }
0x1933   : > { %v5282_v21 = vpop.xlane.xlu1 %5281 }
0x1934   : > { %7702 = vrsqrt.f32 %v5285_v18  ;;  %v5284_v47 = vmul.f32 0.0078125, %v5282_v21 }
0x1936   : > { %v5286_v6 = vadd.f32 1e-05, %v5284_v47 }
0x1938   : > { %7704 = vrsqrt.f32 %v5286_v6 }
0x1941   : > { %v7703_v7 = vpop.eup %7702 }
0x1942   : > { %v5289_v56 = vmul.f32 %v7703_v7, %v5275_v24 }
0x1944   : > { %v5297_v0 = vmul.f32 %v6317_v9, %v5289_v56 }
0x1945   : > { %v7705_v13 = vpop.eup %7704 }
0x1946   : > { %v5305_v53 = vadd.f32 %v6318_v38, %v5297_v0  ;;  %v5290_v60 = vmul.f32 %v7705_v13, %v5276_v46 }
0x1948   : > { %5307 = vst [vmem:[#allocation2] sm:$0xff] %v5305_v53  ;;  %v5298_v28 = vmul.f32 %v6317_v9, %v5290_v60  ;;  %5311 = sbr.rel (%p6281_p9) target bundleno = 6788 (0x1a84), region = 200 }
0x194a   : > { %v5306_v12 = vadd.f32 %v6318_v38, %v5298_v28 }
0x194c   : > { %5308 = vst [vmem:[#allocation2 + $0x8] sm:$0xff] %v5306_v12 }
0x194d   : > { %5314 = vadd.xlane.f32.xlu0 %v5305_v53  ;;  %v6320_v54 = vld [vmem:[%s11444_s1] ss:$0 sm:$0xff] }
0x194e   : > { %v6321_v25 = vld [vmem:[%s11445_s2] ss:$0 sm:$0xff] }
0x1951   : > { %5316 = vadd.xlane.f32.xlu0 %v5306_v12 }
0x19d6   : > { %v5315_v63 = vpop.xlane.xlu0 %5314 }
0x19d7   : > { %v5318_v44 = vmul.f32 0.0078125, %v5315_v63 }
0x19d9   : > { %v5320_v35 = vsub.f32 %v5305_v53, %v5318_v44 }
0x19da   : > { %v5317_v58 = vpop.xlane.xlu0 %5316 }
0x19db   : > { %v5319_v50 = vmul.f32 0.0078125, %v5317_v58  ;;  %v5322_v8 = vmul.f32 %v5320_v35, %v5320_v35 }
0x19dd   : > { %v5321_v61 = vsub.f32 %v5306_v12, %v5319_v50  ;;  %5324 = vadd.xlane.f32.xlu1 %v5322_v8 }
0x19df   : > { %v5323_v39 = vmul.f32 %v5321_v61, %v5321_v61 }
0x19e1   : > { %5326 = vadd.xlane.f32.xlu1 %v5323_v39 }
0x1a66   : > { %v5325_v5 = vpop.xlane.xlu1 %5324 }
0x1a67   : > { %v5328_v27 = vmul.f32 0.0078125, %v5325_v5 }
0x1a69   : > { %v5330_v19 = vadd.f32 1e-05, %v5328_v27 }
0x1a6a   : > { %v5327_v40 = vpop.xlane.xlu1 %5326 }
0x1a6b   : > { %7706 = vrsqrt.f32 %v5330_v19  ;;  %v5329_v52 = vmul.f32 0.0078125, %v5327_v40 }
0x1a6d   : > { %v5331_v22 = vadd.f32 1e-05, %v5329_v52 }
0x1a6f   : > { %7708 = vrsqrt.f32 %v5331_v22 }
0x1a78   : > { %v7707_v11 = vpop.eup %7706 }
0x1a79   : > { %v5334_v31 = vmul.f32 %v7707_v11, %v5320_v35 }
0x1a7b   : > { %v5342_v23 = vmul.f32 %v6320_v54, %v5334_v31 }
0x1a7c   : > { %v7709_v10 = vpop.eup %7708 }
0x1a7d   : > { %v5350_v34 = vadd.f32 %v6321_v25, %v5342_v23  ;;  %v5335_v4 = vmul.f32 %v7709_v10, %v5321_v61 }
0x1a7f   : > { %5352 = vst [vmem:[%s9236_s15] sm:$0xff] %v5350_v34  ;;  %v5343_v41 = vmul.f32 %v6320_v54, %v5335_v4 }
0x1a81   : > { %v5351_v48 = vadd.f32 %v6321_v25, %v5343_v41 }
0x1a83   : > { %5353 = vst [vmem:[%s9236_s15 + $0x8] sm:$0xff] %v5351_v48 }
0x1a84 PF: > { %s11446_s8 = sld [smem:[#allocation86_spill]]  ;;  %s5409_s7 = sshll.u32 %s9239_s16, 4  ;;  %s10797_s7 = int_to_ptr.vmem [resolvable:$true] %s5409_s7 }
0x1a85   : > { %s11447_s29 = sld [smem:[#allocation75_spill]]  ;;  %s8046_s9 = scalar_lea.vmem %s10797_s7, 256 }
0x1a86   : > { %s11448_s19 = sld [smem:[#allocation100_spill]]  ;;  %p8047_p8 = scmp.ne.s32.totalorder %s10797_s7, %s8046_s9 }
0x1a87   : > { %s11449_s11 = sld [smem:[#allocation97_spill]]  ;;  %s8393_s3 = smov [#allocation24]  }
0x1a88   : > { %s8050_s24 = sshll.u32 %s8393_s3, 4  ;;  %s8051_s24 = int_to_ptr.vmem [resolvable:$false] %s8050_s24 }
0x1a89   : > { %s8052_s25 = scalar_lea.vmem %s8051_s24, 512  ;;  %p8053_p3 = scmp.lt.s32.totalorder %s10797_s7, %s8051_s24 }
0x1a8a   : > { %s10790_s21 = sshll.u32 %s11446_s8, 8  ;;  %p8054_p11 = scmp.lt.s32.totalorder %s8052_s25, %s8046_s9 }
0x1a8b   : > { %s10794_s0 = scalar_lea.hbm %s11447_s29, %s10790_s21 }
0x1a8c   : > { %s5360_s30 = scalar_lea.sflag [#allocation25], %s11448_s19  ;;  %p8055_p7 = por %p8054_p11, %p8053_p3 }
0x1a8d   : > { %p11450_p4 = scmp.ne.s32.totalorder %s11449_s11, 0 }
0x1a8f   : > { %p8048_p12 = pnand %p8047_p8, %p11450_p4 }
0x1a91   : > { %p8049_p5 = pneg %p8048_p12 }
0x1a93   : > { %p8056_p13 = pnand %p8055_p7, %p8049_p5 }
0x1a95   : > { %8059 = shalt.err (!%p8056_p13)
}
0x1a96   : > { %s8060_s16 = scalar_lea.hbm %s10794_s0, 256  ;;  %s8064_s10 = scalar_lea.hbm %s11447_s29, 512 }
0x1a97   : > { %p8061_p0 = scmp.ne.s32.totalorder %s10794_s0, %s8060_s16  ;;  %p8065_p1 = scmp.lt.s32.totalorder %s10794_s0, %s11447_s29 }
0x1a98   : > { %p8066_p6 = scmp.lt.s32.totalorder %s8064_s10, %s8060_s16 }
0x1a99   : > { %p8062_p10 = pnand %p8061_p0, %p11450_p4 }
0x1a9a   : > { %p8067_p9 = por %p8066_p6, %p8065_p1 }
0x1a9b   : > { %p8063_p2 = pneg %p8062_p10 }
0x1a9d   : > { %p8068_p8 = pnand %p8067_p9, %p8063_p2 }
0x1a9f   : > { %8071 = shalt.err (!%p8068_p8)
}
0x1aa0   : > { %s8394_s5 = smov 128   ;;  %s11451_s20 = sld [smem:[#allocation76_spill]] }
0x1aa1   : > { %s11452_s23 = sld [smem:[#allocation77_spill]]  ;;  %s8395_s26 = smov 8  }
0x1aa2   : > { %7322 = dma.vmem_to_hbm [thread:$0]  (%p11450_p4), %s10797_s7, 256, %s10794_s0, %s5360_s30, %s8394_s5, %s8394_s5, %s8395_s26  }
0x1aa3   : > { %s6360_s14 = sshll.u32 %s11446_s8, 12  ;;  %s5443_s28 = sshll.u32 %s9245_s6, 4  ;;  %s10829_s28 = int_to_ptr.vmem [resolvable:$true] %s5443_s28 }
0x1aa4   : > { %s5370_s4 = scalar_lea.sflag [#allocation28], %s11448_s19  ;;  %s8072_s1 = scalar_lea.vmem %s10829_s28, 4096 }
0x1aa5   : > { %p8073_p12 = scmp.ne.s32.totalorder %s10829_s28, %s8072_s1  ;;  %s8396_s2 = smov [#allocation27]  }
0x1aa6   : > { %s10824_s18 = scalar_lea.hbm %s11451_s20, %s6360_s14  ;;  %s8076_s9 = sshll.u32 %s8396_s2, 4  ;;  %s8077_s9 = int_to_ptr.vmem [resolvable:$false] %s8076_s9 }
0x1aa7   : > { %s11453_s27 = smov %s11452_s23  ;;  %s10827_s22 = scalar_lea.hbm %s11452_s23, %s6360_s14 }
0x1aa8   : > { %p8074_p5 = pnand %p8073_p12, %p11450_p4  ;;  %s8078_s8 = scalar_lea.vmem %s8077_s9, 8192 }
0x1aa9   : > { %p8079_p11 = scmp.lt.s32.totalorder %s10829_s28, %s8077_s9  ;;  %p8080_p7 = scmp.lt.s32.totalorder %s8078_s8, %s8072_s1 }
0x1aaa   : > { %p8075_p3 = pneg %p8074_p5 }
0x1aab   : > { %p8081_p13 = por %p8080_p7, %p8079_p11 }
0x1aad   : > { %p8082_p0 = pnand %p8081_p13, %p8075_p3 }
0x1aaf   : > { %8085 = shalt.err (!%p8082_p0)
}
0x1ab0   : > { %s8086_s6 = scalar_lea.hbm %s10827_s22, 4096  ;;  %s8090_s0 = scalar_lea.hbm %s11453_s27, 8192 }
0x1ab1   : > { %p8087_p10 = scmp.ne.s32.totalorder %s10827_s22, %s8086_s6  ;;  %p8091_p6 = scmp.lt.s32.totalorder %s10827_s22, %s11453_s27 }
0x1ab2   : > { %p8092_p9 = scmp.lt.s32.totalorder %s8090_s0, %s8086_s6 }
0x1ab3   : > { %p8088_p2 = pnand %p8087_p10, %p11450_p4 }
0x1ab4   : > { %p8093_p8 = por %p8092_p9, %p8091_p6 }
0x1ab5   : > { %p8089_p1 = pneg %p8088_p2 }
0x1ab7   : > { %p8094_p12 = pnand %p8093_p8, %p8089_p1 }
0x1ab9   : > { %8097 = shalt.err (!%p8094_p12)
}
0x1aba   : > { %s11454_s7 = sld [smem:[#allocation74_spill]]  ;;  %s5393_s16 = sshll.u32 %s9236_s15, 4  ;;  %s10858_s16 = int_to_ptr.vmem [resolvable:$true] %s5393_s16 }
0x1abb   : > { %s11456_s24 = sld [smem:[#allocation99_spill]]  ;;  %s5426_s10 = sshll.u32 %s9242_s17, 4  ;;  %s10883_s10 = int_to_ptr.vmem [resolvable:$true] %s5426_s10 }
0x1abc   : > { %7324 = dma.vmem_to_hbm [thread:$0]  (%p11450_p4), %s10829_s28, 4096, %s10827_s22, %s5370_s4, %s8394_s5, %s8394_s5, %s8395_s26  }
0x1abd   : > { %s8098_s14 = scalar_lea.vmem %s10858_s16, 256  ;;  %s8397_s1 = smov [#allocation23]  }
0x1abe   : > { %p8099_p5 = scmp.ne.s32.totalorder %s10858_s16, %s8098_s14  ;;  %s8102_s2 = sshll.u32 %s8397_s1, 4  ;;  %s8103_s2 = int_to_ptr.vmem [resolvable:$false] %s8102_s2 }
0x1abf   : > { %s8104_s9 = scalar_lea.vmem %s8103_s2, 512  ;;  %p8105_p7 = scmp.lt.s32.totalorder %s10858_s16, %s8103_s2 }
0x1ac0   : > { %s11455_s3 = smov %s11454_s7  ;;  %s10855_s25 = scalar_lea.hbm %s11454_s7, %s10790_s21 }
0x1ac1   : > { %s5355_s23 = scalar_lea.sflag [#allocation5], %s11456_s24  ;;  %p8100_p3 = pnand %p8099_p5, %p11450_p4 }
0x1ac2   : > { %p8106_p13 = scmp.lt.s32.totalorder %s8104_s9, %s8098_s14 }
0x1ac3   : > { %p8101_p11 = pneg %p8100_p3 }
0x1ac4   : > { %p8107_p0 = por %p8106_p13, %p8105_p7 }
0x1ac6   : > { %p8108_p10 = pnand %p8107_p0, %p8101_p11 }
0x1ac8   : > { %8111 = shalt.err (!%p8108_p10)
}
0x1ac9   : > { %s8112_s15 = scalar_lea.hbm %s10855_s25, 256  ;;  %s8116_s28 = scalar_lea.hbm %s11455_s3, 512 }
0x1aca   : > { %p8113_p2 = scmp.ne.s32.totalorder %s10855_s25, %s8112_s15  ;;  %p8117_p9 = scmp.lt.s32.totalorder %s10855_s25, %s11455_s3 }
0x1acb   : > { %p8118_p8 = scmp.lt.s32.totalorder %s8116_s28, %s8112_s15 }
0x1acc   : > { %p8114_p1 = pnand %p8113_p2, %p11450_p4 }
0x1acd   : > { %p8119_p12 = por %p8118_p8, %p8117_p9 }
0x1ace   : > { %p8115_p6 = pneg %p8114_p1 }
0x1ad0   : > { %p8120_p5 = pnand %p8119_p12, %p8115_p6 }
0x1ad2   : > { %8123 = shalt.err (!%p8120_p5)
}
0x1ad3   : > { %s11457_s22 = sld [smem:[#allocation78_spill]]  ;;  %s8124_s0 = scalar_lea.vmem %s10883_s10, 4096 }
0x1ad4   : > { %7321 = dma.vmem_to_hbm [thread:$0]  (%p11450_p4), %s10858_s16, 256, %s10855_s25, %s5355_s23, %s8394_s5, %s8394_s5, %s8395_s26  }
0x1ad5   : > { %p8125_p3 = scmp.ne.s32.totalorder %s10883_s10, %s8124_s0  ;;  %s8398_s7 = smov [#allocation26]  }
0x1ad6   : > { %s8128_s14 = sshll.u32 %s8398_s7, 4  ;;  %s8129_s14 = int_to_ptr.vmem [resolvable:$false] %s8128_s14 }
0x1ad7   : > { %p8126_p11 = pnand %p8125_p3, %p11450_p4  ;;  %s8130_s1 = scalar_lea.vmem %s8129_s14, 8192 }
0x1ad8   : > { %p8131_p13 = scmp.lt.s32.totalorder %s10883_s10, %s8129_s14  ;;  %p8132_p0 = scmp.lt.s32.totalorder %s8130_s1, %s8124_s0 }
0x1ad9   : > { %s11458_s8 = smov %s11457_s22  ;;  %s10887_s6 = scalar_lea.hbm %s11457_s22, %s10790_s21 }
0x1ada   : > { %p8127_p7 = pneg %p8126_p11  ;;  %p8133_p10 = por %p8132_p0, %p8131_p13 }
0x1adc   : > { %p8134_p2 = pnand %p8133_p10, %p8127_p7 }
0x1ade   : > { %8137 = shalt.err (!%p8134_p2)
}
0x1adf   : > { %s8138_s17 = scalar_lea.hbm %s10824_s18, 4096  ;;  %s8142_s25 = scalar_lea.hbm %s11451_s20, 8192 }
0x1ae0   : > { %p8139_p1 = scmp.ne.s32.totalorder %s10824_s18, %s8138_s17  ;;  %p8143_p8 = scmp.lt.s32.totalorder %s10824_s18, %s11451_s20 }
0x1ae1   : > { %p8144_p12 = scmp.lt.s32.totalorder %s8142_s25, %s8138_s17 }
0x1ae2   : > { %p8140_p6 = pnand %p8139_p1, %p11450_p4 }
0x1ae3   : > { %p8145_p5 = por %p8144_p12, %p8143_p8 }
0x1ae4   : > { %p8141_p9 = pneg %p8140_p6 }
0x1ae6   : > { %p8146_p3 = pnand %p8145_p5, %p8141_p9 }
0x1ae8   : > { %8149 = shalt.err (!%p8146_p3)
}
0x1ae9   : > { %s11459_s16 = sld [smem:[#allocation79_spill]]  ;;  %s5459_s23 = sshll.u32 %s9248_s12, 4  ;;  %s10911_s23 = int_to_ptr.vmem [resolvable:$true] %s5459_s23 }
0x1aea   : > { %7323 = dma.vmem_to_hbm [thread:$0]  (%p11450_p4), %s10883_s10, 4096, %s10824_s18, %s5360_s30, %s8394_s5, %s8394_s5, %s8395_s26  }
0x1aeb   : > { %s8150_s9 = scalar_lea.vmem %s10911_s23, 256  ;;  %s8399_s15 = smov [#allocation29]  }
0x1aec   : > { %p8151_p11 = scmp.ne.s32.totalorder %s10911_s23, %s8150_s9  ;;  %s8154_s28 = sshll.u32 %s8399_s15, 4  ;;  %s8155_s28 = int_to_ptr.vmem [resolvable:$false] %s8154_s28 }
0x1aed   : > { %s8156_s22 = scalar_lea.vmem %s8155_s28, 512  ;;  %p8157_p0 = scmp.lt.s32.totalorder %s10911_s23, %s8155_s28 }
0x1aee   : > { %p8152_p7 = pnand %p8151_p11, %p11450_p4  ;;  %p8158_p10 = scmp.lt.s32.totalorder %s8156_s22, %s8150_s9 }
0x1aef   : > { %s10915_s2 = scalar_lea.hbm %s11459_s16, %s10790_s21 }
0x1af0   : > { %p8153_p13 = pneg %p8152_p7  ;;  %p8159_p2 = por %p8158_p10, %p8157_p0 }
0x1af2   : > { %p8160_p1 = pnand %p8159_p2, %p8153_p13 }
0x1af4   : > { %8163 = shalt.err (!%p8160_p1)
}
0x1af5   : > { %s8164_s12 = scalar_lea.hbm %s10887_s6, 256  ;;  %s8168_s21 = scalar_lea.hbm %s11458_s8, 512 }
0x1af6   : > { %p8165_p6 = scmp.ne.s32.totalorder %s10887_s6, %s8164_s12  ;;  %p8169_p12 = scmp.lt.s32.totalorder %s10887_s6, %s11458_s8 }
0x1af7   : > { %p8170_p5 = scmp.lt.s32.totalorder %s8168_s21, %s8164_s12 }
0x1af8   : > { %p8166_p9 = pnand %p8165_p6, %p11450_p4 }
0x1af9   : > { %p8171_p3 = por %p8170_p5, %p8169_p12 }
0x1afa   : > { %p8167_p8 = pneg %p8166_p9 }
0x1afc   : > { %p8172_p11 = pnand %p8171_p3, %p8167_p8 }
0x1afe   : > { %8175 = shalt.err (!%p8172_p11)
}
0x1aff   : > { %7325 = dma.vmem_to_hbm [thread:$0]  (%p11450_p4), %s10911_s23, 256, %s10887_s6, %s5370_s4, %s8394_s5, %s8394_s5, %s8395_s26  }
0x1b00   : > { %s5475_s30 = sshll.u32 %s9251_s13, 4  ;;  %s5380_s18 = scalar_lea.sflag [#allocation31], %s11456_s24  ;;  %s10939_s30 = int_to_ptr.vmem [resolvable:$true] %s5475_s30 }
0x1b01   : > { %s8176_s10 = scalar_lea.vmem %s10939_s30, 256  ;;  %s8400_s0 = smov [#allocation30]  }
0x1b02   : > { %p8177_p7 = scmp.ne.s32.totalorder %s10939_s30, %s8176_s10  ;;  %s8180_s19 = sshll.u32 %s8400_s0, 4  ;;  %s8181_s19 = int_to_ptr.vmem [resolvable:$false] %s8180_s19 }
0x1b03   : > { %s8182_s7 = scalar_lea.vmem %s8181_s19, 512  ;;  %p8183_p10 = scmp.lt.s32.totalorder %s10939_s30, %s8181_s19 }
0x1b04   : > { %p8178_p13 = pnand %p8177_p7, %p11450_p4  ;;  %p8184_p2 = scmp.lt.s32.totalorder %s8182_s7, %s8176_s10 }
0x1b06   : > { %p8179_p0 = pneg %p8178_p13  ;;  %p8185_p1 = por %p8184_p2, %p8183_p10 }
0x1b08   : > { %p8186_p6 = pnand %p8185_p1, %p8179_p0 }
0x1b0a   : > { %8189 = shalt.err (!%p8186_p6)
}
0x1b0b   : > { %s8190_s13 = scalar_lea.hbm %s10915_s2, 256  ;;  %s8194_s4 = scalar_lea.hbm %s11459_s16, 512 }
0x1b0c   : > { %p8191_p9 = scmp.ne.s32.totalorder %s10915_s2, %s8190_s13  ;;  %p8195_p5 = scmp.lt.s32.totalorder %s10915_s2, %s11459_s16 }
0x1b0d   : > { %p8196_p3 = scmp.lt.s32.totalorder %s8194_s4, %s8190_s13 }
0x1b0e   : > { %p8192_p8 = pnand %p8191_p9, %p11450_p4 }
0x1b0f   : > { %p8197_p11 = por %p8196_p3, %p8195_p5 }
0x1b10   : > { %p8193_p12 = pneg %p8192_p8 }
0x1b12   : > { %p8198_p7 = pnand %p8197_p11, %p8193_p12 }
0x1b14   : > { %8201 = shalt.err (!%p8198_p7)
}
0x1b15   : > { %7326 = dma.vmem_to_hbm [thread:$0]  (%p11450_p4), %s10939_s30, 256, %s10915_s2, %s5380_s18, %s8394_s5, %s8394_s5, %s8395_s26  }
0x1b16 PF: > { %s11460_s24 = sld [smem:[#allocation89_spill]] }
0x1b17   : > { %s11461_s6 = sld [smem:[#allocation82_spill]] }
0x1b18   : > { %s11462_s14 = sld [smem:[#allocation98_spill]] }
0x1b1c   : > { %p7390_p13 = scmp.ge.s32.totalorder %s11460_s24, 2 }
0x1b1d   : > { %s5490_s1 = sand.u32 1, %s11461_s6  }
0x1b1e   : > { %p11463_p0 = scmp.ne.s32.totalorder %s11462_s14, 0  ;;  %s5491_s17 = scalar_lea.sflag [#allocation5], %s5490_s1 }
0x1b20   : > { %p7371_p10 = pnand %p7390_p13, %p11463_p0 }
0x1b22   : > { %p7372_p2 = pneg %p7371_p10 }
0x1b24   : > { %8279 = dma.done.wait (%p7372_p2), %s5491_s17, 256  }
0x1b25   : > { %8281 = vsyncadd (%p7372_p2), %s5491_s17, 4294967040  ;;  %s11464_s11 = sadd.s32 4294967294, %s11460_s24  }
0x1b26   : > { %s5499_s25 = sand.u32 1, %s11464_s11  }
0x1b27   : > { %s5500_s23 = scalar_lea.sflag [#allocation25], %s5499_s25 }
0x1b28   : > { %8283 = dma.done.wait (%p7372_p2), %s5500_s23, 4352  }
0x1b29   : > { %8285 = vsyncadd (%p7372_p2), %s5500_s23, 4294962944  ;;  %s5518_s9 = scalar_lea.sflag [#allocation28], %s5499_s25 }
0x1b2a   : > { %8287 = dma.done.wait (%p7372_p2), %s5518_s9, 4352  }
0x1b2b   : > { %8289 = vsyncadd (%p7372_p2), %s5518_s9, 4294962944  ;;  %s5536_s5 = scalar_lea.sflag [#allocation31], %s5490_s1 }
0x1b2c   : > { %8291 = dma.done.wait (%p7372_p2), %s5536_s5, 256  }
0x1b2d   : > { %8293 = vsyncadd (%p7372_p2), %s5536_s5, 4294967040  ;;  %s115_s15 = sadd.s32 1, %s11460_s24   ;;  %s11465_s0 = sld [smem:[#allocation80_spill]] }
0x1b2e   : > { %p112_p4 = scmp.ge.s32.totalorder %s115_s15, 6   ;;  %s11466_s22 = sld [smem:[#allocation81_spill]] }
0x1b2f   : > { %s11467_s23 = sld [smem:[#allocation94_spill]] }
0x1b30   : > { %s11468_s26 = sld [smem:[#allocation83_spill]] }
0x1b31   : > { %s11469_s28 = sld [smem:[#allocation84_spill]] }
0x1b32   : > { %s11470_s1 = sld [smem:[#allocation95_spill]]  ;;  %114 = sbr.rel (!%p112_p4) target bundleno = 105 (0x69), region = 494 }
0x1b33   : > { %s11471_s2 = sld [smem:[#allocation87_spill]] }
0x1b34   : > { %s11472_s7 = sld [smem:[#allocation88_spill]] }
0x1b35   : > { %s11473_s10 = sld [smem:[#allocation91_spill]] }
0x1b36   : > { %s11474_s11 = sld [smem:[#allocation92_spill]] }
0x1b37   :  { %5541 = vsyncpa [#allocation4], 1 }
0x1b38   :  { %5543 = vsyncpa [#allocation4 + $0x1], 1 }
0x1b39   :  { %5544 = vsyncpa [#allocation7], 1 }
0x1b3a   :  { %5546 = vsyncpa [#allocation7 + $0x1], 1 }
0x1b3b   :  { %5547 = vsyncpa [#allocation10], 1 }
0x1b3c   :  { %5549 = vsyncpa [#allocation10 + $0x1], 1 }
0x1b3d   :  { %5550 = vsyncpa [#allocation13], 1 }
0x1b3e   :  { %5552 = vsyncpa [#allocation13 + $0x1], 1 }
0x1b3f   :  { %5553 = vsyncpa [#allocation16], 1 }
0x1b40   :  { %5555 = vsyncpa [#allocation16 + $0x1], 1 }
0x1b41   :  { %5556 = vsyncpa [#allocation19], 1 }
0x1b42   :  { %5558 = vsyncpa [#allocation19 + $0x1], 1 }
0x1b43   :  { %5559 = vsyncpa [#allocation22], 1 }
0x1b44   :  { %5561 = vsyncpa [#allocation22 + $0x1], 1 }
0x1b45   :  { %5562 = vsyncpa [#allocation5], 1 }
0x1b46   :  { %5564 = vsyncpa [#allocation5 + $0x1], 1 }
0x1b47   :  { %5565 = vsyncpa [#allocation25], 1 }
0x1b48   :  { %5567 = vsyncpa [#allocation25 + $0x1], 1 }
0x1b49   :  { %5568 = vsyncpa [#allocation28], 1 }
0x1b4a   :  { %5570 = vsyncpa [#allocation28 + $0x1], 1 }
0x1b4b   :  { %5571 = vsyncpa [#allocation31], 1 }
0x1b4c   :  { %5573 = vsyncpa [#allocation31 + $0x1], 1 }

</bundles_post_ra>
